<compile_context>
chip_gen: v7x
topology: tpu7x:2x2x1
jax: 0.10.0
libtpu: 0.0.40
codegen_flags: <defaults>
</compile_context>

<pallas_src>
import functools

import jax
import jax.numpy as jnp
from jax.experimental import pallas as pl
from jax.experimental.pallas import tpu as pltpu

_LANE = 128      # feature dims padded to multiples of this (lane-dense stores)
_ROW_TILE = 16   # row-tile granularity: native bf16 packing is (16, 128)


def _round_up(n, m):
    return ((n + m - 1) // m) * m


def _tpu_vmem_capacity_bytes():
    """Physical VMEM per TensorCore; conservative fallback if the query fails."""
    try:
        info = pltpu.get_tpu_info()
        cap = getattr(info, "vmem_capacity_bytes", None)
        if cap:
            return int(cap)
    except Exception:
        pass
    return 64 * (1 << 20)   # v7x-sized fallback (safe lower bound)


def _mlp_encoder_kernel(x_ref, b_ref, *refs, n_hidden, mxu_dtype):
    """Fused MLP + L2-normalize for one (tile_v, S*A) row tile.

    refs = (w_in, [w_hidden_stack], w_out, out_ref).  Matmuls run on the MXU in
    `mxu_dtype` with f32 accumulation; bias add / ReLU / normalize stay in f32.
    """
    out_ref = refs[-1]
    w_in_ref = refs[0]
    w_out_ref = refs[-2]
    w_hid_ref = refs[1] if n_hidden > 0 else None

    b_all = b_ref[...]                        # (L, max_out_pad) f32, resident
    h = x_ref[...].astype(mxu_dtype)          # in-kernel cast; K dim unpadded

    def linear(h, w, bias_row, relu):
        acc = jnp.dot(h, w, preferred_element_type=jnp.float32) + bias_row
        return jnp.maximum(acc, 0.0) if relu else acc

    w0 = w_in_ref[...]                        # (S*A, w_pad)
    acc = linear(h, w0, b_all[0:1, :w0.shape[1]], relu=True)
    for l in range(n_hidden):                 # static loop over stacked weights
        wl = w_hid_ref[l]                     # (w_pad, w_pad)
        acc = linear(acc.astype(mxu_dtype), wl,
                     b_all[l + 1:l + 2, :wl.shape[1]], relu=True)
    w_last = w_out_ref[...]                   # (w_pad, d_pad)
    acc = linear(acc.astype(mxu_dtype), w_last,
                 b_all[n_hidden + 1:n_hidden + 2, :w_last.shape[1]], relu=False)

    # TODO(synk): Distance.normalize is unspecified in the reference code; we
    # implement L2 unit-norm rows ("Encoded sequences, normalized").  Padded
    # output columns are exactly zero, so the norm over d_pad == norm over D.
    sq = jnp.sum(acc * acc, axis=-1, keepdims=True)
    out_ref[...] = (acc * jax.lax.rsqrt(sq + 1e-12)).astype(out_ref.dtype)


def _vmem_need_bytes(tile_v, sa, d_pad, max_dim_pad, param_bytes, param_bufs,
                     out_itemsize):
    return (2 * tile_v * sa * 4                    # double-buffered input tiles (f32)
            + 2 * tile_v * d_pad * out_itemsize    # double-buffered output tiles
            + param_bufs * param_bytes             # resident weights + bias stack
            + 4 * tile_v * max_dim_pad * 4)        # activation temporaries


def _choose_tile_v(V, sa, d_pad, max_dim_pad, param_bytes, out_itemsize, budget,
                   prefer_multi_step):
    v_cap = _round_up(max(V, 1), _ROW_TILE)
    if prefer_multi_step and V > _ROW_TILE:
        # Small-VMEM parts (v7x): keep the "parallel" row axis at >= 2 (even)
        # grid steps so it can shard across the two TensorCores.
        v_cap = max(_ROW_TILE, _round_up((V + 1) // 2, _ROW_TILE))
    for t in (2048, 1024, 512, 256, 128, 64, 32, 16):
        if t > v_cap:
            continue
        if _vmem_need_bytes(t, sa, d_pad, max_dim_pad, param_bytes, 1,
                            out_itemsize) <= budget:
            return t
    return _ROW_TILE


def mlp_sequence_encoder(sequences_VxSxA, weights, biases, *, tile_v=None,
                         use_bf16=True, out_dtype=jnp.float32):
    """Fused MLPSequenceEncoder forward.

    Args:
      sequences_VxSxA: (V, S, A) float32.
      weights: [ (S*A, width), (width, width) * (depth-1), (width, D) ] f32,
               stored so that y = x @ W + b.
      biases:  matching (out,) f32 vectors.
      tile_v:  rows per grid step (multiple of 8, 16 preferred); auto if None.
      use_bf16: cast matmul inputs to bfloat16 (f32 accumulation) for the MXU.
      out_dtype: output dtype (bf16 halves output HBM traffic).
    Returns:
      (V, D) L2-normalized embeddings in `out_dtype`.
    """
    V, S, A = sequences_VxSxA.shape
    sa = S * A
    L = len(weights)
    assert L >= 2 and len(biases) == L
    width = weights[0].shape[1]
    D = weights[-1].shape[1]
    n_hidden = L - 2
    assert weights[0].shape == (sa, width)
    for w in weights[1:-1]:
        assert w.shape == (width, width), "hidden layers must be width x width"
    assert weights[-1].shape == (width, D)

    compute_dtype = jnp.bfloat16 if use_bf16 else jnp.float32
    w_itemsize = jnp.dtype(compute_dtype).itemsize
    out_itemsize = jnp.dtype(out_dtype).itemsize

    # Lane-dense padding of width / D only (zero padding is exact); layer-0 K
    # stays at the real S*A so x is consumed straight from HBM without a pad
    # pass.  TODO(synk): pad to 256-multiples when widths are large enough to
    # make the 2x256x256 MXU the binding unit (not the case at width=32).
    w_pad = _round_up(width, _LANE)
    d_pad = _round_up(D, _LANE)
    max_out_pad = max(w_pad, d_pad)
    max_dim_pad = max(_round_up(sa, _LANE), w_pad, d_pad)

    # Pad + cast parameters once, outside the kernel / grid loop.
    w_in_p = jnp.zeros((sa, w_pad), compute_dtype).at[:, :width].set(
        weights[0].astype(compute_dtype))
    w_out_p = jnp.zeros((w_pad, d_pad), compute_dtype).at[:width, :D].set(
        weights[-1].astype(compute_dtype))
    w_hid_p = None
    if n_hidden > 0:
        w_hid_p = jnp.zeros((n_hidden, w_pad, w_pad), compute_dtype)
        for l in range(n_hidden):
            w_hid_p = w_hid_p.at[l, :width, :width].set(
                weights[1 + l].astype(compute_dtype))
    b_stack = jnp.zeros((L, max_out_pad), jnp.float32)
    for l, b in enumerate(biases):
        b_stack = b_stack.at[l, :b.shape[0]].set(b.astype(jnp.float32))

    param_bytes = ((sa * w_pad + n_hidden * w_pad * w_pad + w_pad * d_pad)
                   * w_itemsize + L * max_out_pad * 4)

    vmem_cap = _tpu_vmem_capacity_bytes()
    budget = int(vmem_cap * 0.8)                      # Mosaic scratch headroom
    prefer_multi_step = vmem_cap < 96 * (1 << 20)     # v7x proxy (2 TCs / 64 MiB)

    min_need = _vmem_need_bytes(_ROW_TILE, sa, d_pad, max_dim_pad, param_bytes,
                                1, out_itemsize)
    if min_need > budget:
        # TODO(synk): fall back to a K-/layer-tiled variant (second grid axis or
        # pltpu.emit_pipeline over weight chunks) instead of failing.
        raise ValueError(
            f"resident MLP parameters need {min_need} B of VMEM which exceeds "
            f"the {budget} B budget on this TPU generation")

    if tile_v is None:
        tile_v = _choose_tile_v(V, sa, d_pad, max_dim_pad, param_bytes,
                                out_itemsize, budget, prefer_multi_step)
    assert tile_v % 8 == 0, "tile_v must be a multiple of 8 (16 preferred for bf16)"

    # Ragged last block: reads of out-of-range rows are padded, writes masked.
    grid = (pl.cdiv(V, tile_v),)

    # vmem_limit covers the worst case (params double-buffered) so the
    # no-Buffered(1) fallback path also fits.
    need_worst = _vmem_need_bytes(tile_v, sa, d_pad, max_dim_pad, param_bytes,
                                  2, out_itemsize)
    vmem_limit = int(min(max(need_worst + (8 << 20), 32 << 20),
                         vmem_cap - (8 << 20)))

    flops = 2 * V * (sa * w_pad + n_hidden * w_pad * w_pad + w_pad * d_pad)
    flops += 4 * V * d_pad                            # normalize epilogue
    bytes_accessed = V * sa * 4 + V * d_pad * out_itemsize + param_bytes
    cost = pl.CostEstimate(flops=int(flops), transcendentals=int(V),
                           bytes_accessed=int(bytes_accessed))

    kernel_fn = functools.partial(_mlp_encoder_kernel, n_hidden=n_hidden,
                                  mxu_dtype=compute_dtype)

    x2d = sequences_VxSxA.reshape(V, sa)              # free reshape, no pad/cast

    def build(single_buffer_params):
        pm = {"pipeline_mode": pl.Buffered(1)} if single_buffer_params else {}

        def const_map(ndim):
            def im(i):
                return (0,) * ndim
            return im

        in_specs = [
            pl.BlockSpec((tile_v, sa), lambda i: (i, 0)),
            pl.BlockSpec(b_stack.shape, const_map(2), **pm),
            pl.BlockSpec(w_in_p.shape, const_map(2), **pm),
        ]
        if n_hidden > 0:
            in_specs.append(pl.BlockSpec(w_hid_p.shape, const_map(3), **pm))
        in_specs.append(pl.BlockSpec(w_out_p.shape, const_map(2), **pm))
        # TODO(synk): on v7x, sweep pl.Buffered(3) on the x/out specs once the
        # params are single-buffered (DMA-latency bound at these tiny widths).
        out_spec = pl.BlockSpec((tile_v, d_pad), lambda i: (i, 0))

        return pl.pallas_call(
            kernel_fn,
            out_shape=jax.ShapeDtypeStruct((V, d_pad), out_dtype),
            grid_spec=pltpu.PrefetchScalarGridSpec(
                num_scalar_prefetch=0,
                grid=grid,
                in_specs=in_specs,
                out_specs=out_spec,
            ),
            compiler_params=pltpu.CompilerParams(
                dimension_semantics=("parallel",),
                vmem_limit_bytes=vmem_limit,
            ),
            cost_estimate=cost,
        )

    args = [x2d, b_stack, w_in_p] + ([w_hid_p] if n_hidden > 0 else []) + [w_out_p]
    try:
        out_padded = build(single_buffer_params=True)(*args)
    except Exception:
        # Installed Pallas rejects Buffered(1): fall back to default buffering.
        out_padded = build(single_buffer_params=False)(*args)

    return out_padded[:, :D]


def init_params(key, in_features, out_features, width, depth):
    """Deterministic init matching the MLP module's layer shapes.

    Layers: Linear(in, width), [Linear(width, width)] * (depth-1), Linear(width, D).
    Weights stored transposed relative to torch (in, out) so y = x @ W + b.
    """
    dims = [in_features] + [width] * depth + [out_features]
    weights, biases = [], []
    for i in range(len(dims) - 1):
        key, wk, bk = jax.random.split(key, 3)
        bound = 1.0 / jnp.sqrt(dims[i])
        weights.append(
            jax.random.uniform(wk, (dims[i], dims[i + 1]), jnp.float32, -bound, bound))
        biases.append(
            jax.random.uniform(bk, (dims[i + 1],), jnp.float32, -bound, bound))
    return weights, biases


def reference_forward(sequences_VxSxA, weights, biases, *,
                      matmul_dtype=jnp.float32):
    """Pure-JAX reference of MLPSequenceEncoder.forward (for validation)."""
    V = sequences_VxSxA.shape[0]
    h = sequences_VxSxA.reshape(V, -1).astype(jnp.float32)
    n = len(weights)
    for i, (w, b) in enumerate(zip(weights, biases)):
        h = jnp.dot(h.astype(matmul_dtype), w.astype(matmul_dtype),
                    preferred_element_type=jnp.float32) + b.astype(jnp.float32)
        if i < n - 1:
            h = jnp.maximum(h, 0.0)
    norm_sq = jnp.sum(h * h, axis=-1, keepdims=True)
    return h * jax.lax.rsqrt(norm_sq + 1e-12)


if __name__ == "__main__":
    # Small but non-trivial shapes: V=1000 sequences, S=16 sites, A=4 letters,
    # D=16 dims, width=32, depth=3 (layers: 64->32, 32->32, 32->32, 32->16).
    # V=1000 exercises the ragged last row block and a multi-step grid.
    V, S, A, D, WIDTH, DEPTH = 1000, 16, 4, 16, 32, 3

    key = jax.random.PRNGKey(0)
    key, xk = jax.random.split(key)
    sequences = jax.random.uniform(xk, (V, S, A), jnp.float32)
    weights, biases = init_params(key, S * A, D, WIDTH, DEPTH)

    # Default path: bf16 MXU inputs, f32 output, auto row tile.
    out = jax.block_until_ready(mlp_sequence_encoder(sequences, weights, biases))
    assert out.shape == (V, D)

    # Tight check against a reference using the same bf16 matmul inputs.
    ref_bf16 = reference_forward(sequences, weights, biases,
                                 matmul_dtype=jnp.bfloat16)
    assert jnp.allclose(out, ref_bf16, atol=1e-4, rtol=1e-4), \
        "mismatch vs bf16-matched reference"

    # Loose sanity check vs the pure-f32 reference (bf16 quantization error).
    ref_f32 = reference_forward(sequences, weights, biases)
    assert float(jnp.max(jnp.abs(out - ref_f32))) < 0.08, \
        "mismatch vs f32 reference"

    # Full-f32 kernel path must match the f32 reference tightly.
    out_f32 = jax.block_until_ready(
        mlp_sequence_encoder(sequences, weights, biases, use_bf16=False))
    assert jnp.allclose(out_f32, ref_f32, atol=1e-5, rtol=1e-5), \
        "mismatch (f32 path) vs f32 reference"

    # bf16-output path (halves output HBM traffic); loose bf16-rounding check.
    out_bf16 = jax.block_until_ready(
        mlp_sequence_encoder(sequences, weights, biases, out_dtype=jnp.bfloat16))
    assert out_bf16.dtype == jnp.bfloat16
    assert float(jnp.max(jnp.abs(out_bf16.astype(jnp.float32) - ref_bf16))) < 0.02, \
        "mismatch (bf16 output) vs bf16-matched reference"

    print("KERNEL_OK")
</pallas_src>

<mosaic_0001>
module attributes {stable_mosaic.version = 11 : i64} {
  func.func @_mlp_encoder_kernel(%arg0: i32, %arg1: memref<512x64xf32, #tpu.memory_space<vmem>>, %arg2: memref<4x128xf32, #tpu.memory_space<vmem>>, %arg3: memref<64x128xbf16, #tpu.memory_space<vmem>>, %arg4: memref<2x128x128xbf16, #tpu.memory_space<vmem>>, %arg5: memref<128x128xbf16, #tpu.memory_space<vmem>>, %arg6: memref<512x128xf32, #tpu.memory_space<vmem>>) attributes {dimension_semantics = [#tpu.dimension_semantics<parallel>], iteration_bounds = array<i64: 2>, scalar_prefetch = 0 : i64, scratch_operands = 0 : i64, tpu.core_type = #tpu.core_type<tc>, window_params = [{transform_indices = @transform_0, window_bounds = array<i64: 512, 64>}, {pipeline_mode = #tpu.pipeline_mode<synchronous>, transform_indices = @transform_1, window_bounds = array<i64: 4, 128>}, {pipeline_mode = #tpu.pipeline_mode<synchronous>, transform_indices = @transform_2, window_bounds = array<i64: 64, 128>}, {pipeline_mode = #tpu.pipeline_mode<synchronous>, transform_indices = @transform_3, window_bounds = array<i64: 2, 128, 128>}, {pipeline_mode = #tpu.pipeline_mode<synchronous>, transform_indices = @transform_4, window_bounds = array<i64: 128, 128>}, {transform_indices = @transform_5, window_bounds = array<i64: 512, 128>}]} {
    %c0 = arith.constant 0 : index
    %c0_0 = arith.constant 0 : index
    %0 = vector.load %arg2[%c0, %c0_0] : memref<4x128xf32, #tpu.memory_space<vmem>>, vector<4x128xf32>
    %c0_1 = arith.constant 0 : index
    %c0_2 = arith.constant 0 : index
    %1 = vector.load %arg1[%c0_1, %c0_2] : memref<512x64xf32, #tpu.memory_space<vmem>>, vector<512x64xf32>
    %2 = arith.truncf %1 : vector<512x64xf32> to vector<512x64xbf16>
    %c0_3 = arith.constant 0 : index
    %c0_4 = arith.constant 0 : index
    %3 = vector.load %arg3[%c0_3, %c0_4] : memref<64x128xbf16, #tpu.memory_space<vmem>>, vector<64x128xbf16>
    %4 = vector.extract_strided_slice %0 {offsets = [0, 0], sizes = [1, 128], strides = [1, 1]} : vector<4x128xf32> to vector<1x128xf32>
    %cst = arith.constant dense<0.000000e+00> : vector<512x128xf32>
    %5 = tpu.matmul %2, %3, %cst {dimension_numbers = #tpu.dot_dimension_numbers<[1], [0], [0], [1], [0, 0, 1, 1], [], []>} : vector<512x64xbf16>, vector<64x128xbf16>, vector<512x128xf32> -> vector<512x128xf32>
    %6 = vector.broadcast %4 : vector<1x128xf32> to vector<512x128xf32>
    %7 = arith.addf %5, %6 : vector<512x128xf32>
    %cst_5 = arith.constant 0.000000e+00 : f32
    %8 = vector.broadcast %cst_5 : f32 to vector<512x128xf32>
    %9 = arith.maximumf %7, %8 : vector<512x128xf32>
    %c0_6 = arith.constant 0 : index
    %c0_7 = arith.constant 0 : index
    %c0_8 = arith.constant 0 : index
    %10 = vector.load %arg4[%c0_6, %c0_7, %c0_8] : memref<2x128x128xbf16, #tpu.memory_space<vmem>>, vector<1x128x128xbf16>
    %11 = vector.shape_cast %10 : vector<1x128x128xbf16> to vector<128x128xbf16>
    %12 = arith.truncf %9 : vector<512x128xf32> to vector<512x128xbf16>
    %13 = vector.extract_strided_slice %0 {offsets = [1, 0], sizes = [1, 128], strides = [1, 1]} : vector<4x128xf32> to vector<1x128xf32>
    %cst_9 = arith.constant dense<0.000000e+00> : vector<512x128xf32>
    %14 = tpu.matmul %12, %11, %cst_9 {dimension_numbers = #tpu.dot_dimension_numbers<[1], [0], [0], [1], [0, 0, 1, 1], [], []>} : vector<512x128xbf16>, vector<128x128xbf16>, vector<512x128xf32> -> vector<512x128xf32>
    %15 = vector.broadcast %13 : vector<1x128xf32> to vector<512x128xf32>
    %16 = arith.addf %14, %15 : vector<512x128xf32>
    %cst_10 = arith.constant 0.000000e+00 : f32
    %17 = vector.broadcast %cst_10 : f32 to vector<512x128xf32>
    %18 = arith.maximumf %16, %17 : vector<512x128xf32>
    %c1 = arith.constant 1 : index
    %c0_11 = arith.constant 0 : index
    %c0_12 = arith.constant 0 : index
    %19 = vector.load %arg4[%c1, %c0_11, %c0_12] : memref<2x128x128xbf16, #tpu.memory_space<vmem>>, vector<1x128x128xbf16>
    %20 = vector.shape_cast %19 : vector<1x128x128xbf16> to vector<128x128xbf16>
    %21 = arith.truncf %18 : vector<512x128xf32> to vector<512x128xbf16>
    %22 = vector.extract_strided_slice %0 {offsets = [2, 0], sizes = [1, 128], strides = [1, 1]} : vector<4x128xf32> to vector<1x128xf32>
    %cst_13 = arith.constant dense<0.000000e+00> : vector<512x128xf32>
    %23 = tpu.matmul %21, %20, %cst_13 {dimension_numbers = #tpu.dot_dimension_numbers<[1], [0], [0], [1], [0, 0, 1, 1], [], []>} : vector<512x128xbf16>, vector<128x128xbf16>, vector<512x128xf32> -> vector<512x128xf32>
    %24 = vector.broadcast %22 : vector<1x128xf32> to vector<512x128xf32>
    %25 = arith.addf %23, %24 : vector<512x128xf32>
    %cst_14 = arith.constant 0.000000e+00 : f32
    %26 = vector.broadcast %cst_14 : f32 to vector<512x128xf32>
    %27 = arith.maximumf %25, %26 : vector<512x128xf32>
    %c0_15 = arith.constant 0 : index
    %c0_16 = arith.constant 0 : index
    %28 = vector.load %arg5[%c0_15, %c0_16] : memref<128x128xbf16, #tpu.memory_space<vmem>>, vector<128x128xbf16>
    %29 = arith.truncf %27 : vector<512x128xf32> to vector<512x128xbf16>
    %30 = vector.extract_strided_slice %0 {offsets = [3, 0], sizes = [1, 128], strides = [1, 1]} : vector<4x128xf32> to vector<1x128xf32>
    %cst_17 = arith.constant dense<0.000000e+00> : vector<512x128xf32>
    %31 = tpu.matmul %29, %28, %cst_17 {dimension_numbers = #tpu.dot_dimension_numbers<[1], [0], [0], [1], [0, 0, 1, 1], [], []>} : vector<512x128xbf16>, vector<128x128xbf16>, vector<512x128xf32> -> vector<512x128xf32>
    %32 = vector.broadcast %30 : vector<1x128xf32> to vector<512x128xf32>
    %33 = arith.addf %31, %32 : vector<512x128xf32>
    %34 = arith.mulf %33, %33 : vector<512x128xf32>
    %cst_18 = arith.constant dense<0.000000e+00> : vector<512xf32>
    %35 = vector.multi_reduction <add>, %34, %cst_18 [1] : vector<512x128xf32> to vector<512xf32>
    %36 = vector.shape_cast %35 : vector<512xf32> to vector<512x1xf32>
    %cst_19 = arith.constant 9.99999996E-13 : f32
    %37 = vector.broadcast %cst_19 : f32 to vector<512x1xf32>
    %38 = arith.addf %36, %37 : vector<512x1xf32>
    %39 = math.rsqrt %38 : vector<512x1xf32>
    %40 = vector.broadcast %39 : vector<512x1xf32> to vector<512x128xf32>
    %41 = arith.mulf %33, %40 : vector<512x128xf32>
    %c0_20 = arith.constant 0 : index
    %c0_21 = arith.constant 0 : index
    %42 = vector.load %arg6[%c0_20, %c0_21] : memref<512x128xf32, #tpu.memory_space<vmem>>, vector<512x128xf32>
    tpu.vector_store %arg6[%c0_20, %c0_21], %41 {strides = array<i32>} : memref<512x128xf32, #tpu.memory_space<vmem>>, vector<512x128xf32>,
    return
  }
  func.func @transform_0(%arg0: i32) -> (i32, i32) {
    %c0_i32 = arith.constant 0 : i32
    %c0_i32_0 = arith.constant 0 : i32
    return %arg0, %c0_i32 : i32, i32
  }
  func.func @transform_1(%arg0: i32) -> (i32, i32) {
    %c0_i32 = arith.constant 0 : i32
    %c0_i32_0 = arith.constant 0 : i32
    %c0_i32_1 = arith.constant 0 : i32
    return %c0_i32, %c0_i32_0 : i32, i32
  }
  func.func @transform_2(%arg0: i32) -> (i32, i32) {
    %c0_i32 = arith.constant 0 : i32
    %c0_i32_0 = arith.constant 0 : i32
    %c0_i32_1 = arith.constant 0 : i32
    return %c0_i32, %c0_i32_0 : i32, i32
  }
  func.func @transform_3(%arg0: i32) -> (i32, i32, i32) {
    %c0_i32 = arith.constant 0 : i32
    %c0_i32_0 = arith.constant 0 : i32
    %c0_i32_1 = arith.constant 0 : i32
    %c0_i32_2 = arith.constant 0 : i32
    return %c0_i32, %c0_i32_0, %c0_i32_1 : i32, i32, i32
  }
  func.func @transform_4(%arg0: i32) -> (i32, i32) {
    %c0_i32 = arith.constant 0 : i32
    %c0_i32_0 = arith.constant 0 : i32
    %c0_i32_1 = arith.constant 0 : i32
    return %c0_i32, %c0_i32_0 : i32, i32
  }
  func.func @transform_5(%arg0: i32) -> (i32, i32) {
    %c0_i32 = arith.constant 0 : i32
    %c0_i32_0 = arith.constant 0 : i32
    return %arg0, %c0_i32 : i32, i32
  }
}

module attributes {stable_mosaic.version = 11 : i64} {
  func.func @_mlp_encoder_kernel(%arg0: i32, %arg1: memref<512x64xf32, #tpu.memory_space<vmem>>, %arg2: memref<4x128xf32, #tpu.memory_space<vmem>>, %arg3: memref<64x128xbf16, #tpu.memory_space<vmem>>, %arg4: memref<2x128x128xbf16, #tpu.memory_space<vmem>>, %arg5: memref<128x128xbf16, #tpu.memory_space<vmem>>, %arg6: memref<512x128xf32, #tpu.memory_space<vmem>>) attributes {dimension_semantics = [#tpu.dimension_semantics<parallel>], iteration_bounds = array<i64: 2>, scalar_prefetch = 0 : i64, scratch_operands = 0 : i64, tpu.core_type = #tpu.core_type<tc>, window_params = [{transform_indices = @transform_0, window_bounds = array<i64: 512, 64>}, {pipeline_mode = #tpu.pipeline_mode<synchronous>, transform_indices = @transform_1, window_bounds = array<i64: 4, 128>}, {pipeline_mode = #tpu.pipeline_mode<synchronous>, transform_indices = @transform_2, window_bounds = array<i64: 64, 128>}, {pipeline_mode = #tpu.pipeline_mode<synchronous>, transform_indices = @transform_3, window_bounds = array<i64: 2, 128, 128>}, {pipeline_mode = #tpu.pipeline_mode<synchronous>, transform_indices = @transform_4, window_bounds = array<i64: 128, 128>}, {transform_indices = @transform_5, window_bounds = array<i64: 512, 128>}]} {
    %c0 = arith.constant 0 : index
    %c0_0 = arith.constant 0 : index
    %0 = vector.load %arg2[%c0, %c0_0] : memref<4x128xf32, #tpu.memory_space<vmem>>, vector<4x128xf32>
    %c0_1 = arith.constant 0 : index
    %c0_2 = arith.constant 0 : index
    %1 = vector.load %arg1[%c0_1, %c0_2] : memref<512x64xf32, #tpu.memory_space<vmem>>, vector<512x64xf32>
    %2 = arith.truncf %1 : vector<512x64xf32> to vector<512x64xbf16>
    %c0_3 = arith.constant 0 : index
    %c0_4 = arith.constant 0 : index
    %3 = vector.load %arg3[%c0_3, %c0_4] : memref<64x128xbf16, #tpu.memory_space<vmem>>, vector<64x128xbf16>
    %4 = vector.extract_strided_slice %0 {offsets = [0, 0], sizes = [1, 128], strides = [1, 1]} : vector<4x128xf32> to vector<1x128xf32>
    %cst = arith.constant dense<0.000000e+00> : vector<512x128xf32>
    %5 = tpu.matmul %2, %3, %cst {dimension_numbers = #tpu.dot_dimension_numbers<[1], [0], [0], [1], [0, 0, 1, 1], [], []>} : vector<512x64xbf16>, vector<64x128xbf16>, vector<512x128xf32> -> vector<512x128xf32>
    %6 = vector.broadcast %4 : vector<1x128xf32> to vector<512x128xf32>
    %7 = arith.addf %5, %6 : vector<512x128xf32>
    %cst_5 = arith.constant 0.000000e+00 : f32
    %8 = vector.broadcast %cst_5 : f32 to vector<512x128xf32>
    %9 = arith.maximumf %7, %8 : vector<512x128xf32>
    %c0_6 = arith.constant 0 : index
    %c0_7 = arith.constant 0 : index
    %c0_8 = arith.constant 0 : index
    %10 = vector.load %arg4[%c0_6, %c0_7, %c0_8] : memref<2x128x128xbf16, #tpu.memory_space<vmem>>, vector<1x128x128xbf16>
    %11 = vector.shape_cast %10 : vector<1x128x128xbf16> to vector<128x128xbf16>
    %12 = arith.truncf %9 : vector<512x128xf32> to vector<512x128xbf16>
    %13 = vector.extract_strided_slice %0 {offsets = [1, 0], sizes = [1, 128], strides = [1, 1]} : vector<4x128xf32> to vector<1x128xf32>
    %cst_9 = arith.constant dense<0.000000e+00> : vector<512x128xf32>
    %14 = tpu.matmul %12, %11, %cst_9 {dimension_numbers = #tpu.dot_dimension_numbers<[1], [0], [0], [1], [0, 0, 1, 1], [], []>} : vector<512x128xbf16>, vector<128x128xbf16>, vector<512x128xf32> -> vector<512x128xf32>
    %15 = vector.broadcast %13 : vector<1x128xf32> to vector<512x128xf32>
    %16 = arith.addf %14, %15 : vector<512x128xf32>
    %cst_10 = arith.constant 0.000000e+00 : f32
    %17 = vector.broadcast %cst_10 : f32 to vector<512x128xf32>
    %18 = arith.maximumf %16, %17 : vector<512x128xf32>
    %c1 = arith.constant 1 : index
    %c0_11 = arith.constant 0 : index
    %c0_12 = arith.constant 0 : index
    %19 = vector.load %arg4[%c1, %c0_11, %c0_12] : memref<2x128x128xbf16, #tpu.memory_space<vmem>>, vector<1x128x128xbf16>
    %20 = vector.shape_cast %19 : vector<1x128x128xbf16> to vector<128x128xbf16>
    %21 = arith.truncf %18 : vector<512x128xf32> to vector<512x128xbf16>
    %22 = vector.extract_strided_slice %0 {offsets = [2, 0], sizes = [1, 128], strides = [1, 1]} : vector<4x128xf32> to vector<1x128xf32>
    %cst_13 = arith.constant dense<0.000000e+00> : vector<512x128xf32>
    %23 = tpu.matmul %21, %20, %cst_13 {dimension_numbers = #tpu.dot_dimension_numbers<[1], [0], [0], [1], [0, 0, 1, 1], [], []>} : vector<512x128xbf16>, vector<128x128xbf16>, vector<512x128xf32> -> vector<512x128xf32>
    %24 = vector.broadcast %22 : vector<1x128xf32> to vector<512x128xf32>
    %25 = arith.addf %23, %24 : vector<512x128xf32>
    %cst_14 = arith.constant 0.000000e+00 : f32
    %26 = vector.broadcast %cst_14 : f32 to vector<512x128xf32>
    %27 = arith.maximumf %25, %26 : vector<512x128xf32>
    %c0_15 = arith.constant 0 : index
    %c0_16 = arith.constant 0 : index
    %28 = vector.load %arg5[%c0_15, %c0_16] : memref<128x128xbf16, #tpu.memory_space<vmem>>, vector<128x128xbf16>
    %29 = arith.truncf %27 : vector<512x128xf32> to vector<512x128xbf16>
    %30 = vector.extract_strided_slice %0 {offsets = [3, 0], sizes = [1, 128], strides = [1, 1]} : vector<4x128xf32> to vector<1x128xf32>
    %cst_17 = arith.constant dense<0.000000e+00> : vector<512x128xf32>
    %31 = tpu.matmul %29, %28, %cst_17 {dimension_numbers = #tpu.dot_dimension_numbers<[1], [0], [0], [1], [0, 0, 1, 1], [], []>} : vector<512x128xbf16>, vector<128x128xbf16>, vector<512x128xf32> -> vector<512x128xf32>
    %32 = vector.broadcast %30 : vector<1x128xf32> to vector<512x128xf32>
    %33 = arith.addf %31, %32 : vector<512x128xf32>
    %34 = arith.mulf %33, %33 : vector<512x128xf32>
    %cst_18 = arith.constant dense<0.000000e+00> : vector<512xf32>
    %35 = vector.multi_reduction <add>, %34, %cst_18 [1] : vector<512x128xf32> to vector<512xf32>
    %36 = vector.shape_cast %35 : vector<512xf32> to vector<512x1xf32>
    %cst_19 = arith.constant 9.99999996E-13 : f32
    %37 = vector.broadcast %cst_19 : f32 to vector<512x1xf32>
    %38 = arith.addf %36, %37 : vector<512x1xf32>
    %39 = math.rsqrt %38 : vector<512x1xf32>
    %40 = vector.broadcast %39 : vector<512x1xf32> to vector<512x128xf32>
    %41 = arith.mulf %33, %40 : vector<512x128xf32>
    %c0_20 = arith.constant 0 : index
    %c0_21 = arith.constant 0 : index
    %42 = vector.load %arg6[%c0_20, %c0_21] : memref<512x128xf32, #tpu.memory_space<vmem>>, vector<512x128xf32>
    tpu.vector_store %arg6[%c0_20, %c0_21], %41 {strides = array<i32>} : memref<512x128xf32, #tpu.memory_space<vmem>>, vector<512x128xf32>,
    return
  }
  func.func @transform_0(%arg0: i32) -> (i32, i32) {
    %c0_i32 = arith.constant 0 : i32
    %c0_i32_0 = arith.constant 0 : i32
    return %arg0, %c0_i32 : i32, i32
  }
  func.func @transform_1(%arg0: i32) -> (i32, i32) {
    %c0_i32 = arith.constant 0 : i32
    %c0_i32_0 = arith.constant 0 : i32
    %c0_i32_1 = arith.constant 0 : i32
    return %c0_i32, %c0_i32_0 : i32, i32
  }
  func.func @transform_2(%arg0: i32) -> (i32, i32) {
    %c0_i32 = arith.constant 0 : i32
    %c0_i32_0 = arith.constant 0 : i32
    %c0_i32_1 = arith.constant 0 : i32
    return %c0_i32, %c0_i32_0 : i32, i32
  }
  func.func @transform_3(%arg0: i32) -> (i32, i32, i32) {
    %c0_i32 = arith.constant 0 : i32
    %c0_i32_0 = arith.constant 0 : i32
    %c0_i32_1 = arith.constant 0 : i32
    %c0_i32_2 = arith.constant 0 : i32
    return %c0_i32, %c0_i32_0, %c0_i32_1 : i32, i32, i32
  }
  func.func @transform_4(%arg0: i32) -> (i32, i32) {
    %c0_i32 = arith.constant 0 : i32
    %c0_i32_0 = arith.constant 0 : i32
    %c0_i32_1 = arith.constant 0 : i32
    return %c0_i32, %c0_i32_0 : i32, i32
  }
  func.func @transform_5(%arg0: i32) -> (i32, i32) {
    %c0_i32 = arith.constant 0 : i32
    %c0_i32_0 = arith.constant 0 : i32
    return %arg0, %c0_i32 : i32, i32
  }
}

</mosaic_0001>

<bundles_post_ra>
// kernel: tpu_custom_call.1
= control target key start
LH: loop header
LB: loop body
LE: loop exit
PB: predicated region body
PF: predicated region fallthrough
CT: control target
= control target key end

     0   :  { %10 = vsyncpa [#allocation3], 0  ;;  %s4505_s0 = inlined_call_operand.vmem [shape: f32[1000,64], index: 0, kind: input, shape index: {}]   ;;  %s4506_s1 = inlined_call_operand.vmem [shape: f32[4,128], index: 1, kind: input, shape index: {}]   ;;  %s4507_s2 = inlined_call_operand.vmem [shape: bf16[64,128], index: 2, kind: input, shape index: {}]   ;;  %s4508_s3 = inlined_call_operand.vmem [shape: bf16[2,128,128], index: 3, kind: input, shape index: {}]   ;;  %s4509_s4 = inlined_call_operand.vmem [shape: bf16[128,128], index: 4, kind: input, shape index: {}]   ;;  %s4510_s5 = inlined_call_operand.hbm [shape: f32[1000,128], index: 5, kind: output, shape index: {}]  }
   0x1   :  { %12 = vsyncpa [#allocation3 + $0x1], 0  ;;  %s3531_s18 = smov 0   ;;  %s3533_s19 = smov 0  }
   0x2   :  { %s3535_s20 = smov 0   ;;  %s3537_s21 = smov 0  }
   0x3 LB: > { %s3552_s22 = sadd.s32 4294967295, %s3496_s21   ;;  %s2660_s23 = sadd.s32 4294967294, %s3496_s21   ;;  %s3496_s21 = sphi %s3537_s21, %s4558_s21   ;;  %s3492_s20 = sphi %s3535_s20, %s4557_s20   ;;  %s3488_s19 = sphi %s3533_s19, %s4556_s19   ;;  %s3484_s18 = sphi %s3531_s18, %s4555_s18  }
   0x4   : > { %s3556_s24 = sadd.s32 1, %s3496_s21   ;;  %s135_s25 = sadd.s32 1, %s3492_s20 }
   0x5   : > { %s132_s26 = ssub.s32 %s3496_s21, %s3556_s24  ;;  %p145_p0 = scmp.ne.s32.totalorder %s3492_s20, %s3488_s19 }
   0x6   : > { %p133_p1 = scmp.eq.s32.totalorder %s132_s26, 0  ;;  %p146_p2 = scmp.eq.s32.totalorder %s3552_s22, 1 }
   0x7   : > { %p151_p3 = scmp.ne.s32.totalorder %s3488_s19, %s3484_s18  ;;  %p152_p4 = scmp.eq.s32.totalorder %s2660_s23, 1 }
   0x8   : > { %s3567_s27 = scalar_select %p133_p1, %s3492_s20, %s135_s25  }
   0x9   : > { %p3569_p5 = por %p146_p2, %p145_p0  ;;  %p3573_p6 = por %p152_p4, %p151_p3 }
   0xa   : > { %p2663_p7 = scmp.ge.s32.totalorder %s3496_s21, 1  ;;  %p199_p8 = scmp.lt.s32.totalorder %s3496_s21, 3 }
   0xc   : > { %p200_p9 = pnand %p2663_p7, %p199_p8 }
   0xe   : > { %203 = sbr.rel (%p200_p9) target bundleno = 1233 (0x4d1), region = 40 }
  0x15   : > { %v3277_v0 = vld [vmem:[%s4507_s2] sm:$0xff]   ;;  %s3583_s7 = sshll.u32 %s3552_s22, 6  ;;  %v3278_v1 = vld [vmem:[%s4507_s2 + $0x8] sm:$0xff]   ;;  %v3279_v2 = vld [vmem:[%s4507_s2 + $0x10] sm:$0xff]   ;;  %vm384_vm0 = vcmask 523264   ;;  %s228_s11 = sand.u32 1, %s3488_s19  }
  0x16   : > { %p236_p10 = scmp.lt.s32.totalorder %s3583_s7, 124  ;;  %2909 = vmatprep.subr.bf16.mxu0 %v3277_v0  ;;  %v3280_v5 = vld [vmem:[%s4507_s2 + $0x18] sm:$0xff]   ;;  %v3281_v23 = vld [vmem:[%s4508_s3] sm:$0xff]   ;;  %v3282_v24 = vld [vmem:[%s4508_s3 + $0x8] sm:$0xff]   ;;  %s4444_s14 = scalar_lea.sflag [#allocation3], %s228_s11 }
  0x17   : > { %2910 = vmatpush3.bf16.msra.mxu0 %v3277_v0  ;;  %2981 = vmatprep.subr.bf16.mxu1 %v3281_v23  ;;  %v3283_v27 = vld [vmem:[%s4508_s3 + $0x10] sm:$0xff]   ;;  %v3284_v32 = vld [vmem:[%s4508_s3 + $0x18] sm:$0xff]   ;;  %v3285_v34 = vld [vmem:[%s4508_s3 + $0x20] sm:$0xff]   ;;  %s2587_s15 = ssub.s32 (%p3569_p5), 125, %s3583_s7 }
  0x18   : > { %s237_s12 = scalar_select %p236_p10, %s3583_s7, 124  ;;  %2911 = vmatprep.subr.bf16.mxu0 %v3278_v1  ;;  %2982 = vmatpush3.bf16.msra.mxu1 %v3281_v23  ;;  %v3286_v40 = vld [vmem:[%s4508_s3 + $0x28] sm:$0xff]  }
  0x19   : > { %2983 = vmatprep.subr.bf16.mxu1 %v3282_v24  ;;  %p2588_p11 = scmp.lt.s32.totalorder (%p3569_p5), %s2587_s15, 64 }
  0x1a   : > { %s2666_s13 = sshll.u32 %s237_s12, 3  ;;  %s2664_s12 = sshll.u32 %s228_s11, 9 }
  0x1b   : > { %s3596_s16 = scalar_lea.vmem %s4505_s0, %s2666_s13  ;;  %2912 = vmatpush3.bf16.msra.mxu0 %v3278_v1  ;;  %s4314_s13 = scalar_lea.vmem [#allocation2], %s2664_s12 }
  0x1c   : > { %v252_v3 = vld [vmem:[%s3596_s16] sm:$0xff]  ;;  %v253_v4 = vld [vmem:[%s3596_s16 + $0x8] sm:$0xff]  ;;  %2913 = vmatprep.subr.bf16.mxu0 %v3279_v2  ;;  %v254_v7 = vld [vmem:[%s3596_s16 + $0x10] sm:$0xff]  ;;  %2984 = vmatpush3.bf16.msra.mxu1 %v3282_v24 }
  0x1d   : > { %v316_v6 = vpack.c.bf16 %v253_v4, %v252_v3  ;;  %v255_v8 = vld [vmem:[%s3596_s16 + $0x18] sm:$0xff]  ;;  %v256_v9 = vld [vmem:[%s3596_s16 + $0x20] sm:$0xff]  ;;  %v257_v10 = vld [vmem:[%s3596_s16 + $0x28] sm:$0xff]  ;;  %2985 = vmatprep.subr.bf16.mxu1 %v3283_v27 }
  0x1e   : > { %v317_v11 = vpack.c.bf16 %v255_v8, %v254_v7  ;;  %v318_v12 = vpack.c.bf16 %v257_v10, %v256_v9  ;;  %v258_v13 = vld [vmem:[%s3596_s16 + $0x30] sm:$0xff]  ;;  %v259_v14 = vld [vmem:[%s3596_s16 + $0x38] sm:$0xff]  ;;  %v260_v15 = vld [vmem:[%s3596_s16 + $0x40] sm:$0xff] }
  0x1f   : > { %2917 = vmatprep.mubr.msk.bf16.mxu0 %vm384_vm0, %v316_v6  ;;  %2914 = vmatpush3.bf16.msra.mxu0 %v3279_v2  ;;  %v261_v16 = vld [vmem:[%s3596_s16 + $0x48] sm:$0xff]  ;;  %v319_v17 = vpack.c.bf16 %v259_v14, %v258_v13  ;;  %v262_v19 = vld [vmem:[%s3596_s16 + $0x50] sm:$0xff]  ;;  %v263_v20 = vld [vmem:[%s3596_s16 + $0x58] sm:$0xff] }
  0x20   : > { %2915 = vmatprep.subr.bf16.mxu0 %v3280_v5  ;;  %v320_v18 = vpack.c.bf16 %v261_v16, %v260_v15  ;;  %v264_v21 = vld [vmem:[%s3596_s16 + $0x60] sm:$0xff]  ;;  %v265_v22 = vld [vmem:[%s3596_s16 + $0x68] sm:$0xff]  ;;  %v321_v25 = vpack.c.bf16 %v263_v20, %v262_v19  ;;  %v266_v28 = vld [vmem:[%s3596_s16 + $0x70] sm:$0xff]  ;;  %2986 = vmatpush3.bf16.msra.mxu1 %v3283_v27 }
  0x21   : > { %v322_v26 = vpack.c.bf16 %v265_v22, %v264_v21  ;;  %v267_v29 = vld [vmem:[%s3596_s16 + $0x78] sm:$0xff]  ;;  %v268_v30 = vld [vmem:[%s3596_s16 + $0x80] sm:$0xff]  ;;  %v269_v31 = vld [vmem:[%s3596_s16 + $0x88] sm:$0xff]  ;;  %2987 = vmatprep.subr.bf16.mxu1 %v3284_v32 }
  0x22   : > { %v323_v33 = vpack.c.bf16 %v267_v29, %v266_v28  ;;  %v324_v35 = vpack.c.bf16 %v269_v31, %v268_v30  ;;  %v270_v36 = vld [vmem:[%s3596_s16 + $0x90] sm:$0xff]  ;;  %v271_v37 = vld [vmem:[%s3596_s16 + $0x98] sm:$0xff]  ;;  %v272_v38 = vld [vmem:[%s3596_s16 + $0xa0] sm:$0xff] }
  0x23   : > { %2916 = vmatpush3.bf16.msra.mxu0 %v3280_v5  ;;  %v273_v39 = vld [vmem:[%s3596_s16 + $0xa8] sm:$0xff]  ;;  %v325_v41 = vpack.c.bf16 %v271_v37, %v270_v36  ;;  %v274_v43 = vld [vmem:[%s3596_s16 + $0xb0] sm:$0xff]  ;;  %v275_v44 = vld [vmem:[%s3596_s16 + $0xb8] sm:$0xff] }
  0x24   : > { %2988 = vmatpush3.bf16.msra.mxu1 %v3284_v32  ;;  %v326_v42 = vpack.c.bf16 %v273_v39, %v272_v38  ;;  %v276_v45 = vld [vmem:[%s3596_s16 + $0xc0] sm:$0xff]  ;;  %v277_v46 = vld [vmem:[%s3596_s16 + $0xc8] sm:$0xff]  ;;  %v327_v47 = vpack.c.bf16 %v275_v44, %v274_v43  ;;  %v278_v49 = vld [vmem:[%s3596_s16 + $0xd0] sm:$0xff] }
  0x25   : > { %2989 = vmatprep.subr.bf16.mxu1 %v3285_v34  ;;  %v328_v48 = vpack.c.bf16 %v277_v46, %v276_v45  ;;  %v279_v50 = vld [vmem:[%s3596_s16 + $0xd8] sm:$0xff]  ;;  %v280_v51 = vld [vmem:[%s3596_s16 + $0xe0] sm:$0xff]  ;;  %v281_v52 = vld [vmem:[%s3596_s16 + $0xe8] sm:$0xff]  ;;  %v356_v45 = vlaneseq }
  0x26   : > { %2918 = vmatmul.mubr.msk.bf16.vlgmr.msra.gmra.mrb[0].mxu0 %vm384_vm0, %v317_v11  ;;  %v329_v53 = vpack.c.bf16 %v279_v50, %v278_v49  ;;  %v330_v54 = vpack.c.bf16 %v281_v52, %v280_v51  ;;  %v282_v55 = vld [vmem:[%s3596_s16 + $0xf0] sm:$0xff]  ;;  %v283_v56 = vld [vmem:[%s3596_s16 + $0xf8] sm:$0xff]  ;;  %v284_v57 = vld [vmem:[%s3596_s16 + $0x100] sm:$0xff] }
  0x27   : > { %2921 = vmatprep.mubr.msk.bf16.mxu0 %vm384_vm0, %v318_v12  ;;  %v285_v58 = vld [vmem:[%s3596_s16 + $0x108] sm:$0xff]  ;;  %v331_v59 = vpack.c.bf16 %v283_v56, %v282_v55  ;;  %v286_v61 = vld [vmem:[%s3596_s16 + $0x110] sm:$0xff]  ;;  %v287_v62 = vld [vmem:[%s3596_s16 + $0x118] sm:$0xff]  ;;  %v3724_v46 = vshrl.u32 %v356_v45, 7 }
  0x28   : > { %2990 = vmatpush3.bf16.msra.mxu1 %v3285_v34  ;;  %v332_v60 = vpack.c.bf16 %v285_v58, %v284_v57  ;;  %v288_v63 = vld [vmem:[%s3596_s16 + $0x120] sm:$0xff]  ;;  %v289_v0 = vld [vmem:[%s3596_s16 + $0x128] sm:$0xff]  ;;  %v333_v1 = vpack.c.bf16 %v287_v62, %v286_v61  ;;  %v290_v3 = vld [vmem:[%s3596_s16 + $0x130] sm:$0xff] }
  0x29   : > { %2991 = vmatprep.subr.bf16.mxu1 %v3286_v40  ;;  %v334_v2 = vpack.c.bf16 %v289_v0, %v288_v63  ;;  %v291_v4 = vld [vmem:[%s3596_s16 + $0x138] sm:$0xff]  ;;  %v292_v5 = vld [vmem:[%s3596_s16 + $0x140] sm:$0xff]  ;;  %v293_v6 = vld [vmem:[%s3596_s16 + $0x148] sm:$0xff] }
  0x2a   : > { %v335_v7 = vpack.c.bf16 %v291_v4, %v290_v3  ;;  %v336_v8 = vpack.c.bf16 %v293_v6, %v292_v5  ;;  %v294_v9 = vld [vmem:[%s3596_s16 + $0x150] sm:$0xff]  ;;  %v295_v10 = vld [vmem:[%s3596_s16 + $0x158] sm:$0xff]  ;;  %v296_v11 = vld [vmem:[%s3596_s16 + $0x160] sm:$0xff] }
  0x2b   : > { %v297_v12 = vld [vmem:[%s3596_s16 + $0x168] sm:$0xff]  ;;  %v337_v13 = vpack.c.bf16 %v295_v10, %v294_v9  ;;  %v298_v15 = vld [vmem:[%s3596_s16 + $0x170] sm:$0xff]  ;;  %v299_v16 = vld [vmem:[%s3596_s16 + $0x178] sm:$0xff] }
  0x2c   : > { %2992 = vmatpush3.bf16.msra.mxu1 %v3286_v40  ;;  %v338_v14 = vpack.c.bf16 %v297_v12, %v296_v11  ;;  %v339_v19 = vpack.c.bf16 %v299_v16, %v298_v15  ;;  %v3287_v20 = vld [vmem:[%s4508_s3 + $0x30] sm:$0xff]   ;;  %v3288_v22 = vld [vmem:[%s4508_s3 + $0x38] sm:$0xff]   ;;  %v308_v31 = vld [vmem:[%s3596_s16 + $0x1c0] sm:$0xff] }
  0x2d   : > { %2993 = vmatprep.subr.bf16.mxu1 %v3287_v20  ;;  %v302_v23 = vld [vmem:[%s3596_s16 + $0x190] sm:$0xff]  ;;  %v303_v24 = vld [vmem:[%s3596_s16 + $0x198] sm:$0xff]  ;;  %v309_v32 = vld [vmem:[%s3596_s16 + $0x1c8] sm:$0xff] }
  0x2e   : > { %2922 = vmatmul.mubr.msk.bf16.gmra.mrb[4].mxu0 %vm384_vm0, %v319_v17  ;;  %v300_v17 = vld [vmem:[%s3596_s16 + $0x180] sm:$0xff]  ;;  %v341_v27 = vpack.c.bf16 %v303_v24, %v302_v23  ;;  %v306_v29 = vld [vmem:[%s3596_s16 + $0x1b0] sm:$0xff]  ;;  %v307_v30 = vld [vmem:[%s3596_s16 + $0x1b8] sm:$0xff]  ;;  %v344_v34 = vpack.c.bf16 %v309_v32, %v308_v31 }
  0x2f   : > { %2925 = vmatprep.mubr.msk.bf16.mxu0 %vm384_vm0, %v320_v18  ;;  %v301_v18 = vld [vmem:[%s3596_s16 + $0x188] sm:$0xff]  ;;  %v311_v36 = vld [vmem:[%s3596_s16 + $0x1d8] sm:$0xff]  ;;  %v312_v37 = vld [vmem:[%s3596_s16 + $0x1e0] sm:$0xff] }
  0x30   : > { %v340_v21 = vpack.c.bf16 %v301_v18, %v300_v17  ;;  %2994 = vmatpush3.bf16.msra.mxu1 %v3287_v20  ;;  %v313_v38 = vld [vmem:[%s3596_s16 + $0x1e8] sm:$0xff]  ;;  %v3289_v44 = vld [vmem:[%s4508_s3 + $0x40] sm:$0xff]   ;;  %v3291_v58 = vld [vmem:[%s4508_s3 + $0x50] sm:$0xff]  }
  0x31   : > { %2995 = vmatprep.subr.bf16.mxu1 %v3288_v22  ;;  %v346_v40 = vpack.c.bf16 %v313_v38, %v312_v37  ;;  %3061 = vmatprep.subr.bf16.mxu0 %v3289_v44  ;;  %v3290_v49 = vld [vmem:[%s4508_s3 + $0x48] sm:$0xff]   ;;  %v3295_v18 = vld [vmem:[%s4508_s3 + $0x70] sm:$0xff]  }
  0x32   : > { %3062 = vmatpush3.bf16.msra.mxu0 %v3289_v44  ;;  %v3294_v11 = vld [vmem:[%s4508_s3 + $0x68] sm:$0xff]  }
  0x33   : > { %3063 = vmatprep.subr.bf16.mxu0 %v3290_v49 }
  0x34   : > { %2996 = vmatpush3.bf16.msra.mxu1 %v3288_v22 }
  0x36   : > { %2926 = vmatmul.mubr.msk.bf16.gmra.mrb[8].mxu0 %vm384_vm0, %v321_v25  ;;  %v304_v25 = vld [vmem:[%s3596_s16 + $0x1a0] sm:$0xff] }
  0x37   : > { %2929 = vmatprep.mubr.msk.bf16.mxu0 %vm384_vm0, %v322_v26  ;;  %v305_v26 = vld [vmem:[%s3596_s16 + $0x1a8] sm:$0xff]  ;;  %3064 = vmatpush3.bf16.msra.mxu0 %v3290_v49 }
  0x38   : > { %v342_v28 = vpack.c.bf16 %v305_v26, %v304_v25  ;;  %3065 = vmatprep.subr.bf16.mxu0 %v3291_v58 }
  0x3b   : > { %3066 = vmatpush3.bf16.msra.mxu0 %v3291_v58 }
  0x3e   : > { %2930 = vmatmul.mubr.msk.bf16.gmra.mrb[12].mxu0 %vm384_vm0, %v323_v33  ;;  %v343_v33 = vpack.c.bf16 %v307_v30, %v306_v29 }
  0x3f   : > { %2933 = vmatprep.mubr.msk.bf16.mxu0 %vm384_vm0, %v324_v35  ;;  %v310_v35 = vld [vmem:[%s3596_s16 + $0x1d0] sm:$0xff] }
  0x40   : > { %v345_v39 = vpack.c.bf16 %v311_v36, %v310_v35 }
  0x46   : > { %2934 = vmatmul.mubr.msk.bf16.gmra.mrb[16].mxu0 %vm384_vm0, %v325_v41  ;;  %v314_v41 = vld [vmem:[%s3596_s16 + $0x1f0] sm:$0xff] }
  0x47   : > { %2937 = vmatprep.mubr.msk.bf16.mxu0 %vm384_vm0, %v326_v42  ;;  %v315_v42 = vld [vmem:[%s3596_s16 + $0x1f8] sm:$0xff] }
  0x48   : > { %v347_v43 = vpack.c.bf16 %v315_v42, %v314_v41 }
  0x4e   : > { %2938 = vmatmul.mubr.msk.bf16.gmra.mrb[20].mxu0 %vm384_vm0, %v327_v47  ;;  %v358_v47 = vsub.s32 0, %v3724_v46 }
  0x4f   : > { %2941 = vmatprep.mubr.msk.bf16.mxu0 %vm384_vm0, %v328_v48  ;;  %v3730_v48 = vld [vmem:[%s4506_s1] sm:$0xf] }
  0x50   : > { %v3736_v50 = vrot.slane %v3730_v48, %v358_v47 }
  0x56   : > { %2942 = vmatmul.mubr.msk.bf16.gmra.mrb[24].mxu0 %vm384_vm0, %v329_v53 }
  0x57   : > { %2945 = vmatprep.mubr.msk.bf16.mxu0 %vm384_vm0, %v330_v54 }
  0x5e   : > { %2946 = vmatmul.mubr.msk.bf16.gmra.mrb[28].mxu0 %vm384_vm0, %v331_v59  ;;  %v3292_v59 = vld [vmem:[%s4508_s3 + $0x58] sm:$0xff]  }
  0x5f   : > { %2949 = vmatprep.mubr.msk.bf16.mxu0 %vm384_vm0, %v332_v60  ;;  %3067 = vmatprep.subr.bf16.mxu0 %v3292_v59 }
  0x60   : > { %3068 = vmatpush3.bf16.msra.mxu0 %v3292_v59 }
  0x66   : > { %2950 = vmatmul.mubr.msk.bf16.gmra.mrb[32].mxu0 %vm384_vm0, %v333_v1 }
  0x67   : > { %2953 = vmatprep.mubr.msk.bf16.mxu0 %vm384_vm0, %v334_v2  ;;  %v3293_v2 = vld [vmem:[%s4508_s3 + $0x60] sm:$0xff]  }
  0x68   : > { %3069 = vmatprep.subr.bf16.mxu0 %v3293_v2 }
  0x69   : > { %3070 = vmatpush3.bf16.msra.mxu0 %v3293_v2 }
  0x6a   : > { %3071 = vmatprep.subr.bf16.mxu0 %v3294_v11 }
  0x6d   : > { %3072 = vmatpush3.bf16.msra.mxu0 %v3294_v11 }
  0x6e   : > { %2954 = vmatmul.mubr.msk.bf16.gmra.mrb[36].mxu0 %vm384_vm0, %v335_v7  ;;  %3073 = vmatprep.subr.bf16.mxu0 %v3295_v18 }
  0x6f   : > { %2957 = vmatprep.mubr.msk.bf16.mxu0 %vm384_vm0, %v336_v8 }
  0x71   : > { %3074 = vmatpush3.bf16.msra.mxu0 %v3295_v18 }
  0x76   : > { %2958 = vmatmul.mubr.msk.bf16.gmra.mrb[40].mxu0 %vm384_vm0, %v337_v13 }
  0x77   : > { %2961 = vmatprep.mubr.msk.bf16.mxu0 %vm384_vm0, %v338_v14 }
  0x7e   : > { %2962 = vmatmul.mubr.msk.bf16.gmra.mrb[44].mxu0 %vm384_vm0, %v339_v19 }
  0x7f   : > { %2965 = vmatprep.mubr.msk.bf16.mxu0 %vm384_vm0, %v340_v21 }
  0x86   : > { %2966 = vmatmul.mubr.msk.bf16.gmra.mrb[48].mxu0 %vm384_vm0, %v341_v27  ;;  %v3296_v27 = vld [vmem:[%s4508_s3 + $0x78] sm:$0xff]  }
  0x87   : > { %2969 = vmatprep.mubr.msk.bf16.mxu0 %vm384_vm0, %v342_v28  ;;  %3075 = vmatprep.subr.bf16.mxu0 %v3296_v27 }
  0x88   : > { %3076 = vmatpush3.bf16.msra.mxu0 %v3296_v27 }
  0x8e   : > { %2970 = vmatmul.mubr.msk.bf16.gmra.mrb[52].mxu0 %vm384_vm0, %v343_v33 }
  0x8f   : > { %2973 = vmatprep.mubr.msk.bf16.mxu0 %vm384_vm0, %v344_v34 }
  0x96   : > { %2974 = vmatmul.mubr.msk.bf16.gmra.mrb[56].mxu0 %vm384_vm0, %v345_v39 }
  0x97   : > { %2977 = vmatprep.mubr.msk.bf16.mxu0 %vm384_vm0, %v346_v40 }
  0x9e   : > { %2978 = vmatmul.mubr.msk.bf16.gmra.mrb[60].mxu0 %vm384_vm0, %v347_v43 }
  0xf9   : > { %v2919_v51 = vpop.f32.mrb[0].mxu0 }
  0xfa   : > { %v524_v52 = vadd.f32 %v2919_v51, %v3736_v50  ;;  %v515_v53 = vpop.f32.mrb[1].mxu0 }
  0xfb   : > { %v516_v54 = vadd.f32 %v515_v53, %v3736_v50  ;;  %v2920_v55 = vpop.f32.mrb[2].mxu0 }
  0xfc   : > { %v527_v56 = vadd.f32 %v2920_v55, %v3736_v50  ;;  %v518_v57 = vpop.f32.mrb[3].mxu0  ;;  %v772_v61 = vmax.f32 %v524_v52, 0.0 }
  0xfd   : > { %v519_v60 = vadd.f32 %v518_v57, %v3736_v50  ;;  %v770_v63 = vmax.f32 %v516_v54, 0.0 }
  0xfe   : > { %v773_v62 = vmax.f32 %v527_v56, 0.0 }
  0xff   : > { %v771_v0 = vmax.f32 %v519_v60, 0.0 }
 0x100   : > { %v851_v1 = vpack.c.bf16 %v773_v62, %v772_v61 }
 0x101   : > { %v2923_v3 = vpop.f32.mrb[4].mxu0  ;;  %v850_v4 = vpack.c.bf16 %v771_v0, %v770_v63 }
 0x102   : > { %v540_v5 = vadd.f32 %v2923_v3, %v3736_v50  ;;  %v531_v6 = vpop.f32.mrb[5].mxu0 }
 0x103   : > { %v532_v7 = vadd.f32 %v531_v6, %v3736_v50  ;;  %v2924_v8 = vpop.f32.mrb[6].mxu0  ;;  %2997 = vmatprep.mubr.bf16.mxu1 %v850_v4 }
 0x104   : > { %v543_v9 = vadd.f32 %v2924_v8, %v3736_v50  ;;  %v534_v10 = vpop.f32.mrb[7].mxu0  ;;  %2998 = vmatmul.mubr.bf16.vlgmr.msra.gmra.mrb[0].mxu1 %v851_v1  ;;  %v776_v13 = vmax.f32 %v540_v5, 0.0 }
 0x105   : > { %v535_v12 = vadd.f32 %v534_v10, %v3736_v50  ;;  %v774_v15 = vmax.f32 %v532_v7, 0.0 }
 0x106   : > { %v777_v14 = vmax.f32 %v543_v9, 0.0 }
 0x107   : > { %v775_v16 = vmax.f32 %v535_v12, 0.0 }
 0x108   : > { %v853_v17 = vpack.c.bf16 %v777_v14, %v776_v13 }
 0x109   : > { %v852_v19 = vpack.c.bf16 %v775_v16, %v774_v15  ;;  %v2927_v20 = vpop.f32.mrb[8].mxu0 }
 0x10a   : > { %v556_v21 = vadd.f32 %v2927_v20, %v3736_v50  ;;  %v547_v22 = vpop.f32.mrb[9].mxu0 }
 0x10b   : > { %v548_v23 = vadd.f32 %v547_v22, %v3736_v50  ;;  %v2928_v24 = vpop.f32.mrb[10].mxu0  ;;  %3001 = vmatprep.mubr.bf16.mxu1 %v852_v19 }
 0x10c   : > { %v559_v25 = vadd.f32 %v2928_v24, %v3736_v50  ;;  %v550_v26 = vpop.f32.mrb[11].mxu0  ;;  %3002 = vmatmul.mubr.bf16.gmra.mrb[4].mxu1 %v853_v17  ;;  %v780_v29 = vmax.f32 %v556_v21, 0.0 }
 0x10d   : > { %v551_v28 = vadd.f32 %v550_v26, %v3736_v50  ;;  %v778_v31 = vmax.f32 %v548_v23, 0.0 }
 0x10e   : > { %v781_v30 = vmax.f32 %v559_v25, 0.0 }
 0x10f   : > { %v779_v32 = vmax.f32 %v551_v28, 0.0 }
 0x110   : > { %v855_v33 = vpack.c.bf16 %v781_v30, %v780_v29 }
 0x111   : > { %v854_v34 = vpack.c.bf16 %v779_v32, %v778_v31  ;;  %v2931_v35 = vpop.f32.mrb[12].mxu0 }
 0x112   : > { %v572_v36 = vadd.f32 %v2931_v35, %v3736_v50  ;;  %v563_v37 = vpop.f32.mrb[13].mxu0 }
 0x113   : > { %v564_v38 = vadd.f32 %v563_v37, %v3736_v50  ;;  %v2932_v39 = vpop.f32.mrb[14].mxu0  ;;  %3005 = vmatprep.mubr.bf16.mxu1 %v854_v34 }
 0x114   : > { %v575_v40 = vadd.f32 %v2932_v39, %v3736_v50  ;;  %v566_v41 = vpop.f32.mrb[15].mxu0  ;;  %3006 = vmatmul.mubr.bf16.gmra.mrb[8].mxu1 %v855_v33  ;;  %v784_v43 = vmax.f32 %v572_v36, 0.0 }
 0x115   : > { %v567_v42 = vadd.f32 %v566_v41, %v3736_v50  ;;  %v782_v45 = vmax.f32 %v564_v38, 0.0 }
 0x116   : > { %v785_v44 = vmax.f32 %v575_v40, 0.0 }
 0x117   : > { %v783_v47 = vmax.f32 %v567_v42, 0.0 }
 0x118   : > { %v857_v49 = vpack.c.bf16 %v785_v44, %v784_v43 }
 0x119   : > { %v856_v51 = vpack.c.bf16 %v783_v47, %v782_v45  ;;  %v2935_v52 = vpop.f32.mrb[16].mxu0 }
 0x11a   : > { %v588_v53 = vadd.f32 %v2935_v52, %v3736_v50  ;;  %v579_v54 = vpop.f32.mrb[17].mxu0 }
 0x11b   : > { %v580_v55 = vadd.f32 %v579_v54, %v3736_v50  ;;  %v2936_v56 = vpop.f32.mrb[18].mxu0  ;;  %3009 = vmatprep.mubr.bf16.mxu1 %v856_v51 }
 0x11c   : > { %v591_v57 = vadd.f32 %v2936_v56, %v3736_v50  ;;  %v582_v58 = vpop.f32.mrb[19].mxu0  ;;  %3010 = vmatmul.mubr.bf16.gmra.mrb[12].mxu1 %v857_v49  ;;  %v788_v60 = vmax.f32 %v588_v53, 0.0 }
 0x11d   : > { %v583_v59 = vadd.f32 %v582_v58, %v3736_v50  ;;  %v786_v62 = vmax.f32 %v580_v55, 0.0 }
 0x11e   : > { %v789_v61 = vmax.f32 %v591_v57, 0.0 }
 0x11f   : > { %v787_v63 = vmax.f32 %v583_v59, 0.0 }
 0x120   : > { %v859_v0 = vpack.c.bf16 %v789_v61, %v788_v60 }
 0x121   : > { %v858_v1 = vpack.c.bf16 %v787_v63, %v786_v62  ;;  %v2939_v2 = vpop.f32.mrb[20].mxu0 }
 0x122   : > { %v604_v3 = vadd.f32 %v2939_v2, %v3736_v50  ;;  %v595_v4 = vpop.f32.mrb[21].mxu0 }
 0x123   : > { %v596_v5 = vadd.f32 %v595_v4, %v3736_v50  ;;  %v2940_v6 = vpop.f32.mrb[22].mxu0  ;;  %3013 = vmatprep.mubr.bf16.mxu1 %v858_v1 }
 0x124   : > { %v607_v7 = vadd.f32 %v2940_v6, %v3736_v50  ;;  %v598_v8 = vpop.f32.mrb[23].mxu0  ;;  %3014 = vmatmul.mubr.bf16.gmra.mrb[16].mxu1 %v859_v0  ;;  %v792_v10 = vmax.f32 %v604_v3, 0.0 }
 0x125   : > { %v599_v9 = vadd.f32 %v598_v8, %v3736_v50  ;;  %v790_v12 = vmax.f32 %v596_v5, 0.0 }
 0x126   : > { %v793_v11 = vmax.f32 %v607_v7, 0.0 }
 0x127   : > { %v791_v13 = vmax.f32 %v599_v9, 0.0 }
 0x128   : > { %v861_v14 = vpack.c.bf16 %v793_v11, %v792_v10 }
 0x129   : > { %v860_v15 = vpack.c.bf16 %v791_v13, %v790_v12  ;;  %v2943_v16 = vpop.f32.mrb[24].mxu0 }
 0x12a   : > { %v620_v17 = vadd.f32 %v2943_v16, %v3736_v50  ;;  %v611_v18 = vpop.f32.mrb[25].mxu0 }
 0x12b   : > { %v612_v19 = vadd.f32 %v611_v18, %v3736_v50  ;;  %v2944_v20 = vpop.f32.mrb[26].mxu0  ;;  %3017 = vmatprep.mubr.bf16.mxu1 %v860_v15 }
 0x12c   : > { %v623_v21 = vadd.f32 %v2944_v20, %v3736_v50  ;;  %v614_v22 = vpop.f32.mrb[27].mxu0  ;;  %3018 = vmatmul.mubr.bf16.gmra.mrb[20].mxu1 %v861_v14  ;;  %v796_v24 = vmax.f32 %v620_v17, 0.0 }
 0x12d   : > { %v615_v23 = vadd.f32 %v614_v22, %v3736_v50  ;;  %v794_v26 = vmax.f32 %v612_v19, 0.0 }
 0x12e   : > { %v797_v25 = vmax.f32 %v623_v21, 0.0 }
 0x12f   : > { %v795_v27 = vmax.f32 %v615_v23, 0.0 }
 0x130   : > { %v863_v28 = vpack.c.bf16 %v797_v25, %v796_v24 }
 0x131   : > { %v862_v29 = vpack.c.bf16 %v795_v27, %v794_v26  ;;  %v2947_v30 = vpop.f32.mrb[28].mxu0 }
 0x132   : > { %v636_v31 = vadd.f32 %v2947_v30, %v3736_v50  ;;  %v627_v32 = vpop.f32.mrb[29].mxu0 }
 0x133   : > { %v628_v33 = vadd.f32 %v627_v32, %v3736_v50  ;;  %v2948_v34 = vpop.f32.mrb[30].mxu0  ;;  %3021 = vmatprep.mubr.bf16.mxu1 %v862_v29 }
 0x134   : > { %v639_v35 = vadd.f32 %v2948_v34, %v3736_v50  ;;  %v630_v36 = vpop.f32.mrb[31].mxu0  ;;  %3022 = vmatmul.mubr.bf16.gmra.mrb[24].mxu1 %v863_v28  ;;  %v800_v38 = vmax.f32 %v636_v31, 0.0 }
 0x135   : > { %v631_v37 = vadd.f32 %v630_v36, %v3736_v50  ;;  %v798_v40 = vmax.f32 %v628_v33, 0.0 }
 0x136   : > { %v801_v39 = vmax.f32 %v639_v35, 0.0 }
 0x137   : > { %v799_v41 = vmax.f32 %v631_v37, 0.0 }
 0x138   : > { %v865_v42 = vpack.c.bf16 %v801_v39, %v800_v38 }
 0x139   : > { %v864_v43 = vpack.c.bf16 %v799_v41, %v798_v40  ;;  %v2951_v44 = vpop.f32.mrb[32].mxu0 }
 0x13a   : > { %v652_v45 = vadd.f32 %v2951_v44, %v3736_v50  ;;  %v643_v47 = vpop.f32.mrb[33].mxu0 }
 0x13b   : > { %v644_v49 = vadd.f32 %v643_v47, %v3736_v50  ;;  %v2952_v51 = vpop.f32.mrb[34].mxu0  ;;  %3025 = vmatprep.mubr.bf16.mxu1 %v864_v43 }
 0x13c   : > { %v655_v52 = vadd.f32 %v2952_v51, %v3736_v50  ;;  %v646_v53 = vpop.f32.mrb[35].mxu0  ;;  %3026 = vmatmul.mubr.bf16.gmra.mrb[28].mxu1 %v865_v42  ;;  %v804_v55 = vmax.f32 %v652_v45, 0.0 }
 0x13d   : > { %v647_v54 = vadd.f32 %v646_v53, %v3736_v50  ;;  %v802_v57 = vmax.f32 %v644_v49, 0.0 }
 0x13e   : > { %v805_v56 = vmax.f32 %v655_v52, 0.0 }
 0x13f   : > { %v803_v58 = vmax.f32 %v647_v54, 0.0 }
 0x140   : > { %v867_v59 = vpack.c.bf16 %v805_v56, %v804_v55 }
 0x141   : > { %v866_v60 = vpack.c.bf16 %v803_v58, %v802_v57  ;;  %v2955_v61 = vpop.f32.mrb[36].mxu0 }
 0x142   : > { %v668_v62 = vadd.f32 %v2955_v61, %v3736_v50  ;;  %v659_v63 = vpop.f32.mrb[37].mxu0 }
 0x143   : > { %v660_v0 = vadd.f32 %v659_v63, %v3736_v50  ;;  %v2956_v1 = vpop.f32.mrb[38].mxu0  ;;  %3029 = vmatprep.mubr.bf16.mxu1 %v866_v60 }
 0x144   : > { %v671_v2 = vadd.f32 %v2956_v1, %v3736_v50  ;;  %v662_v3 = vpop.f32.mrb[39].mxu0  ;;  %3030 = vmatmul.mubr.bf16.gmra.mrb[32].mxu1 %v867_v59  ;;  %v808_v5 = vmax.f32 %v668_v62, 0.0 }
 0x145   : > { %v663_v4 = vadd.f32 %v662_v3, %v3736_v50  ;;  %v806_v7 = vmax.f32 %v660_v0, 0.0 }
 0x146   : > { %v809_v6 = vmax.f32 %v671_v2, 0.0 }
 0x147   : > { %v807_v8 = vmax.f32 %v663_v4, 0.0 }
 0x148   : > { %v869_v9 = vpack.c.bf16 %v809_v6, %v808_v5 }
 0x149   : > { %v868_v10 = vpack.c.bf16 %v807_v8, %v806_v7  ;;  %v2959_v11 = vpop.f32.mrb[40].mxu0 }
 0x14a   : > { %v684_v12 = vadd.f32 %v2959_v11, %v3736_v50  ;;  %v675_v13 = vpop.f32.mrb[41].mxu0 }
 0x14b   : > { %v676_v14 = vadd.f32 %v675_v13, %v3736_v50  ;;  %v2960_v15 = vpop.f32.mrb[42].mxu0  ;;  %3033 = vmatprep.mubr.bf16.mxu1 %v868_v10 }
 0x14c   : > { %v687_v16 = vadd.f32 %v2960_v15, %v3736_v50  ;;  %v678_v17 = vpop.f32.mrb[43].mxu0  ;;  %3034 = vmatmul.mubr.bf16.gmra.mrb[36].mxu1 %v869_v9  ;;  %v812_v19 = vmax.f32 %v684_v12, 0.0 }
 0x14d   : > { %v679_v18 = vadd.f32 %v678_v17, %v3736_v50  ;;  %v810_v21 = vmax.f32 %v676_v14, 0.0 }
 0x14e   : > { %v813_v20 = vmax.f32 %v687_v16, 0.0 }
 0x14f   : > { %v811_v22 = vmax.f32 %v679_v18, 0.0 }
 0x150   : > { %v871_v23 = vpack.c.bf16 %v813_v20, %v812_v19 }
 0x151   : > { %v870_v24 = vpack.c.bf16 %v811_v22, %v810_v21  ;;  %v2963_v25 = vpop.f32.mrb[44].mxu0 }
 0x152   : > { %v700_v26 = vadd.f32 %v2963_v25, %v3736_v50  ;;  %v691_v27 = vpop.f32.mrb[45].mxu0 }
 0x153   : > { %v692_v28 = vadd.f32 %v691_v27, %v3736_v50  ;;  %v2964_v29 = vpop.f32.mrb[46].mxu0  ;;  %3037 = vmatprep.mubr.bf16.mxu1 %v870_v24 }
 0x154   : > { %v703_v30 = vadd.f32 %v2964_v29, %v3736_v50  ;;  %v694_v31 = vpop.f32.mrb[47].mxu0  ;;  %3038 = vmatmul.mubr.bf16.gmra.mrb[40].mxu1 %v871_v23  ;;  %v816_v33 = vmax.f32 %v700_v26, 0.0 }
 0x155   : > { %v695_v32 = vadd.f32 %v694_v31, %v3736_v50  ;;  %v814_v35 = vmax.f32 %v692_v28, 0.0 }
 0x156   : > { %v817_v34 = vmax.f32 %v703_v30, 0.0 }
 0x157   : > { %v815_v36 = vmax.f32 %v695_v32, 0.0 }
 0x158   : > { %v873_v37 = vpack.c.bf16 %v817_v34, %v816_v33  ;;  %v3297_v34 = vld [vmem:[%s4509_s4] sm:$0xff]  }
 0x159   : > { %v872_v38 = vpack.c.bf16 %v815_v36, %v814_v35  ;;  %v2967_v39 = vpop.f32.mrb[48].mxu0  ;;  %3141 = vmatprep.subr.bf16.mxu0 %v3297_v34  ;;  %3221 = vmatprep.subr.bf16.mxu1 %v3297_v34  ;;  %v884_v35 = vsub.s32 1, %v3724_v46 }
 0x15a   : > { %v716_v40 = vadd.f32 %v2967_v39, %v3736_v50  ;;  %v707_v41 = vpop.f32.mrb[49].mxu0  ;;  %3229 = vmatpush3.bf16.msra.mxu1 %v3297_v34 }
 0x15b   : > { %v708_v42 = vadd.f32 %v707_v41, %v3736_v50  ;;  %v2968_v43 = vpop.f32.mrb[50].mxu0  ;;  %3041 = vmatprep.mubr.bf16.mxu1 %v872_v38  ;;  %v3825_v36 = vrot.slane %v3730_v48, %v884_v35  ;;  %v3299_v48 = vld [vmem:[%s4509_s4 + $0x10] sm:$0xff]  }
 0x15c   : > { %v719_v44 = vadd.f32 %v2968_v43, %v3736_v50  ;;  %v710_v45 = vpop.f32.mrb[51].mxu0  ;;  %3042 = vmatmul.mubr.bf16.gmra.mrb[44].mxu1 %v873_v37  ;;  %v820_v49 = vmax.f32 %v716_v40, 0.0 }
 0x15d   : > { %v711_v47 = vadd.f32 %v710_v45, %v3736_v50  ;;  %v818_v52 = vmax.f32 %v708_v42, 0.0 }
 0x15e   : > { %v821_v51 = vmax.f32 %v719_v44, 0.0 }
 0x15f   : > { %v819_v53 = vmax.f32 %v711_v47, 0.0 }
 0x160   : > { %v875_v54 = vpack.c.bf16 %v821_v51, %v820_v49  ;;  %v3300_v49 = vld [vmem:[%s4509_s4 + $0x18] sm:$0xff]  }
 0x161   : > { %v874_v55 = vpack.c.bf16 %v819_v53, %v818_v52  ;;  %v2971_v56 = vpop.f32.mrb[52].mxu0 }
 0x162   : > { %v732_v57 = vadd.f32 %v2971_v56, %v3736_v50  ;;  %v723_v58 = vpop.f32.mrb[53].mxu0 }
 0x163   : > { %v724_v59 = vadd.f32 %v723_v58, %v3736_v50  ;;  %v2972_v60 = vpop.f32.mrb[54].mxu0  ;;  %3045 = vmatprep.mubr.bf16.mxu1 %v874_v55  ;;  %v3301_v58 = vld [vmem:[%s4509_s4 + $0x20] sm:$0xff]  }
 0x164   : > { %v735_v61 = vadd.f32 %v2972_v60, %v3736_v50  ;;  %v726_v62 = vpop.f32.mrb[55].mxu0  ;;  %3046 = vmatmul.mubr.bf16.gmra.mrb[48].mxu1 %v875_v54  ;;  %v824_v0 = vmax.f32 %v732_v57, 0.0 }
 0x165   : > { %v727_v63 = vadd.f32 %v726_v62, %v3736_v50  ;;  %v822_v2 = vmax.f32 %v724_v59, 0.0 }
 0x166   : > { %v825_v1 = vmax.f32 %v735_v61, 0.0 }
 0x167   : > { %v823_v3 = vmax.f32 %v727_v63, 0.0 }
 0x168   : > { %v877_v4 = vpack.c.bf16 %v825_v1, %v824_v0 }
 0x169   : > { %v876_v5 = vpack.c.bf16 %v823_v3, %v822_v2  ;;  %v2975_v6 = vpop.f32.mrb[56].mxu0  ;;  %v3302_v2 = vld [vmem:[%s4509_s4 + $0x28] sm:$0xff]  }
 0x16a   : > { %v748_v7 = vadd.f32 %v2975_v6, %v3736_v50  ;;  %v739_v8 = vpop.f32.mrb[57].mxu0 }
 0x16b   : > { %v740_v9 = vadd.f32 %v739_v8, %v3736_v50  ;;  %v2976_v10 = vpop.f32.mrb[58].mxu0  ;;  %3049 = vmatprep.mubr.bf16.mxu1 %v876_v5 }
 0x16c   : > { %v751_v11 = vadd.f32 %v2976_v10, %v3736_v50  ;;  %v742_v12 = vpop.f32.mrb[59].mxu0  ;;  %3050 = vmatmul.mubr.bf16.gmra.mrb[52].mxu1 %v877_v4  ;;  %v828_v14 = vmax.f32 %v748_v7, 0.0  ;;  %v3303_v10 = vld [vmem:[%s4509_s4 + $0x30] sm:$0xff]  }
 0x16d   : > { %v743_v13 = vadd.f32 %v742_v12, %v3736_v50  ;;  %v826_v16 = vmax.f32 %v740_v9, 0.0 }
 0x16e   : > { %v829_v15 = vmax.f32 %v751_v11, 0.0 }
 0x16f   : > { %v827_v17 = vmax.f32 %v743_v13, 0.0 }
 0x170   : > { %v879_v18 = vpack.c.bf16 %v829_v15, %v828_v14 }
 0x171   : > { %v878_v19 = vpack.c.bf16 %v827_v17, %v826_v16  ;;  %v2979_v20 = vpop.f32.mrb[60].mxu0 }
 0x172   : > { %v764_v21 = vadd.f32 %v2979_v20, %v3736_v50  ;;  %v755_v22 = vpop.f32.mrb[61].mxu0 }
 0x173   : > { %v756_v23 = vadd.f32 %v755_v22, %v3736_v50  ;;  %v2980_v24 = vpop.f32.mrb[62].mxu0  ;;  %3053 = vmatprep.mubr.bf16.mxu1 %v878_v19 }
 0x174   : > { %v767_v25 = vadd.f32 %v2980_v24, %v3736_v50  ;;  %v758_v26 = vpop.f32.mrb[63].mxu0  ;;  %3054 = vmatmul.mubr.bf16.gmra.mrb[56].mxu1 %v879_v18  ;;  %v832_v28 = vmax.f32 %v764_v21, 0.0  ;;  %v3304_v18 = vld [vmem:[%s4509_s4 + $0x38] sm:$0xff]  }
 0x175   : > { %v759_v27 = vadd.f32 %v758_v26, %v3736_v50  ;;  %v830_v30 = vmax.f32 %v756_v23, 0.0  ;;  %v3298_v50 = vld [vmem:[%s4509_s4 + $0x8] sm:$0xff]  }
 0x176   : > { %v833_v29 = vmax.f32 %v767_v25, 0.0  ;;  %3222 = vmatprep.subr.bf16.mxu1 %v3298_v50 }
 0x177   : > { %v831_v31 = vmax.f32 %v759_v27, 0.0  ;;  %3230 = vmatpush3.bf16.msra.mxu1 %v3298_v50 }
 0x178   : > { %v881_v32 = vpack.c.bf16 %v833_v29, %v832_v28  ;;  %3223 = vmatprep.subr.bf16.mxu1 %v3299_v48 }
 0x179   : > { %v880_v33 = vpack.c.bf16 %v831_v31, %v830_v30 }
 0x17b   : > { %3057 = vmatprep.mubr.bf16.mxu1 %v880_v33  ;;  %3231 = vmatpush3.bf16.msra.mxu1 %v3299_v48 }
 0x17c   : > { %3058 = vmatmul.mubr.bf16.gmra.mrb[60].mxu1 %v881_v32  ;;  %3224 = vmatprep.subr.bf16.mxu1 %v3300_v49 }
 0x17f   : > { %3232 = vmatpush3.bf16.msra.mxu1 %v3300_v49 }
 0x180   : > { %3225 = vmatprep.subr.bf16.mxu1 %v3301_v58 }
 0x183   : > { %3233 = vmatpush3.bf16.msra.mxu1 %v3301_v58 }
 0x184   : > { %3226 = vmatprep.subr.bf16.mxu1 %v3302_v2 }
 0x187   : > { %3234 = vmatpush3.bf16.msra.mxu1 %v3302_v2 }
 0x188   : > { %3227 = vmatprep.subr.bf16.mxu1 %v3303_v10 }
 0x18b   : > { %3235 = vmatpush3.bf16.msra.mxu1 %v3303_v10 }
 0x18c   : > { %3228 = vmatprep.subr.bf16.mxu1 %v3304_v18 }
 0x18f   : > { %3236 = vmatpush3.bf16.msra.mxu1 %v3304_v18 }
 0x1d7   : > { %v2999_v37 = vpop.f32.mrb[0].mxu1 }
 0x1d8   : > { %v977_v38 = vadd.f32 %v2999_v37, %v3825_v36  ;;  %v968_v39 = vpop.f32.mrb[1].mxu1 }
 0x1d9   : > { %v969_v40 = vadd.f32 %v968_v39, %v3825_v36  ;;  %v3000_v41 = vpop.f32.mrb[2].mxu1 }
 0x1da   : > { %v980_v42 = vadd.f32 %v3000_v41, %v3825_v36  ;;  %v971_v43 = vpop.f32.mrb[3].mxu1  ;;  %v1225_v45 = vmax.f32 %v977_v38, 0.0 }
 0x1db   : > { %v972_v44 = vadd.f32 %v971_v43, %v3825_v36  ;;  %v1223_v51 = vmax.f32 %v969_v40, 0.0 }
 0x1dc   : > { %v1226_v47 = vmax.f32 %v980_v42, 0.0 }
 0x1dd   : > { %v1224_v52 = vmax.f32 %v972_v44, 0.0 }
 0x1de   : > { %v1305_v53 = vpack.c.bf16 %v1226_v47, %v1225_v45 }
 0x1df   : > { %v1304_v54 = vpack.c.bf16 %v1224_v52, %v1223_v51  ;;  %v3003_v55 = vpop.f32.mrb[4].mxu1 }
 0x1e0   : > { %v993_v56 = vadd.f32 %v3003_v55, %v3825_v36  ;;  %v984_v57 = vpop.f32.mrb[5].mxu1 }
 0x1e1   : > { %v985_v59 = vadd.f32 %v984_v57, %v3825_v36  ;;  %v3004_v60 = vpop.f32.mrb[6].mxu1  ;;  %3077 = vmatprep.mubr.bf16.mxu0 %v1304_v54 }
 0x1e2   : > { %v996_v61 = vadd.f32 %v3004_v60, %v3825_v36  ;;  %v987_v62 = vpop.f32.mrb[7].mxu1  ;;  %3078 = vmatmul.mubr.bf16.vlgmr.msra.gmra.mrb[64].mxu0 %v1305_v53  ;;  %v1229_v0 = vmax.f32 %v993_v56, 0.0 }
 0x1e3   : > { %v988_v63 = vadd.f32 %v987_v62, %v3825_v36  ;;  %3142 = vmatpush3.bf16.msra.mxu0 %v3297_v34  ;;  %v1227_v3 = vmax.f32 %v985_v59, 0.0 }
 0x1e4   : > { %v1230_v1 = vmax.f32 %v996_v61, 0.0  ;;  %3143 = vmatprep.subr.bf16.mxu0 %v3298_v50 }
 0x1e5   : > { %v1228_v4 = vmax.f32 %v988_v63, 0.0 }
 0x1e6   : > { %v1307_v5 = vpack.c.bf16 %v1230_v1, %v1229_v0 }
 0x1e7   : > { %v1306_v6 = vpack.c.bf16 %v1228_v4, %v1227_v3  ;;  %v3007_v7 = vpop.f32.mrb[8].mxu1  ;;  %3144 = vmatpush3.bf16.msra.mxu0 %v3298_v50 }
 0x1e8   : > { %v1009_v8 = vadd.f32 %v3007_v7, %v3825_v36  ;;  %v1000_v9 = vpop.f32.mrb[9].mxu1  ;;  %3145 = vmatprep.subr.bf16.mxu0 %v3299_v48 }
 0x1e9   : > { %v1001_v11 = vadd.f32 %v1000_v9, %v3825_v36  ;;  %v3008_v12 = vpop.f32.mrb[10].mxu1  ;;  %3081 = vmatprep.mubr.bf16.mxu0 %v1306_v6 }
 0x1ea   : > { %v1012_v13 = vadd.f32 %v3008_v12, %v3825_v36  ;;  %v1003_v14 = vpop.f32.mrb[11].mxu1  ;;  %3082 = vmatmul.mubr.bf16.gmra.mrb[68].mxu0 %v1307_v5  ;;  %v1233_v16 = vmax.f32 %v1009_v8, 0.0 }
 0x1eb   : > { %v1004_v15 = vadd.f32 %v1003_v14, %v3825_v36  ;;  %3146 = vmatpush3.bf16.msra.mxu0 %v3299_v48  ;;  %v1231_v19 = vmax.f32 %v1001_v11, 0.0 }
 0x1ec   : > { %v1234_v17 = vmax.f32 %v1012_v13, 0.0  ;;  %3147 = vmatprep.subr.bf16.mxu0 %v3300_v49 }
 0x1ed   : > { %v1232_v20 = vmax.f32 %v1004_v15, 0.0 }
 0x1ee   : > { %v1309_v21 = vpack.c.bf16 %v1234_v17, %v1233_v16 }
 0x1ef   : > { %v1308_v22 = vpack.c.bf16 %v1232_v20, %v1231_v19  ;;  %v3011_v23 = vpop.f32.mrb[12].mxu1  ;;  %3148 = vmatpush3.bf16.msra.mxu0 %v3300_v49 }
 0x1f0   : > { %v1025_v24 = vadd.f32 %v3011_v23, %v3825_v36  ;;  %v1016_v25 = vpop.f32.mrb[13].mxu1  ;;  %3149 = vmatprep.subr.bf16.mxu0 %v3301_v58 }
 0x1f1   : > { %v1017_v26 = vadd.f32 %v1016_v25, %v3825_v36  ;;  %v3012_v27 = vpop.f32.mrb[14].mxu1  ;;  %3085 = vmatprep.mubr.bf16.mxu0 %v1308_v22 }
 0x1f2   : > { %v1028_v28 = vadd.f32 %v3012_v27, %v3825_v36  ;;  %v1019_v29 = vpop.f32.mrb[15].mxu1  ;;  %3086 = vmatmul.mubr.bf16.gmra.mrb[72].mxu0 %v1309_v21  ;;  %v1237_v31 = vmax.f32 %v1025_v24, 0.0 }
 0x1f3   : > { %v1020_v30 = vadd.f32 %v1019_v29, %v3825_v36  ;;  %3150 = vmatpush3.bf16.msra.mxu0 %v3301_v58  ;;  %v1235_v33 = vmax.f32 %v1017_v26, 0.0 }
 0x1f4   : > { %v1238_v32 = vmax.f32 %v1028_v28, 0.0  ;;  %3151 = vmatprep.subr.bf16.mxu0 %v3302_v2 }
 0x1f5   : > { %v1236_v34 = vmax.f32 %v1020_v30, 0.0 }
 0x1f6   : > { %v1311_v35 = vpack.c.bf16 %v1238_v32, %v1237_v31 }
 0x1f7   : > { %v1310_v50 = vpack.c.bf16 %v1236_v34, %v1235_v33  ;;  %v3015_v37 = vpop.f32.mrb[16].mxu1  ;;  %3152 = vmatpush3.bf16.msra.mxu0 %v3302_v2 }
 0x1f8   : > { %v1041_v38 = vadd.f32 %v3015_v37, %v3825_v36  ;;  %v1032_v39 = vpop.f32.mrb[17].mxu1  ;;  %3153 = vmatprep.subr.bf16.mxu0 %v3303_v10 }
 0x1f9   : > { %v1033_v40 = vadd.f32 %v1032_v39, %v3825_v36  ;;  %v3016_v41 = vpop.f32.mrb[18].mxu1  ;;  %3089 = vmatprep.mubr.bf16.mxu0 %v1310_v50 }
 0x1fa   : > { %v1044_v42 = vadd.f32 %v3016_v41, %v3825_v36  ;;  %v1035_v43 = vpop.f32.mrb[19].mxu1  ;;  %3090 = vmatmul.mubr.bf16.gmra.mrb[76].mxu0 %v1311_v35  ;;  %v1241_v44 = vmax.f32 %v1041_v38, 0.0 }
 0x1fb   : > { %v1036_v48 = vadd.f32 %v1035_v43, %v3825_v36  ;;  %3154 = vmatpush3.bf16.msra.mxu0 %v3303_v10  ;;  %v1239_v47 = vmax.f32 %v1033_v40, 0.0 }
 0x1fc   : > { %v1242_v45 = vmax.f32 %v1044_v42, 0.0  ;;  %3155 = vmatprep.subr.bf16.mxu0 %v3304_v18 }
 0x1fd   : > { %v1240_v49 = vmax.f32 %v1036_v48, 0.0 }
 0x1fe   : > { %v1313_v51 = vpack.c.bf16 %v1242_v45, %v1241_v44 }
 0x1ff   : > { %v1312_v52 = vpack.c.bf16 %v1240_v49, %v1239_v47  ;;  %v3019_v53 = vpop.f32.mrb[20].mxu1  ;;  %3156 = vmatpush3.bf16.msra.mxu0 %v3304_v18 }
 0x200   : > { %v1057_v54 = vadd.f32 %v3019_v53, %v3825_v36  ;;  %v1048_v55 = vpop.f32.mrb[21].mxu1 }
 0x201   : > { %v1049_v56 = vadd.f32 %v1048_v55, %v3825_v36  ;;  %v3020_v57 = vpop.f32.mrb[22].mxu1  ;;  %3093 = vmatprep.mubr.bf16.mxu0 %v1312_v52 }
 0x202   : > { %v1060_v58 = vadd.f32 %v3020_v57, %v3825_v36  ;;  %v1051_v59 = vpop.f32.mrb[23].mxu1  ;;  %3094 = vmatmul.mubr.bf16.gmra.mrb[80].mxu0 %v1313_v51  ;;  %v1245_v61 = vmax.f32 %v1057_v54, 0.0 }
 0x203   : > { %v1052_v60 = vadd.f32 %v1051_v59, %v3825_v36  ;;  %v1243_v63 = vmax.f32 %v1049_v56, 0.0 }
 0x204   : > { %v1246_v62 = vmax.f32 %v1060_v58, 0.0 }
 0x205   : > { %v1244_v0 = vmax.f32 %v1052_v60, 0.0 }
 0x206   : > { %v1315_v1 = vpack.c.bf16 %v1246_v62, %v1245_v61 }
 0x207   : > { %v1314_v2 = vpack.c.bf16 %v1244_v0, %v1243_v63  ;;  %v3023_v3 = vpop.f32.mrb[24].mxu1 }
 0x208   : > { %v1073_v4 = vadd.f32 %v3023_v3, %v3825_v36  ;;  %v1064_v5 = vpop.f32.mrb[25].mxu1 }
 0x209   : > { %v1065_v6 = vadd.f32 %v1064_v5, %v3825_v36  ;;  %v3024_v7 = vpop.f32.mrb[26].mxu1  ;;  %3097 = vmatprep.mubr.bf16.mxu0 %v1314_v2 }
 0x20a   : > { %v1076_v8 = vadd.f32 %v3024_v7, %v3825_v36  ;;  %v1067_v9 = vpop.f32.mrb[27].mxu1  ;;  %3098 = vmatmul.mubr.bf16.gmra.mrb[84].mxu0 %v1315_v1  ;;  %v1249_v11 = vmax.f32 %v1073_v4, 0.0 }
 0x20b   : > { %v1068_v10 = vadd.f32 %v1067_v9, %v3825_v36  ;;  %v1247_v13 = vmax.f32 %v1065_v6, 0.0 }
 0x20c   : > { %v1250_v12 = vmax.f32 %v1076_v8, 0.0 }
 0x20d   : > { %v1248_v14 = vmax.f32 %v1068_v10, 0.0 }
 0x20e   : > { %v1317_v15 = vpack.c.bf16 %v1250_v12, %v1249_v11 }
 0x20f   : > { %v1316_v16 = vpack.c.bf16 %v1248_v14, %v1247_v13  ;;  %v3027_v17 = vpop.f32.mrb[28].mxu1 }
 0x210   : > { %v1089_v18 = vadd.f32 %v3027_v17, %v3825_v36  ;;  %v1080_v19 = vpop.f32.mrb[29].mxu1 }
 0x211   : > { %v1081_v20 = vadd.f32 %v1080_v19, %v3825_v36  ;;  %v3028_v21 = vpop.f32.mrb[30].mxu1  ;;  %3101 = vmatprep.mubr.bf16.mxu0 %v1316_v16 }
 0x212   : > { %v1092_v22 = vadd.f32 %v3028_v21, %v3825_v36  ;;  %v1083_v23 = vpop.f32.mrb[31].mxu1  ;;  %3102 = vmatmul.mubr.bf16.gmra.mrb[88].mxu0 %v1317_v15  ;;  %v1253_v25 = vmax.f32 %v1089_v18, 0.0 }
 0x213   : > { %v1084_v24 = vadd.f32 %v1083_v23, %v3825_v36  ;;  %v1251_v27 = vmax.f32 %v1081_v20, 0.0 }
 0x214   : > { %v1254_v26 = vmax.f32 %v1092_v22, 0.0 }
 0x215   : > { %v1252_v28 = vmax.f32 %v1084_v24, 0.0 }
 0x216   : > { %v1319_v29 = vpack.c.bf16 %v1254_v26, %v1253_v25 }
 0x217   : > { %v1318_v30 = vpack.c.bf16 %v1252_v28, %v1251_v27  ;;  %v3031_v31 = vpop.f32.mrb[32].mxu1 }
 0x218   : > { %v1105_v32 = vadd.f32 %v3031_v31, %v3825_v36  ;;  %v1096_v33 = vpop.f32.mrb[33].mxu1 }
 0x219   : > { %v1097_v34 = vadd.f32 %v1096_v33, %v3825_v36  ;;  %v3032_v35 = vpop.f32.mrb[34].mxu1  ;;  %3105 = vmatprep.mubr.bf16.mxu0 %v1318_v30 }
 0x21a   : > { %v1108_v50 = vadd.f32 %v3032_v35, %v3825_v36  ;;  %v1099_v37 = vpop.f32.mrb[35].mxu1  ;;  %3106 = vmatmul.mubr.bf16.gmra.mrb[92].mxu0 %v1319_v29  ;;  %v1257_v39 = vmax.f32 %v1105_v32, 0.0 }
 0x21b   : > { %v1100_v38 = vadd.f32 %v1099_v37, %v3825_v36  ;;  %v1255_v41 = vmax.f32 %v1097_v34, 0.0 }
 0x21c   : > { %v1258_v40 = vmax.f32 %v1108_v50, 0.0 }
 0x21d   : > { %v1256_v42 = vmax.f32 %v1100_v38, 0.0 }
 0x21e   : > { %v1321_v43 = vpack.c.bf16 %v1258_v40, %v1257_v39 }
 0x21f   : > { %v1320_v48 = vpack.c.bf16 %v1256_v42, %v1255_v41  ;;  %v3035_v44 = vpop.f32.mrb[36].mxu1 }
 0x220   : > { %v1121_v45 = vadd.f32 %v3035_v44, %v3825_v36  ;;  %v1112_v47 = vpop.f32.mrb[37].mxu1 }
 0x221   : > { %v1113_v49 = vadd.f32 %v1112_v47, %v3825_v36  ;;  %v3036_v51 = vpop.f32.mrb[38].mxu1  ;;  %3109 = vmatprep.mubr.bf16.mxu0 %v1320_v48 }
 0x222   : > { %v1124_v52 = vadd.f32 %v3036_v51, %v3825_v36  ;;  %v1115_v53 = vpop.f32.mrb[39].mxu1  ;;  %3110 = vmatmul.mubr.bf16.gmra.mrb[96].mxu0 %v1321_v43  ;;  %v1261_v55 = vmax.f32 %v1121_v45, 0.0 }
 0x223   : > { %v1116_v54 = vadd.f32 %v1115_v53, %v3825_v36  ;;  %v1259_v57 = vmax.f32 %v1113_v49, 0.0 }
 0x224   : > { %v1262_v56 = vmax.f32 %v1124_v52, 0.0 }
 0x225   : > { %v1260_v58 = vmax.f32 %v1116_v54, 0.0 }
 0x226   : > { %v1323_v59 = vpack.c.bf16 %v1262_v56, %v1261_v55 }
 0x227   : > { %v1322_v60 = vpack.c.bf16 %v1260_v58, %v1259_v57  ;;  %v3039_v61 = vpop.f32.mrb[40].mxu1 }
 0x228   : > { %v1137_v62 = vadd.f32 %v3039_v61, %v3825_v36  ;;  %v1128_v63 = vpop.f32.mrb[41].mxu1 }
 0x229   : > { %v1129_v0 = vadd.f32 %v1128_v63, %v3825_v36  ;;  %v3040_v1 = vpop.f32.mrb[42].mxu1  ;;  %3113 = vmatprep.mubr.bf16.mxu0 %v1322_v60 }
 0x22a   : > { %v1140_v2 = vadd.f32 %v3040_v1, %v3825_v36  ;;  %v1131_v3 = vpop.f32.mrb[43].mxu1  ;;  %3114 = vmatmul.mubr.bf16.gmra.mrb[100].mxu0 %v1323_v59  ;;  %v1265_v5 = vmax.f32 %v1137_v62, 0.0 }
 0x22b   : > { %v1132_v4 = vadd.f32 %v1131_v3, %v3825_v36  ;;  %v1263_v7 = vmax.f32 %v1129_v0, 0.0 }
 0x22c   : > { %v1266_v6 = vmax.f32 %v1140_v2, 0.0 }
 0x22d   : > { %v1264_v8 = vmax.f32 %v1132_v4, 0.0 }
 0x22e   : > { %v1325_v9 = vpack.c.bf16 %v1266_v6, %v1265_v5 }
 0x22f   : > { %v1324_v10 = vpack.c.bf16 %v1264_v8, %v1263_v7  ;;  %v3043_v11 = vpop.f32.mrb[44].mxu1 }
 0x230   : > { %v1153_v12 = vadd.f32 %v3043_v11, %v3825_v36  ;;  %v1144_v13 = vpop.f32.mrb[45].mxu1 }
 0x231   : > { %v1145_v14 = vadd.f32 %v1144_v13, %v3825_v36  ;;  %v3044_v15 = vpop.f32.mrb[46].mxu1  ;;  %3117 = vmatprep.mubr.bf16.mxu0 %v1324_v10 }
 0x232   : > { %v1156_v16 = vadd.f32 %v3044_v15, %v3825_v36  ;;  %v1147_v17 = vpop.f32.mrb[47].mxu1  ;;  %3118 = vmatmul.mubr.bf16.gmra.mrb[104].mxu0 %v1325_v9  ;;  %v1269_v19 = vmax.f32 %v1153_v12, 0.0 }
 0x233   : > { %v1148_v18 = vadd.f32 %v1147_v17, %v3825_v36  ;;  %v1267_v21 = vmax.f32 %v1145_v14, 0.0 }
 0x234   : > { %v1270_v20 = vmax.f32 %v1156_v16, 0.0 }
 0x235   : > { %v1268_v22 = vmax.f32 %v1148_v18, 0.0 }
 0x236   : > { %v1327_v23 = vpack.c.bf16 %v1270_v20, %v1269_v19  ;;  %v1338_v19 = vsub.s32 2, %v3724_v46  ;;  %v3916_v20 = vld [vmem:[%s4506_s1] sm:$0xf] }
 0x237   : > { %v1326_v24 = vpack.c.bf16 %v1268_v22, %v1267_v21  ;;  %v3047_v25 = vpop.f32.mrb[48].mxu1 }
 0x238   : > { %v1169_v26 = vadd.f32 %v3047_v25, %v3825_v36  ;;  %v1160_v27 = vpop.f32.mrb[49].mxu1  ;;  %v3919_v21 = vrot.slane %v3916_v20, %v1338_v19 }
 0x239   : > { %v1161_v28 = vadd.f32 %v1160_v27, %v3825_v36  ;;  %v3048_v29 = vpop.f32.mrb[50].mxu1  ;;  %3121 = vmatprep.mubr.bf16.mxu0 %v1326_v24 }
 0x23a   : > { %v1172_v30 = vadd.f32 %v3048_v29, %v3825_v36  ;;  %v1163_v31 = vpop.f32.mrb[51].mxu1  ;;  %3122 = vmatmul.mubr.bf16.gmra.mrb[108].mxu0 %v1327_v23  ;;  %v1273_v33 = vmax.f32 %v1169_v26, 0.0 }
 0x23b   : > { %v1164_v32 = vadd.f32 %v1163_v31, %v3825_v36  ;;  %v1271_v35 = vmax.f32 %v1161_v28, 0.0 }
 0x23c   : > { %v1274_v34 = vmax.f32 %v1172_v30, 0.0 }
 0x23d   : > { %v1272_v50 = vmax.f32 %v1164_v32, 0.0 }
 0x23e   : > { %v1329_v37 = vpack.c.bf16 %v1274_v34, %v1273_v33 }
 0x23f   : > { %v1328_v38 = vpack.c.bf16 %v1272_v50, %v1271_v35  ;;  %v3051_v39 = vpop.f32.mrb[52].mxu1 }
 0x240   : > { %v1185_v40 = vadd.f32 %v3051_v39, %v3825_v36  ;;  %v1176_v41 = vpop.f32.mrb[53].mxu1 }
 0x241   : > { %v1177_v42 = vadd.f32 %v1176_v41, %v3825_v36  ;;  %v3052_v43 = vpop.f32.mrb[54].mxu1  ;;  %3125 = vmatprep.mubr.bf16.mxu0 %v1328_v38 }
 0x242   : > { %v1188_v48 = vadd.f32 %v3052_v43, %v3825_v36  ;;  %v1179_v44 = vpop.f32.mrb[55].mxu1  ;;  %3126 = vmatmul.mubr.bf16.gmra.mrb[112].mxu0 %v1329_v37  ;;  %v1277_v47 = vmax.f32 %v1185_v40, 0.0 }
 0x243   : > { %v1180_v45 = vadd.f32 %v1179_v44, %v3825_v36  ;;  %v1275_v51 = vmax.f32 %v1177_v42, 0.0 }
 0x244   : > { %v1278_v49 = vmax.f32 %v1188_v48, 0.0 }
 0x245   : > { %v1276_v52 = vmax.f32 %v1180_v45, 0.0 }
 0x246   : > { %v1331_v53 = vpack.c.bf16 %v1278_v49, %v1277_v47 }
 0x247   : > { %v1330_v54 = vpack.c.bf16 %v1276_v52, %v1275_v51  ;;  %v3055_v55 = vpop.f32.mrb[56].mxu1 }
 0x248   : > { %v1201_v56 = vadd.f32 %v3055_v55, %v3825_v36  ;;  %v1192_v57 = vpop.f32.mrb[57].mxu1 }
 0x249   : > { %v1193_v58 = vadd.f32 %v1192_v57, %v3825_v36  ;;  %v3056_v59 = vpop.f32.mrb[58].mxu1  ;;  %3129 = vmatprep.mubr.bf16.mxu0 %v1330_v54 }
 0x24a   : > { %v1204_v60 = vadd.f32 %v3056_v59, %v3825_v36  ;;  %v1195_v61 = vpop.f32.mrb[59].mxu1  ;;  %3130 = vmatmul.mubr.bf16.gmra.mrb[116].mxu0 %v1331_v53  ;;  %v1281_v63 = vmax.f32 %v1201_v56, 0.0 }
 0x24b   : > { %v1196_v62 = vadd.f32 %v1195_v61, %v3825_v36  ;;  %v1279_v1 = vmax.f32 %v1193_v58, 0.0 }
 0x24c   : > { %v1282_v0 = vmax.f32 %v1204_v60, 0.0 }
 0x24d   : > { %v1280_v2 = vmax.f32 %v1196_v62, 0.0 }
 0x24e   : > { %v1333_v3 = vpack.c.bf16 %v1282_v0, %v1281_v63 }
 0x24f   : > { %v1332_v4 = vpack.c.bf16 %v1280_v2, %v1279_v1  ;;  %v3059_v5 = vpop.f32.mrb[60].mxu1 }
 0x250   : > { %v1217_v6 = vadd.f32 %v3059_v5, %v3825_v36  ;;  %v1208_v7 = vpop.f32.mrb[61].mxu1 }
 0x251   : > { %v1209_v8 = vadd.f32 %v1208_v7, %v3825_v36  ;;  %v3060_v9 = vpop.f32.mrb[62].mxu1  ;;  %3133 = vmatprep.mubr.bf16.mxu0 %v1332_v4 }
 0x252   : > { %v1220_v10 = vadd.f32 %v3060_v9, %v3825_v36  ;;  %v1211_v11 = vpop.f32.mrb[63].mxu1  ;;  %3134 = vmatmul.mubr.bf16.gmra.mrb[120].mxu0 %v1333_v3  ;;  %v1285_v13 = vmax.f32 %v1217_v6, 0.0 }
 0x253   : > { %v1212_v12 = vadd.f32 %v1211_v11, %v3825_v36  ;;  %v1283_v15 = vmax.f32 %v1209_v8, 0.0 }
 0x254   : > { %v1286_v14 = vmax.f32 %v1220_v10, 0.0 }
 0x255   : > { %v1284_v16 = vmax.f32 %v1212_v12, 0.0 }
 0x256   : > { %v1335_v17 = vpack.c.bf16 %v1286_v14, %v1285_v13 }
 0x257   : > { %v1334_v18 = vpack.c.bf16 %v1284_v16, %v1283_v15 }
 0x259   : > { %3137 = vmatprep.mubr.bf16.mxu0 %v1334_v18 }
 0x25a   : > { %3138 = vmatmul.mubr.bf16.gmra.mrb[124].mxu0 %v1335_v17 }
 0x2b5   : > { %v3079_v22 = vpop.f32.mrb[64].mxu0 }
 0x2b6   : > { %v1431_v36 = vadd.f32 %v3079_v22, %v3919_v21  ;;  %v1422_v23 = vpop.f32.mrb[65].mxu0 }
 0x2b7   : > { %v1423_v24 = vadd.f32 %v1422_v23, %v3919_v21  ;;  %v3080_v25 = vpop.f32.mrb[66].mxu0 }
 0x2b8   : > { %v1434_v26 = vadd.f32 %v3080_v25, %v3919_v21  ;;  %v1425_v27 = vpop.f32.mrb[67].mxu0  ;;  %v1679_v29 = vmax.f32 %v1431_v36, 0.0 }
 0x2b9   : > { %v1426_v28 = vadd.f32 %v1425_v27, %v3919_v21  ;;  %v1677_v31 = vmax.f32 %v1423_v24, 0.0 }
 0x2ba   : > { %v1680_v30 = vmax.f32 %v1434_v26, 0.0 }
 0x2bb   : > { %v1678_v32 = vmax.f32 %v1426_v28, 0.0 }
 0x2bc   : > { %v1758_v33 = vpack.c.bf16 %v1680_v30, %v1679_v29 }
 0x2bd   : > { %v1757_v34 = vpack.c.bf16 %v1678_v32, %v1677_v31  ;;  %v3083_v35 = vpop.f32.mrb[68].mxu0 }
 0x2be   : > { %v1447_v50 = vadd.f32 %v3083_v35, %v3919_v21  ;;  %v1438_v37 = vpop.f32.mrb[69].mxu0 }
 0x2bf   : > { %v1439_v38 = vadd.f32 %v1438_v37, %v3919_v21  ;;  %v3084_v39 = vpop.f32.mrb[70].mxu0  ;;  %3157 = vmatprep.mubr.bf16.mxu0 %v1757_v34 }
 0x2c0   : > { %v1450_v40 = vadd.f32 %v3084_v39, %v3919_v21  ;;  %v1441_v41 = vpop.f32.mrb[71].mxu0  ;;  %3158 = vmatmul.mubr.bf16.vlgmr.msra.gmra.mrb[128].mxu0 %v1758_v33  ;;  %v1683_v43 = vmax.f32 %v1447_v50, 0.0 }
 0x2c1   : > { %v1442_v42 = vadd.f32 %v1441_v41, %v3919_v21  ;;  %v1681_v44 = vmax.f32 %v1439_v38, 0.0 }
 0x2c2   : > { %v1684_v48 = vmax.f32 %v1450_v40, 0.0 }
 0x2c3   : > { %v1682_v45 = vmax.f32 %v1442_v42, 0.0 }
 0x2c4   : > { %v1760_v47 = vpack.c.bf16 %v1684_v48, %v1683_v43 }
 0x2c5   : > { %v1759_v49 = vpack.c.bf16 %v1682_v45, %v1681_v44  ;;  %v3087_v51 = vpop.f32.mrb[72].mxu0 }
 0x2c6   : > { %v1463_v52 = vadd.f32 %v3087_v51, %v3919_v21  ;;  %v1454_v53 = vpop.f32.mrb[73].mxu0 }
 0x2c7   : > { %v1455_v54 = vadd.f32 %v1454_v53, %v3919_v21  ;;  %v3088_v55 = vpop.f32.mrb[74].mxu0  ;;  %3161 = vmatprep.mubr.bf16.mxu1 %v1759_v49 }
 0x2c8   : > { %v1466_v56 = vadd.f32 %v3088_v55, %v3919_v21  ;;  %v1457_v57 = vpop.f32.mrb[75].mxu0  ;;  %3162 = vmatmul.mubr.bf16.vlgmr.msra.gmra.mrb[64].mxu1 %v1760_v47  ;;  %v1687_v59 = vmax.f32 %v1463_v52, 0.0 }
 0x2c9   : > { %v1458_v58 = vadd.f32 %v1457_v57, %v3919_v21  ;;  %v1685_v61 = vmax.f32 %v1455_v54, 0.0 }
 0x2ca   : > { %v1688_v60 = vmax.f32 %v1466_v56, 0.0 }
 0x2cb   : > { %v1686_v62 = vmax.f32 %v1458_v58, 0.0 }
 0x2cc   : > { %v1762_v63 = vpack.c.bf16 %v1688_v60, %v1687_v59 }
 0x2cd   : > { %v1761_v0 = vpack.c.bf16 %v1686_v62, %v1685_v61  ;;  %v3091_v1 = vpop.f32.mrb[76].mxu0 }
 0x2ce   : > { %v1479_v2 = vadd.f32 %v3091_v1, %v3919_v21  ;;  %v1470_v3 = vpop.f32.mrb[77].mxu0 }
 0x2cf   : > { %v1471_v4 = vadd.f32 %v1470_v3, %v3919_v21  ;;  %v3092_v5 = vpop.f32.mrb[78].mxu0  ;;  %3165 = vmatprep.mubr.bf16.mxu1 %v1761_v0 }
 0x2d0   : > { %v1482_v6 = vadd.f32 %v3092_v5, %v3919_v21  ;;  %v1473_v7 = vpop.f32.mrb[79].mxu0  ;;  %3166 = vmatmul.mubr.bf16.gmra.mrb[68].mxu1 %v1762_v63  ;;  %v1691_v9 = vmax.f32 %v1479_v2, 0.0 }
 0x2d1   : > { %v1474_v8 = vadd.f32 %v1473_v7, %v3919_v21  ;;  %v1689_v11 = vmax.f32 %v1471_v4, 0.0 }
 0x2d2   : > { %v1692_v10 = vmax.f32 %v1482_v6, 0.0 }
 0x2d3   : > { %v1690_v12 = vmax.f32 %v1474_v8, 0.0 }
 0x2d4   : > { %v1764_v13 = vpack.c.bf16 %v1692_v10, %v1691_v9 }
 0x2d5   : > { %v1763_v14 = vpack.c.bf16 %v1690_v12, %v1689_v11  ;;  %v3095_v15 = vpop.f32.mrb[80].mxu0 }
 0x2d6   : > { %v1495_v16 = vadd.f32 %v3095_v15, %v3919_v21  ;;  %v1486_v17 = vpop.f32.mrb[81].mxu0 }
 0x2d7   : > { %v1487_v18 = vadd.f32 %v1486_v17, %v3919_v21  ;;  %v3096_v19 = vpop.f32.mrb[82].mxu0  ;;  %3169 = vmatprep.mubr.bf16.mxu1 %v1763_v14 }
 0x2d8   : > { %v1498_v22 = vadd.f32 %v3096_v19, %v3919_v21  ;;  %v1489_v36 = vpop.f32.mrb[83].mxu0  ;;  %3170 = vmatmul.mubr.bf16.gmra.mrb[72].mxu1 %v1764_v13  ;;  %v1695_v24 = vmax.f32 %v1495_v16, 0.0 }
 0x2d9   : > { %v1490_v23 = vadd.f32 %v1489_v36, %v3919_v21  ;;  %v1693_v26 = vmax.f32 %v1487_v18, 0.0 }
 0x2da   : > { %v1696_v25 = vmax.f32 %v1498_v22, 0.0 }
 0x2db   : > { %v1694_v27 = vmax.f32 %v1490_v23, 0.0 }
 0x2dc   : > { %v1766_v28 = vpack.c.bf16 %v1696_v25, %v1695_v24 }
 0x2dd   : > { %v1765_v29 = vpack.c.bf16 %v1694_v27, %v1693_v26  ;;  %v3099_v30 = vpop.f32.mrb[84].mxu0 }
 0x2de   : > { %v1511_v31 = vadd.f32 %v3099_v30, %v3919_v21  ;;  %v1502_v32 = vpop.f32.mrb[85].mxu0 }
 0x2df   : > { %v1503_v33 = vadd.f32 %v1502_v32, %v3919_v21  ;;  %v3100_v34 = vpop.f32.mrb[86].mxu0  ;;  %3173 = vmatprep.mubr.bf16.mxu1 %v1765_v29 }
 0x2e0   : > { %v1514_v35 = vadd.f32 %v3100_v34, %v3919_v21  ;;  %v1505_v50 = vpop.f32.mrb[87].mxu0  ;;  %3174 = vmatmul.mubr.bf16.gmra.mrb[76].mxu1 %v1766_v28  ;;  %v1699_v38 = vmax.f32 %v1511_v31, 0.0 }
 0x2e1   : > { %v1506_v37 = vadd.f32 %v1505_v50, %v3919_v21  ;;  %v1697_v40 = vmax.f32 %v1503_v33, 0.0 }
 0x2e2   : > { %v1700_v39 = vmax.f32 %v1514_v35, 0.0 }
 0x2e3   : > { %v1698_v41 = vmax.f32 %v1506_v37, 0.0 }
 0x2e4   : > { %v1768_v42 = vpack.c.bf16 %v1700_v39, %v1699_v38 }
 0x2e5   : > { %v1767_v43 = vpack.c.bf16 %v1698_v41, %v1697_v40  ;;  %v3103_v48 = vpop.f32.mrb[88].mxu0 }
 0x2e6   : > { %v1527_v44 = vadd.f32 %v3103_v48, %v3919_v21  ;;  %v1518_v45 = vpop.f32.mrb[89].mxu0 }
 0x2e7   : > { %v1519_v47 = vadd.f32 %v1518_v45, %v3919_v21  ;;  %v3104_v49 = vpop.f32.mrb[90].mxu0  ;;  %3177 = vmatprep.mubr.bf16.mxu1 %v1767_v43 }
 0x2e8   : > { %v1530_v51 = vadd.f32 %v3104_v49, %v3919_v21  ;;  %v1521_v52 = vpop.f32.mrb[91].mxu0  ;;  %3178 = vmatmul.mubr.bf16.gmra.mrb[80].mxu1 %v1768_v42  ;;  %v1703_v54 = vmax.f32 %v1527_v44, 0.0 }
 0x2e9   : > { %v1522_v53 = vadd.f32 %v1521_v52, %v3919_v21  ;;  %v1701_v56 = vmax.f32 %v1519_v47, 0.0 }
 0x2ea   : > { %v1704_v55 = vmax.f32 %v1530_v51, 0.0 }
 0x2eb   : > { %v1702_v57 = vmax.f32 %v1522_v53, 0.0 }
 0x2ec   : > { %v1770_v58 = vpack.c.bf16 %v1704_v55, %v1703_v54 }
 0x2ed   : > { %v1769_v59 = vpack.c.bf16 %v1702_v57, %v1701_v56  ;;  %v3107_v60 = vpop.f32.mrb[92].mxu0 }
 0x2ee   : > { %v1543_v61 = vadd.f32 %v3107_v60, %v3919_v21  ;;  %v1534_v62 = vpop.f32.mrb[93].mxu0 }
 0x2ef   : > { %v1535_v63 = vadd.f32 %v1534_v62, %v3919_v21  ;;  %v3108_v0 = vpop.f32.mrb[94].mxu0  ;;  %3181 = vmatprep.mubr.bf16.mxu1 %v1769_v59 }
 0x2f0   : > { %v1546_v1 = vadd.f32 %v3108_v0, %v3919_v21  ;;  %v1537_v2 = vpop.f32.mrb[95].mxu0  ;;  %3182 = vmatmul.mubr.bf16.gmra.mrb[84].mxu1 %v1770_v58  ;;  %v1707_v4 = vmax.f32 %v1543_v61, 0.0 }
 0x2f1   : > { %v1538_v3 = vadd.f32 %v1537_v2, %v3919_v21  ;;  %v1705_v6 = vmax.f32 %v1535_v63, 0.0 }
 0x2f2   : > { %v1708_v5 = vmax.f32 %v1546_v1, 0.0 }
 0x2f3   : > { %v1706_v7 = vmax.f32 %v1538_v3, 0.0 }
 0x2f4   : > { %v1772_v8 = vpack.c.bf16 %v1708_v5, %v1707_v4 }
 0x2f5   : > { %v1771_v9 = vpack.c.bf16 %v1706_v7, %v1705_v6  ;;  %v3111_v10 = vpop.f32.mrb[96].mxu0 }
 0x2f6   : > { %v1559_v11 = vadd.f32 %v3111_v10, %v3919_v21  ;;  %v1550_v12 = vpop.f32.mrb[97].mxu0 }
 0x2f7   : > { %v1551_v13 = vadd.f32 %v1550_v12, %v3919_v21  ;;  %v3112_v14 = vpop.f32.mrb[98].mxu0  ;;  %3185 = vmatprep.mubr.bf16.mxu1 %v1771_v9 }
 0x2f8   : > { %v1562_v15 = vadd.f32 %v3112_v14, %v3919_v21  ;;  %v1553_v16 = vpop.f32.mrb[99].mxu0  ;;  %3186 = vmatmul.mubr.bf16.gmra.mrb[88].mxu1 %v1772_v8  ;;  %v1711_v18 = vmax.f32 %v1559_v11, 0.0 }
 0x2f9   : > { %v1554_v17 = vadd.f32 %v1553_v16, %v3919_v21  ;;  %v1709_v22 = vmax.f32 %v1551_v13, 0.0 }
 0x2fa   : > { %v1712_v19 = vmax.f32 %v1562_v15, 0.0 }
 0x2fb   : > { %v1710_v36 = vmax.f32 %v1554_v17, 0.0 }
 0x2fc   : > { %v1774_v23 = vpack.c.bf16 %v1712_v19, %v1711_v18 }
 0x2fd   : > { %v1773_v24 = vpack.c.bf16 %v1710_v36, %v1709_v22  ;;  %v3115_v25 = vpop.f32.mrb[100].mxu0 }
 0x2fe   : > { %v1575_v26 = vadd.f32 %v3115_v25, %v3919_v21  ;;  %v1566_v27 = vpop.f32.mrb[101].mxu0 }
 0x2ff   : > { %v1567_v28 = vadd.f32 %v1566_v27, %v3919_v21  ;;  %v3116_v29 = vpop.f32.mrb[102].mxu0  ;;  %3189 = vmatprep.mubr.bf16.mxu1 %v1773_v24 }
 0x300   : > { %v1578_v30 = vadd.f32 %v3116_v29, %v3919_v21  ;;  %v1569_v31 = vpop.f32.mrb[103].mxu0  ;;  %3190 = vmatmul.mubr.bf16.gmra.mrb[92].mxu1 %v1774_v23  ;;  %v1715_v33 = vmax.f32 %v1575_v26, 0.0 }
 0x301   : > { %v1570_v32 = vadd.f32 %v1569_v31, %v3919_v21  ;;  %v1713_v35 = vmax.f32 %v1567_v28, 0.0 }
 0x302   : > { %v1716_v34 = vmax.f32 %v1578_v30, 0.0 }
 0x303   : > { %v1714_v50 = vmax.f32 %v1570_v32, 0.0 }
 0x304   : > { %v1776_v37 = vpack.c.bf16 %v1716_v34, %v1715_v33 }
 0x305   : > { %v1775_v38 = vpack.c.bf16 %v1714_v50, %v1713_v35  ;;  %v3119_v39 = vpop.f32.mrb[104].mxu0 }
 0x306   : > { %v1591_v40 = vadd.f32 %v3119_v39, %v3919_v21  ;;  %v1582_v41 = vpop.f32.mrb[105].mxu0 }
 0x307   : > { %v1583_v42 = vadd.f32 %v1582_v41, %v3919_v21  ;;  %v3120_v43 = vpop.f32.mrb[106].mxu0  ;;  %3193 = vmatprep.mubr.bf16.mxu1 %v1775_v38 }
 0x308   : > { %v1594_v48 = vadd.f32 %v3120_v43, %v3919_v21  ;;  %v1585_v44 = vpop.f32.mrb[107].mxu0  ;;  %3194 = vmatmul.mubr.bf16.gmra.mrb[96].mxu1 %v1776_v37  ;;  %v1719_v47 = vmax.f32 %v1591_v40, 0.0 }
 0x309   : > { %v1586_v45 = vadd.f32 %v1585_v44, %v3919_v21  ;;  %v1717_v51 = vmax.f32 %v1583_v42, 0.0 }
 0x30a   : > { %v1720_v49 = vmax.f32 %v1594_v48, 0.0 }
 0x30b   : > { %v1718_v52 = vmax.f32 %v1586_v45, 0.0 }
 0x30c   : > { %v1778_v53 = vpack.c.bf16 %v1720_v49, %v1719_v47 }
 0x30d   : > { %v1777_v54 = vpack.c.bf16 %v1718_v52, %v1717_v51  ;;  %v3123_v55 = vpop.f32.mrb[108].mxu0 }
 0x30e   : > { %v1607_v56 = vadd.f32 %v3123_v55, %v3919_v21  ;;  %v1598_v57 = vpop.f32.mrb[109].mxu0 }
 0x30f   : > { %v1599_v58 = vadd.f32 %v1598_v57, %v3919_v21  ;;  %v3124_v59 = vpop.f32.mrb[110].mxu0  ;;  %3197 = vmatprep.mubr.bf16.mxu1 %v1777_v54 }
 0x310   : > { %v1610_v60 = vadd.f32 %v3124_v59, %v3919_v21  ;;  %v1601_v61 = vpop.f32.mrb[111].mxu0  ;;  %3198 = vmatmul.mubr.bf16.gmra.mrb[100].mxu1 %v1778_v53  ;;  %v1723_v63 = vmax.f32 %v1607_v56, 0.0 }
 0x311   : > { %v1602_v62 = vadd.f32 %v1601_v61, %v3919_v21  ;;  %v1721_v1 = vmax.f32 %v1599_v58, 0.0 }
 0x312   : > { %v1724_v0 = vmax.f32 %v1610_v60, 0.0 }
 0x313   : > { %v1722_v2 = vmax.f32 %v1602_v62, 0.0 }
 0x314   : > { %v1780_v3 = vpack.c.bf16 %v1724_v0, %v1723_v63  ;;  %v1791_v0 = vsub.s32 3, %v3724_v46 }
 0x315   : > { %v1779_v4 = vpack.c.bf16 %v1722_v2, %v1721_v1  ;;  %v3127_v5 = vpop.f32.mrb[112].mxu0 }
 0x316   : > { %v1623_v6 = vadd.f32 %v3127_v5, %v3919_v21  ;;  %v1614_v7 = vpop.f32.mrb[113].mxu0  ;;  %v3987_v1 = vrot.slane %v3916_v20, %v1791_v0 }
 0x317   : > { %v1615_v8 = vadd.f32 %v1614_v7, %v3919_v21  ;;  %v3128_v9 = vpop.f32.mrb[114].mxu0  ;;  %3201 = vmatprep.mubr.bf16.mxu1 %v1779_v4 }
 0x318   : > { %v1626_v10 = vadd.f32 %v3128_v9, %v3919_v21  ;;  %v1617_v11 = vpop.f32.mrb[115].mxu0  ;;  %3202 = vmatmul.mubr.bf16.gmra.mrb[104].mxu1 %v1780_v3  ;;  %v1727_v13 = vmax.f32 %v1623_v6, 0.0 }
 0x319   : > { %v1618_v12 = vadd.f32 %v1617_v11, %v3919_v21  ;;  %v1725_v15 = vmax.f32 %v1615_v8, 0.0 }
 0x31a   : > { %v1728_v14 = vmax.f32 %v1626_v10, 0.0 }
 0x31b   : > { %v1726_v16 = vmax.f32 %v1618_v12, 0.0 }
 0x31c   : > { %v1782_v17 = vpack.c.bf16 %v1728_v14, %v1727_v13 }
 0x31d   : > { %v1781_v18 = vpack.c.bf16 %v1726_v16, %v1725_v15  ;;  %v3131_v19 = vpop.f32.mrb[116].mxu0 }
 0x31e   : > { %v1639_v22 = vadd.f32 %v3131_v19, %v3919_v21  ;;  %v1630_v36 = vpop.f32.mrb[117].mxu0 }
 0x31f   : > { %v1631_v23 = vadd.f32 %v1630_v36, %v3919_v21  ;;  %v3132_v24 = vpop.f32.mrb[118].mxu0  ;;  %3205 = vmatprep.mubr.bf16.mxu1 %v1781_v18 }
 0x320   : > { %v1642_v25 = vadd.f32 %v3132_v24, %v3919_v21  ;;  %v1633_v26 = vpop.f32.mrb[119].mxu0  ;;  %3206 = vmatmul.mubr.bf16.gmra.mrb[108].mxu1 %v1782_v17  ;;  %v1731_v28 = vmax.f32 %v1639_v22, 0.0 }
 0x321   : > { %v1634_v27 = vadd.f32 %v1633_v26, %v3919_v21  ;;  %v1729_v30 = vmax.f32 %v1631_v23, 0.0 }
 0x322   : > { %v1732_v29 = vmax.f32 %v1642_v25, 0.0 }
 0x323   : > { %v1730_v31 = vmax.f32 %v1634_v27, 0.0 }
 0x324   : > { %v1784_v32 = vpack.c.bf16 %v1732_v29, %v1731_v28 }
 0x325   : > { %v1783_v33 = vpack.c.bf16 %v1730_v31, %v1729_v30  ;;  %v3135_v34 = vpop.f32.mrb[120].mxu0 }
 0x326   : > { %v1655_v35 = vadd.f32 %v3135_v34, %v3919_v21  ;;  %v1646_v50 = vpop.f32.mrb[121].mxu0 }
 0x327   : > { %v1647_v37 = vadd.f32 %v1646_v50, %v3919_v21  ;;  %v3136_v38 = vpop.f32.mrb[122].mxu0  ;;  %3209 = vmatprep.mubr.bf16.mxu1 %v1783_v33 }
 0x328   : > { %v1658_v39 = vadd.f32 %v3136_v38, %v3919_v21  ;;  %v1649_v40 = vpop.f32.mrb[123].mxu0  ;;  %3210 = vmatmul.mubr.bf16.gmra.mrb[112].mxu1 %v1784_v32  ;;  %v1735_v42 = vmax.f32 %v1655_v35, 0.0 }
 0x329   : > { %v1650_v41 = vadd.f32 %v1649_v40, %v3919_v21  ;;  %v1733_v48 = vmax.f32 %v1647_v37, 0.0 }
 0x32a   : > { %v1736_v43 = vmax.f32 %v1658_v39, 0.0 }
 0x32b   : > { %v1734_v44 = vmax.f32 %v1650_v41, 0.0 }
 0x32c   : > { %v1786_v45 = vpack.c.bf16 %v1736_v43, %v1735_v42 }
 0x32d   : > { %v1785_v47 = vpack.c.bf16 %v1734_v44, %v1733_v48  ;;  %v3139_v49 = vpop.f32.mrb[124].mxu0 }
 0x32e   : > { %v1671_v51 = vadd.f32 %v3139_v49, %v3919_v21  ;;  %v1662_v52 = vpop.f32.mrb[125].mxu0 }
 0x32f   : > { %v1663_v53 = vadd.f32 %v1662_v52, %v3919_v21  ;;  %v3140_v54 = vpop.f32.mrb[126].mxu0  ;;  %3213 = vmatprep.mubr.bf16.mxu1 %v1785_v47 }
 0x330   : > { %v1674_v55 = vadd.f32 %v3140_v54, %v3919_v21  ;;  %v1665_v56 = vpop.f32.mrb[127].mxu0  ;;  %3214 = vmatmul.mubr.bf16.gmra.mrb[116].mxu1 %v1786_v45  ;;  %v1739_v58 = vmax.f32 %v1671_v51, 0.0 }
 0x331   : > { %v1666_v57 = vadd.f32 %v1665_v56, %v3919_v21  ;;  %v1737_v60 = vmax.f32 %v1663_v53, 0.0 }
 0x332   : > { %v1740_v59 = vmax.f32 %v1674_v55, 0.0 }
 0x333   : > { %v1738_v61 = vmax.f32 %v1666_v57, 0.0 }
 0x334   : > { %v1788_v62 = vpack.c.bf16 %v1740_v59, %v1739_v58 }
 0x335   : > { %v1787_v63 = vpack.c.bf16 %v1738_v61, %v1737_v60 }
 0x337   : > { %3217 = vmatprep.mubr.bf16.mxu1 %v1787_v63 }
 0x338   : > { %3218 = vmatmul.mubr.bf16.gmra.mrb[120].mxu1 %v1788_v62 }
 0x393   : > { %v3159_v2 = vpop.f32.mrb[128].mxu0 }
 0x394   : > { %v3990_v3 = vadd.f32 %v3159_v2, %v3987_v1  ;;  %v1875_v4 = vpop.f32.mrb[129].mxu0 }
 0x395   : > { %v3993_v21 = vadd.f32 %v1875_v4, %v3987_v1  ;;  %v3160_v5 = vpop.f32.mrb[130].mxu0 }
 0x396   : > { %v3996_v6 = vadd.f32 %v3160_v5, %v3987_v1  ;;  %v1878_v7 = vpop.f32.mrb[131].mxu0  ;;  %v2132_v8 = vmul.f32 %v3990_v3, %v3990_v3 }
 0x397   : > { %v4001_v46 = vadd.f32 %v1878_v7, %v3987_v1  ;;  %v2130_v20 = vmul.f32 %v3993_v21, %v3993_v21 }
 0x398   : > { %2198 = vadd.xlane.f32.xlu1 %v2132_v8  ;;  %v2133_v9 = vmul.f32 %v3996_v6, %v3996_v6 }
 0x399   : > { %2194 = vadd.xlane.f32.xlu0 %v2130_v20  ;;  %v2131_v11 = vmul.f32 %v4001_v46, %v4001_v46 }
 0x39b   : > { %v3163_v10 = vpop.f32.mrb[64].mxu1 }
 0x39c   : > { %v4010_v12 = vadd.f32 %v3163_v10, %v3987_v1  ;;  %v1891_v13 = vpop.f32.mrb[65].mxu1  ;;  %2200 = vadd.xlane.f32.xlu1 %v2133_v9 }
 0x39d   : > { %v3164_v14 = vpop.f32.mrb[66].mxu1  ;;  %2196 = vadd.xlane.f32.xlu0 %v2131_v11  ;;  %v4018_v18 = vadd.f32 %v1891_v13, %v3987_v1 }
 0x39e   : > { %v4013_v15 = vadd.f32 %v3164_v14, %v3987_v1  ;;  %v1894_v16 = vpop.f32.mrb[67].mxu1  ;;  %v2136_v17 = vmul.f32 %v4010_v12, %v4010_v12 }
 0x39f   : > { %v4021_v19 = vadd.f32 %v1894_v16, %v3987_v1  ;;  %v2134_v23 = vmul.f32 %v4018_v18, %v4018_v18 }
 0x3a0   : > { %v2137_v22 = vmul.f32 %v4013_v15, %v4013_v15 }
 0x3a1   : > { %2206 = vadd.xlane.f32.xlu0 %v2136_v17  ;;  %v2135_v26 = vmul.f32 %v4021_v19, %v4021_v19 }
 0x3a2   : > { %2208 = vadd.xlane.f32.xlu1 %v2137_v22 }
 0x3a3   : > { %v3167_v36 = vpop.f32.mrb[68].mxu1 }
 0x3a4   : > { %v4028_v24 = vadd.f32 %v3167_v36, %v3987_v1  ;;  %v1907_v25 = vpop.f32.mrb[69].mxu1 }
 0x3a5   : > { %v3168_v27 = vpop.f32.mrb[70].mxu1  ;;  %2202 = vadd.xlane.f32.xlu0 %v2134_v23  ;;  %v4038_v31 = vadd.f32 %v1907_v25, %v3987_v1 }
 0x3a6   : > { %v4033_v28 = vadd.f32 %v3168_v27, %v3987_v1  ;;  %v1910_v29 = vpop.f32.mrb[71].mxu1  ;;  %2204 = vadd.xlane.f32.xlu1 %v2135_v26  ;;  %v2140_v30 = vmul.f32 %v4028_v24, %v4028_v24 }
 0x3a7   : > { %v4041_v32 = vadd.f32 %v1910_v29, %v3987_v1  ;;  %v2138_v35 = vmul.f32 %v4038_v31, %v4038_v31 }
 0x3a8   : > { %v2141_v33 = vmul.f32 %v4033_v28, %v4033_v28 }
 0x3a9   : > { %2214 = vadd.xlane.f32.xlu0 %v2140_v30  ;;  %v2139_v38 = vmul.f32 %v4041_v32, %v4041_v32 }
 0x3aa   : > { %2216 = vadd.xlane.f32.xlu1 %v2141_v33 }
 0x3ab   : > { %v3171_v34 = vpop.f32.mrb[72].mxu1 }
 0x3ac   : > { %v4048_v50 = vadd.f32 %v3171_v34, %v3987_v1  ;;  %v1923_v37 = vpop.f32.mrb[73].mxu1 }
 0x3ad   : > { %v3172_v39 = vpop.f32.mrb[74].mxu1  ;;  %2210 = vadd.xlane.f32.xlu0 %v2138_v35  ;;  %v4058_v43 = vadd.f32 %v1923_v37, %v3987_v1 }
 0x3ae   : > { %v4053_v40 = vadd.f32 %v3172_v39, %v3987_v1  ;;  %v1926_v41 = vpop.f32.mrb[75].mxu1  ;;  %2212 = vadd.xlane.f32.xlu1 %v2139_v38  ;;  %v2144_v42 = vmul.f32 %v4048_v50, %v4048_v50 }
 0x3af   : > { %v4061_v48 = vadd.f32 %v1926_v41, %v3987_v1  ;;  %v2142_v47 = vmul.f32 %v4058_v43, %v4058_v43 }
 0x3b0   : > { %v2145_v44 = vmul.f32 %v4053_v40, %v4053_v40 }
 0x3b1   : > { %2222 = vadd.xlane.f32.xlu0 %v2144_v42  ;;  %v2143_v52 = vmul.f32 %v4061_v48, %v4061_v48 }
 0x3b2   : > { %2224 = vadd.xlane.f32.xlu1 %v2145_v44 }
 0x3b3   : > { %v3175_v45 = vpop.f32.mrb[76].mxu1 }
 0x3b4   : > { %v4068_v49 = vadd.f32 %v3175_v45, %v3987_v1  ;;  %v1939_v51 = vpop.f32.mrb[77].mxu1 }
 0x3b5   : > { %v3176_v53 = vpop.f32.mrb[78].mxu1  ;;  %2218 = vadd.xlane.f32.xlu0 %v2142_v47  ;;  %v4078_v57 = vadd.f32 %v1939_v51, %v3987_v1 }
 0x3b6   : > { %v4073_v54 = vadd.f32 %v3176_v53, %v3987_v1  ;;  %v1942_v55 = vpop.f32.mrb[79].mxu1  ;;  %2220 = vadd.xlane.f32.xlu1 %v2143_v52  ;;  %v2148_v56 = vmul.f32 %v4068_v49, %v4068_v49 }
 0x3b7   : > { %v4081_v58 = vadd.f32 %v1942_v55, %v3987_v1  ;;  %v2146_v61 = vmul.f32 %v4078_v57, %v4078_v57 }
 0x3b8   : > { %v2149_v59 = vmul.f32 %v4073_v54, %v4073_v54 }
 0x3b9   : > { %2230 = vadd.xlane.f32.xlu0 %v2148_v56  ;;  %v2147_v0 = vmul.f32 %v4081_v58, %v4081_v58 }
 0x3ba   : > { %2232 = vadd.xlane.f32.xlu1 %v2149_v59 }
 0x3bb   : > { %v3179_v60 = vpop.f32.mrb[80].mxu1 }
 0x3bc   : > { %v4088_v62 = vadd.f32 %v3179_v60, %v3987_v1  ;;  %v1955_v63 = vpop.f32.mrb[81].mxu1 }
 0x3bd   : > { %v3180_v2 = vpop.f32.mrb[82].mxu1  ;;  %2226 = vadd.xlane.f32.xlu0 %v2146_v61  ;;  %v4098_v8 = vadd.f32 %v1955_v63, %v3987_v1 }
 0x3be   : > { %v4093_v4 = vadd.f32 %v3180_v2, %v3987_v1  ;;  %v1958_v5 = vpop.f32.mrb[83].mxu1  ;;  %2228 = vadd.xlane.f32.xlu1 %v2147_v0  ;;  %v2152_v7 = vmul.f32 %v4088_v62, %v4088_v62 }
 0x3bf   : > { %v4101_v20 = vadd.f32 %v1958_v5, %v3987_v1  ;;  %v2150_v11 = vmul.f32 %v4098_v8, %v4098_v8 }
 0x3c0   : > { %v2153_v9 = vmul.f32 %v4093_v4, %v4093_v4 }
 0x3c1   : > { %2238 = vadd.xlane.f32.xlu0 %v2152_v7  ;;  %v2151_v16 = vmul.f32 %v4101_v20, %v4101_v20 }
 0x3c2   : > { %2240 = vadd.xlane.f32.xlu1 %v2153_v9 }
 0x3c3   : > { %v3183_v10 = vpop.f32.mrb[84].mxu1 }
 0x3c4   : > { %v4108_v13 = vadd.f32 %v3183_v10, %v3987_v1  ;;  %v1971_v14 = vpop.f32.mrb[85].mxu1 }
 0x3c5   : > { %v3184_v17 = vpop.f32.mrb[86].mxu1  ;;  %2234 = vadd.xlane.f32.xlu0 %v2150_v11  ;;  %v4118_v25 = vadd.f32 %v1971_v14, %v3987_v1 }
 0x3c6   : > { %v4113_v22 = vadd.f32 %v3184_v17, %v3987_v1  ;;  %v1974_v36 = vpop.f32.mrb[87].mxu1  ;;  %2236 = vadd.xlane.f32.xlu1 %v2151_v16  ;;  %v2156_v23 = vmul.f32 %v4108_v13, %v4108_v13 }
 0x3c7   : > { %v4121_v26 = vadd.f32 %v1974_v36, %v3987_v1  ;;  %v2154_v30 = vmul.f32 %v4118_v25, %v4118_v25 }
 0x3c8   : > { %v2157_v27 = vmul.f32 %v4113_v22, %v4113_v22 }
 0x3c9   : > { %2246 = vadd.xlane.f32.xlu0 %v2156_v23  ;;  %v2155_v35 = vmul.f32 %v4121_v26, %v4121_v26 }
 0x3ca   : > { %2248 = vadd.xlane.f32.xlu1 %v2157_v27 }
 0x3cb   : > { %v3187_v29 = vpop.f32.mrb[88].mxu1 }
 0x3cc   : > { %v4128_v33 = vadd.f32 %v3187_v29, %v3987_v1  ;;  %v1987_v34 = vpop.f32.mrb[89].mxu1 }
 0x3cd   : > { %v3188_v37 = vpop.f32.mrb[90].mxu1  ;;  %2242 = vadd.xlane.f32.xlu0 %v2154_v30  ;;  %v4138_v42 = vadd.f32 %v1987_v34, %v3987_v1 }
 0x3ce   : > { %v4133_v38 = vadd.f32 %v3188_v37, %v3987_v1  ;;  %v1990_v39 = vpop.f32.mrb[91].mxu1  ;;  %2244 = vadd.xlane.f32.xlu1 %v2155_v35  ;;  %v2160_v41 = vmul.f32 %v4128_v33, %v4128_v33 }
 0x3cf   : > { %v4141_v44 = vadd.f32 %v1990_v39, %v3987_v1  ;;  %v2158_v51 = vmul.f32 %v4138_v42, %v4138_v42 }
 0x3d0   : > { %v2161_v45 = vmul.f32 %v4133_v38, %v4133_v38 }
 0x3d1   : > { %2254 = vadd.xlane.f32.xlu0 %v2160_v41  ;;  %v2159_v55 = vmul.f32 %v4141_v44, %v4141_v44 }
 0x3d2   : > { %2256 = vadd.xlane.f32.xlu1 %v2161_v45 }
 0x3d3   : > { %v3191_v47 = vpop.f32.mrb[92].mxu1 }
 0x3d4   : > { %v4148_v52 = vadd.f32 %v3191_v47, %v3987_v1  ;;  %v2003_v53 = vpop.f32.mrb[93].mxu1 }
 0x3d5   : > { %v3192_v56 = vpop.f32.mrb[94].mxu1  ;;  %2250 = vadd.xlane.f32.xlu0 %v2158_v51  ;;  %v4158_v63 = vadd.f32 %v2003_v53, %v3987_v1 }
 0x3d6   : > { %v4153_v59 = vadd.f32 %v3192_v56, %v3987_v1  ;;  %v2006_v60 = vpop.f32.mrb[95].mxu1  ;;  %2252 = vadd.xlane.f32.xlu1 %v2159_v55  ;;  %v2164_v61 = vmul.f32 %v4148_v52, %v4148_v52 }
 0x3d7   : > { %v4161_v0 = vadd.f32 %v2006_v60, %v3987_v1  ;;  %v2162_v7 = vmul.f32 %v4158_v63, %v4158_v63 }
 0x3d8   : > { %v2165_v2 = vmul.f32 %v4153_v59, %v4153_v59 }
 0x3d9   : > { %2262 = vadd.xlane.f32.xlu0 %v2164_v61  ;;  %v2163_v11 = vmul.f32 %v4161_v0, %v4161_v0 }
 0x3da   : > { %2264 = vadd.xlane.f32.xlu1 %v2165_v2 }
 0x3db   : > { %v3195_v5 = vpop.f32.mrb[96].mxu1 }
 0x3dc   : > { %v4168_v9 = vadd.f32 %v3195_v5, %v3987_v1  ;;  %v2019_v10 = vpop.f32.mrb[97].mxu1 }
 0x3dd   : > { %v3196_v14 = vpop.f32.mrb[98].mxu1  ;;  %2258 = vadd.xlane.f32.xlu0 %v2162_v7  ;;  %v4178_v23 = vadd.f32 %v2019_v10, %v3987_v1 }
 0x3de   : > { %v4173_v16 = vadd.f32 %v3196_v14, %v3987_v1  ;;  %v2022_v17 = vpop.f32.mrb[99].mxu1  ;;  %2260 = vadd.xlane.f32.xlu1 %v2163_v11  ;;  %v2168_v36 = vmul.f32 %v4168_v9, %v4168_v9 }
 0x3df   : > { %v4181_v27 = vadd.f32 %v2022_v17, %v3987_v1  ;;  %v2166_v34 = vmul.f32 %v4178_v23, %v4178_v23 }
 0x3e0   : > { %v2169_v29 = vmul.f32 %v4173_v16, %v4173_v16 }
 0x3e1   : > { %2270 = vadd.xlane.f32.xlu0 %v2168_v36  ;;  %v2167_v39 = vmul.f32 %v4181_v27, %v4181_v27 }
 0x3e2   : > { %2272 = vadd.xlane.f32.xlu1 %v2169_v29 }
 0x3e3   : > { %v3199_v30 = vpop.f32.mrb[100].mxu1 }
 0x3e4   : > { %v4188_v35 = vadd.f32 %v3199_v30, %v3987_v1  ;;  %v2035_v37 = vpop.f32.mrb[101].mxu1 }
 0x3e5   : > { %v3200_v41 = vpop.f32.mrb[102].mxu1  ;;  %2266 = vadd.xlane.f32.xlu0 %v2166_v34  ;;  %v4198_v53 = vadd.f32 %v2035_v37, %v3987_v1 }
 0x3e6   : > { %v4193_v45 = vadd.f32 %v3200_v41, %v3987_v1  ;;  %v2038_v47 = vpop.f32.mrb[103].mxu1  ;;  %2268 = vadd.xlane.f32.xlu1 %v2167_v39  ;;  %v2172_v51 = vmul.f32 %v4188_v35, %v4188_v35 }
 0x3e7   : > { %v4201_v55 = vadd.f32 %v2038_v47, %v3987_v1  ;;  %v2170_v61 = vmul.f32 %v4198_v53, %v4198_v53 }
 0x3e8   : > { %v2173_v56 = vmul.f32 %v4193_v45, %v4193_v45 }
 0x3e9   : > { %2278 = vadd.xlane.f32.xlu0 %v2172_v51  ;;  %v2171_v7 = vmul.f32 %v4201_v55, %v4201_v55 }
 0x3ea   : > { %2280 = vadd.xlane.f32.xlu1 %v2173_v56 }
 0x3eb   : > { %v3203_v60 = vpop.f32.mrb[104].mxu1 }
 0x3ec   : > { %v4208_v2 = vadd.f32 %v3203_v60, %v3987_v1  ;;  %v2051_v5 = vpop.f32.mrb[105].mxu1 }
 0x3ed   : > { %v3204_v10 = vpop.f32.mrb[106].mxu1  ;;  %2274 = vadd.xlane.f32.xlu0 %v2170_v61  ;;  %v4218_v36 = vadd.f32 %v2051_v5, %v3987_v1 }
 0x3ee   : > { %v4213_v11 = vadd.f32 %v3204_v10, %v3987_v1  ;;  %v2054_v14 = vpop.f32.mrb[107].mxu1  ;;  %2276 = vadd.xlane.f32.xlu1 %v2171_v7  ;;  %v2176_v17 = vmul.f32 %v4208_v2, %v4208_v2 }
 0x3ef   : > { %v4221_v29 = vadd.f32 %v2054_v14, %v3987_v1  ;;  %v2174_v37 = vmul.f32 %v4218_v36, %v4218_v36 }
 0x3f0   : > { %v2177_v30 = vmul.f32 %v4213_v11, %v4213_v11 }
 0x3f1   : > { %2286 = vadd.xlane.f32.xlu0 %v2176_v17  ;;  %v2175_v47 = vmul.f32 %v4221_v29, %v4221_v29 }
 0x3f2   : > { %2288 = vadd.xlane.f32.xlu1 %v2177_v30 }
 0x3f3   : > { %v3207_v34 = vpop.f32.mrb[108].mxu1 }
 0x3f4   : > { %v4228_v39 = vadd.f32 %v3207_v34, %v3987_v1  ;;  %v2067_v41 = vpop.f32.mrb[109].mxu1 }
 0x3f5   : > { %v3208_v51 = vpop.f32.mrb[110].mxu1  ;;  %2282 = vadd.xlane.f32.xlu0 %v2174_v37  ;;  %v4239_v5 = vadd.f32 %v2067_v41, %v3987_v1 }
 0x3f6   : > { %v4234_v56 = vadd.f32 %v3208_v51, %v3987_v1  ;;  %v2070_v60 = vpop.f32.mrb[111].mxu1  ;;  %2284 = vadd.xlane.f32.xlu1 %v2175_v47  ;;  %v2180_v61 = vmul.f32 %v4228_v39, %v4228_v39 }
 0x3f7   : > { %4527 = vst [vmem:[#allocation5_spill] sm:$0xff] %v4239_v5  ;;  %v4242_v7 = vadd.f32 %v2070_v60, %v3987_v1  ;;  %v2178_v17 = vmul.f32 %v4239_v5, %v4239_v5 }
 0x3f8   : > { %v2181_v10 = vmul.f32 %v4234_v56, %v4234_v56 }
 0x3f9   : > { %4528 = vst [vmem:[#allocation6_spill] sm:$0xff] %v4242_v7  ;;  %2294 = vadd.xlane.f32.xlu0 %v2180_v61  ;;  %v2179_v37 = vmul.f32 %v4242_v7, %v4242_v7 }
 0x3fa   : > { %2296 = vadd.xlane.f32.xlu1 %v2181_v10 }
 0x3fb   : > { %v3211_v14 = vpop.f32.mrb[112].mxu1 }
 0x3fc   : > { %v4249_v30 = vadd.f32 %v3211_v14, %v3987_v1  ;;  %v2083_v34 = vpop.f32.mrb[113].mxu1 }
 0x3fd   : > { %v3212_v41 = vpop.f32.mrb[114].mxu1  ;;  %2290 = vadd.xlane.f32.xlu0 %v2178_v17  ;;  %v4259_v61 = vadd.f32 %v2083_v34, %v3987_v1 }
 0x3fe   : > { %4529 = vst [vmem:[#allocation7_spill] sm:$0xff] %v4249_v30  ;;  %v4254_v47 = vadd.f32 %v3212_v41, %v3987_v1  ;;  %v2086_v51 = vpop.f32.mrb[115].mxu1  ;;  %2292 = vadd.xlane.f32.xlu1 %v2179_v37  ;;  %v2184_v60 = vmul.f32 %v4249_v30, %v4249_v30 }
 0x3ff   : > { %4531 = vst [vmem:[#allocation9_spill] sm:$0xff] %v4259_v61  ;;  %v4262_v10 = vadd.f32 %v2086_v51, %v3987_v1  ;;  %v2182_v41 = vmul.f32 %v4259_v61, %v4259_v61 }
 0x400   : > { %4530 = vst [vmem:[#allocation8_spill] sm:$0xff] %v4254_v47  ;;  %v2185_v14 = vmul.f32 %v4254_v47, %v4254_v47 }
 0x401   : > { %4532 = vst [vmem:[#allocation10_spill] sm:$0xff] %v4262_v10  ;;  %2302 = vadd.xlane.f32.xlu0 %v2184_v60  ;;  %v2183_v34 = vmul.f32 %v4262_v10, %v4262_v10 }
 0x402   : > { %2304 = vadd.xlane.f32.xlu1 %v2185_v14 }
 0x403   : > { %v3215_v17 = vpop.f32.mrb[116].mxu1 }
 0x404   : > { %v4269_v37 = vadd.f32 %v3215_v17, %v3987_v1  ;;  %v2099_v7 = vpop.f32.mrb[117].mxu1 }
 0x405   : > { %v3216_v30 = vpop.f32.mrb[118].mxu1  ;;  %2298 = vadd.xlane.f32.xlu0 %v2182_v41  ;;  %v4279_v14 = vadd.f32 %v2099_v7, %v3987_v1 }
 0x406   : > { %4533 = vst [vmem:[#allocation11_spill] sm:$0xff] %v4269_v37  ;;  %v4274_v51 = vadd.f32 %v3216_v30, %v3987_v1  ;;  %v2102_v5 = vpop.f32.mrb[119].mxu1  ;;  %2300 = vadd.xlane.f32.xlu1 %v2183_v34  ;;  %v2188_v60 = vmul.f32 %v4269_v37, %v4269_v37 }
 0x407   : > { %4535 = vst [vmem:[#allocation13_spill] sm:$0xff] %v4279_v14  ;;  %v4282_v17 = vadd.f32 %v2102_v5, %v3987_v1  ;;  %v2186_v30 = vmul.f32 %v4279_v14, %v4279_v14 }
 0x408   : > { %4534 = vst [vmem:[#allocation12_spill] sm:$0xff] %v4274_v51  ;;  %v2189_v61 = vmul.f32 %v4274_v51, %v4274_v51 }
 0x409   : > { %4536 = vst [vmem:[#allocation14_spill] sm:$0xff] %v4282_v17  ;;  %2310 = vadd.xlane.f32.xlu0 %v2188_v60  ;;  %v2187_v34 = vmul.f32 %v4282_v17, %v4282_v17 }
 0x40a   : > { %2312 = vadd.xlane.f32.xlu1 %v2189_v61 }
 0x40b   : > { %v3219_v41 = vpop.f32.mrb[120].mxu1 }
 0x40c   : > { %v2115_v10 = vpop.f32.mrb[121].mxu1  ;;  %v4294_v47 = vadd.f32 %v3219_v41, %v3987_v1 }
 0x40d   : > { %v4291_v37 = vadd.f32 %v2115_v10, %v3987_v1  ;;  %v3220_v7 = vpop.f32.mrb[122].mxu1  ;;  %2306 = vadd.xlane.f32.xlu0 %v2186_v30 }
 0x40e   : > { %v2118_v5 = vpop.f32.mrb[123].mxu1  ;;  %2308 = vadd.xlane.f32.xlu1 %v2187_v34  ;;  %4538 = vst [vmem:[#allocation16_spill] sm:$0xff] %v4294_v47  ;;  %v4302_v14 = vadd.f32 %v3220_v7, %v3987_v1  ;;  %v2192_v30 = vmul.f32 %v4294_v47, %v4294_v47 }
 0x40f   : > { %4537 = vst [vmem:[#allocation15_spill] sm:$0xff] %v4291_v37  ;;  %v4297_v61 = vadd.f32 %v2118_v5, %v3987_v1  ;;  %v2190_v60 = vmul.f32 %v4291_v37, %v4291_v37 }
 0x410   : > { %4540 = vst [vmem:[#allocation18_spill] sm:$0xff] %v4302_v14  ;;  %v2193_v41 = vmul.f32 %v4302_v14, %v4302_v14 }
 0x411   : > { %4539 = vst [vmem:[#allocation17_spill] sm:$0xff] %v4297_v61  ;;  %2314 = vadd.xlane.f32.xlu0 %v2190_v60  ;;  %v2191_v10 = vmul.f32 %v4297_v61, %v4297_v61 }
 0x413   : > { %2316 = vadd.xlane.f32.xlu1 %v2191_v10 }
 0x415   : > { %2318 = vadd.xlane.f32.xlu0 %v2192_v30 }
 0x417   : > { %2320 = vadd.xlane.f32.xlu1 %v2193_v41 }
 0x425   : > { %v2199_v34 = vpop.xlane.xlu1 %2198 }
 0x426   : > { %v2324_v5 = vadd.f32 1e-12, %v2199_v34  ;;  %v2195_v37 = vpop.xlane.xlu0 %2194 }
 0x427   : > { %v2322_v17 = vadd.f32 1e-12, %v2195_v37 }
 0x428   : > { %3305 = vrsqrt.f32 %v2324_v5 }
 0x429   : > { %3307 = vrsqrt.f32 %v2322_v17  ;;  %v2201_v1 = vpop.xlane.xlu1 %2200 }
 0x42a   : > { %v2325_v7 = vadd.f32 1e-12, %v2201_v1  ;;  %v2197_v60 = vpop.xlane.xlu0 %2196 }
 0x42b   : > { %v2323_v61 = vadd.f32 1e-12, %v2197_v60 }
 0x42c   : > { %3309 = vrsqrt.f32 %v2325_v7 }
 0x42d   : > { %3311 = vrsqrt.f32 %v2323_v61 }
 0x42e   : > { %v2207_v10 = vpop.xlane.xlu0 %2206 }
 0x42f   : > { %v2328_v30 = vadd.f32 1e-12, %v2207_v10  ;;  %v2209_v47 = vpop.xlane.xlu1 %2208 }
 0x430   : > { %v2329_v51 = vadd.f32 1e-12, %v2209_v47 }
 0x431   : > { %3313 = vrsqrt.f32 %v2328_v30 }
 0x432   : > { %v3306_v41 = vpop.eup %3305  ;;  %3315 = vrsqrt.f32 %v2329_v51  ;;  %v2203_v34 = vpop.xlane.xlu0 %2202 }
 0x433   : > { %v3308_v14 = vpop.eup %3307  ;;  %v2452_v37 = vmul.f32 %v3306_v41, %v3990_v3  ;;  %v2326_v17 = vadd.f32 1e-12, %v2203_v34  ;;  %v2205_v5 = vpop.xlane.xlu1 %2204 }
 0x434   : > { %v2450_v1 = vmul.f32 %v3308_v14, %v3993_v21  ;;  %v2327_v60 = vadd.f32 1e-12, %v2205_v5 }
 0x435   : > { %2516 = vst [vmem:[%s4314_s13 + $0x10] sm:$0xff] %v2452_v37  ;;  %3317 = vrsqrt.f32 %v2326_v17 }
 0x436   : > { %v3310_v47 = vpop.eup %3309  ;;  %2514 = vst [vmem:[%s4314_s13] sm:$0xff] %v2450_v1  ;;  %3319 = vrsqrt.f32 %v2327_v60  ;;  %v2215_v51 = vpop.xlane.xlu0 %2214 }
 0x437   : > { %v3312_v61 = vpop.eup %3311  ;;  %v2453_v3 = vmul.f32 %v3310_v47, %v3996_v6  ;;  %v2332_v7 = vadd.f32 1e-12, %v2215_v51  ;;  %v2217_v10 = vpop.xlane.xlu1 %2216 }
 0x438   : > { %v2451_v21 = vmul.f32 %v3312_v61, %v4001_v46  ;;  %v2333_v14 = vadd.f32 1e-12, %v2217_v10 }
 0x439   : > { %2517 = vst [vmem:[%s4314_s13 + $0x18] sm:$0xff] %v2453_v3  ;;  %3321 = vrsqrt.f32 %v2332_v7 }
 0x43a   : > { %2515 = vst [vmem:[%s4314_s13 + $0x8] sm:$0xff] %v2451_v21  ;;  %3323 = vrsqrt.f32 %v2333_v14  ;;  %v2211_v30 = vpop.xlane.xlu0 %2210 }
 0x43b   : > { %v3314_v41 = vpop.eup %3313  ;;  %v2330_v34 = vadd.f32 1e-12, %v2211_v30  ;;  %v2213_v37 = vpop.xlane.xlu1 %2212 }
 0x43c   : > { %v3316_v17 = vpop.eup %3315  ;;  %v2456_v5 = vmul.f32 %v3314_v41, %v4010_v12  ;;  %v2331_v6 = vadd.f32 1e-12, %v2213_v37 }
 0x43d   : > { %v2457_v1 = vmul.f32 %v3316_v17, %v4013_v15  ;;  %3325 = vrsqrt.f32 %v2330_v34 }
 0x43e   : > { %2520 = vst [vmem:[%s4314_s13 + $0x30] sm:$0xff] %v2456_v5  ;;  %3327 = vrsqrt.f32 %v2331_v6  ;;  %v2223_v46 = vpop.xlane.xlu0 %2222 }
 0x43f   : > { %v3318_v60 = vpop.eup %3317  ;;  %2521 = vst [vmem:[%s4314_s13 + $0x38] sm:$0xff] %v2457_v1  ;;  %v2336_v47 = vadd.f32 1e-12, %v2223_v46  ;;  %v2225_v51 = vpop.xlane.xlu1 %2224 }
 0x440   : > { %v3320_v61 = vpop.eup %3319  ;;  %v2454_v3 = vmul.f32 %v3318_v60, %v4018_v18  ;;  %v2337_v7 = vadd.f32 1e-12, %v2225_v51 }
 0x441   : > { %v2455_v12 = vmul.f32 %v3320_v61, %v4021_v19  ;;  %3329 = vrsqrt.f32 %v2336_v47 }
 0x442   : > { %2518 = vst [vmem:[%s4314_s13 + $0x20] sm:$0xff] %v2454_v3  ;;  %3331 = vrsqrt.f32 %v2337_v7  ;;  %v2219_v15 = vpop.xlane.xlu0 %2218 }
 0x443   : > { %v3322_v10 = vpop.eup %3321  ;;  %2519 = vst [vmem:[%s4314_s13 + $0x28] sm:$0xff] %v2455_v12  ;;  %v2334_v21 = vadd.f32 1e-12, %v2219_v15  ;;  %v2221_v14 = vpop.xlane.xlu1 %2220 }
 0x444   : > { %v3324_v30 = vpop.eup %3323  ;;  %v2460_v41 = vmul.f32 %v3322_v10, %v4028_v24  ;;  %v2335_v34 = vadd.f32 1e-12, %v2221_v14 }
 0x445   : > { %v2461_v18 = vmul.f32 %v3324_v30, %v4033_v28  ;;  %3333 = vrsqrt.f32 %v2334_v21 }
 0x446   : > { %2524 = vst [vmem:[%s4314_s13 + $0x50] sm:$0xff] %v2460_v41  ;;  %3335 = vrsqrt.f32 %v2335_v34  ;;  %v2231_v19 = vpop.xlane.xlu0 %2230 }
 0x447   : > { %v3326_v37 = vpop.eup %3325  ;;  %2525 = vst [vmem:[%s4314_s13 + $0x58] sm:$0xff] %v2461_v18  ;;  %v2340_v17 = vadd.f32 1e-12, %v2231_v19  ;;  %v2233_v5 = vpop.xlane.xlu1 %2232 }
 0x448   : > { %v3328_v6 = vpop.eup %3327  ;;  %v2458_v1 = vmul.f32 %v3326_v37, %v4038_v31  ;;  %v2341_v46 = vadd.f32 1e-12, %v2233_v5 }
 0x449   : > { %v2459_v24 = vmul.f32 %v3328_v6, %v4041_v32  ;;  %3337 = vrsqrt.f32 %v2340_v17 }
 0x44a   : > { %2522 = vst [vmem:[%s4314_s13 + $0x40] sm:$0xff] %v2458_v1  ;;  %3339 = vrsqrt.f32 %v2341_v46  ;;  %v2227_v28 = vpop.xlane.xlu0 %2226 }
 0x44b   : > { %v3330_v60 = vpop.eup %3329  ;;  %2523 = vst [vmem:[%s4314_s13 + $0x48] sm:$0xff] %v2459_v24  ;;  %v2338_v47 = vadd.f32 1e-12, %v2227_v28  ;;  %v2229_v51 = vpop.xlane.xlu1 %2228 }
 0x44c   : > { %v3332_v61 = vpop.eup %3331  ;;  %v2464_v3 = vmul.f32 %v3330_v60, %v4048_v50  ;;  %v2339_v7 = vadd.f32 1e-12, %v2229_v51 }
 0x44d   : > { %v2465_v31 = vmul.f32 %v3332_v61, %v4053_v40  ;;  %3341 = vrsqrt.f32 %v2338_v47 }
 0x44e   : > { %2528 = vst [vmem:[%s4314_s13 + $0x70] sm:$0xff] %v2464_v3  ;;  %3343 = vrsqrt.f32 %v2339_v7  ;;  %v2239_v32 = vpop.xlane.xlu0 %2238 }
 0x44f   : > { %v3334_v12 = vpop.eup %3333  ;;  %2529 = vst [vmem:[%s4314_s13 + $0x78] sm:$0xff] %v2465_v31  ;;  %v2344_v15 = vadd.f32 1e-12, %v2239_v32  ;;  %v2241_v10 = vpop.xlane.xlu1 %2240 }
 0x450   : > { %v3336_v21 = vpop.eup %3335  ;;  %v2462_v14 = vmul.f32 %v3334_v12, %v4058_v43  ;;  %v2345_v30 = vadd.f32 1e-12, %v2241_v10 }
 0x451   : > { %v2463_v50 = vmul.f32 %v3336_v21, %v4061_v48  ;;  %3345 = vrsqrt.f32 %v2344_v15 }
 0x452   : > { %2526 = vst [vmem:[%s4314_s13 + $0x60] sm:$0xff] %v2462_v14  ;;  %3347 = vrsqrt.f32 %v2345_v30  ;;  %v2235_v40 = vpop.xlane.xlu0 %2234 }
 0x453   : > { %v3338_v41 = vpop.eup %3337  ;;  %2527 = vst [vmem:[%s4314_s13 + $0x68] sm:$0xff] %v2463_v50  ;;  %v2342_v34 = vadd.f32 1e-12, %v2235_v40  ;;  %v2237_v18 = vpop.xlane.xlu1 %2236 }
 0x454   : > { %v3340_v19 = vpop.eup %3339  ;;  %v2468_v37 = vmul.f32 %v3338_v41, %v4068_v49  ;;  %v2343_v17 = vadd.f32 1e-12, %v2237_v18 }
 0x455   : > { %v2469_v43 = vmul.f32 %v3340_v19, %v4073_v54  ;;  %3349 = vrsqrt.f32 %v2342_v34 }
 0x456   : > { %2532 = vst [vmem:[%s4314_s13 + $0x90] sm:$0xff] %v2468_v37  ;;  %3351 = vrsqrt.f32 %v2343_v17  ;;  %v2247_v48 = vpop.xlane.xlu0 %2246 }
 0x457   : > { %v3342_v5 = vpop.eup %3341  ;;  %2533 = vst [vmem:[%s4314_s13 + $0x98] sm:$0xff] %v2469_v43  ;;  %v2348_v6 = vadd.f32 1e-12, %v2247_v48  ;;  %v2249_v1 = vpop.xlane.xlu1 %2248 }
 0x458   : > { %v3344_v46 = vpop.eup %3343  ;;  %v2466_v24 = vmul.f32 %v3342_v5, %v4078_v57  ;;  %v2349_v28 = vadd.f32 1e-12, %v2249_v1 }
 0x459   : > { %v2467_v49 = vmul.f32 %v3344_v46, %v4081_v58  ;;  %3353 = vrsqrt.f32 %v2348_v6 }
 0x45a   : > { %2530 = vst [vmem:[%s4314_s13 + $0x80] sm:$0xff] %v2466_v24  ;;  %3355 = vrsqrt.f32 %v2349_v28  ;;  %v2243_v54 = vpop.xlane.xlu0 %2242 }
 0x45b   : > { %v3346_v60 = vpop.eup %3345  ;;  %2531 = vst [vmem:[%s4314_s13 + $0x88] sm:$0xff] %v2467_v49  ;;  %v2346_v47 = vadd.f32 1e-12, %v2243_v54  ;;  %v2245_v51 = vpop.xlane.xlu1 %2244 }
 0x45c   : > { %v3348_v61 = vpop.eup %3347  ;;  %v2472_v3 = vmul.f32 %v3346_v60, %v4088_v62  ;;  %v2347_v7 = vadd.f32 1e-12, %v2245_v51 }
 0x45d   : > { %v2473_v57 = vmul.f32 %v3348_v61, %v4093_v4  ;;  %3357 = vrsqrt.f32 %v2346_v47 }
 0x45e   : > { %2536 = vst [vmem:[%s4314_s13 + $0xb0] sm:$0xff] %v2472_v3  ;;  %3359 = vrsqrt.f32 %v2347_v7  ;;  %v2255_v58 = vpop.xlane.xlu0 %2254 }
 0x45f   : > { %v3350_v31 = vpop.eup %3349  ;;  %2537 = vst [vmem:[%s4314_s13 + $0xb8] sm:$0xff] %v2473_v57  ;;  %v2352_v32 = vadd.f32 1e-12, %v2255_v58  ;;  %v2257_v12 = vpop.xlane.xlu1 %2256 }
 0x460   : > { %v3352_v15 = vpop.eup %3351  ;;  %v2470_v10 = vmul.f32 %v3350_v31, %v4098_v8  ;;  %v2353_v21 = vadd.f32 1e-12, %v2257_v12 }
 0x461   : > { %v2471_v62 = vmul.f32 %v3352_v15, %v4101_v20  ;;  %3361 = vrsqrt.f32 %v2352_v32 }
 0x462   : > { %2534 = vst [vmem:[%s4314_s13 + $0xa0] sm:$0xff] %v2470_v10  ;;  %3363 = vrsqrt.f32 %v2353_v21  ;;  %v2251_v4 = vpop.xlane.xlu0 %2250 }
 0x463   : > { %v3354_v14 = vpop.eup %3353  ;;  %2535 = vst [vmem:[%s4314_s13 + $0xa8] sm:$0xff] %v2471_v62  ;;  %v2350_v30 = vadd.f32 1e-12, %v2251_v4  ;;  %v2253_v50 = vpop.xlane.xlu1 %2252 }
 0x464   : > { %v3356_v40 = vpop.eup %3355  ;;  %v2476_v41 = vmul.f32 %v3354_v14, %v4108_v13  ;;  %v2351_v34 = vadd.f32 1e-12, %v2253_v50 }
 0x465   : > { %v2477_v8 = vmul.f32 %v3356_v40, %v4113_v22  ;;  %3365 = vrsqrt.f32 %v2350_v30 }
 0x466   : > { %2540 = vst [vmem:[%s4314_s13 + $0xd0] sm:$0xff] %v2476_v41  ;;  %3367 = vrsqrt.f32 %v2351_v34  ;;  %v2263_v20 = vpop.xlane.xlu0 %2262 }
 0x467   : > { %v3358_v18 = vpop.eup %3357  ;;  %2541 = vst [vmem:[%s4314_s13 + $0xd8] sm:$0xff] %v2477_v8  ;;  %v2356_v19 = vadd.f32 1e-12, %v2263_v20  ;;  %v2265_v37 = vpop.xlane.xlu1 %2264 }
 0x468   : > { %v3360_v17 = vpop.eup %3359  ;;  %v2474_v43 = vmul.f32 %v3358_v18, %v4118_v25  ;;  %v2357_v48 = vadd.f32 1e-12, %v2265_v37 }
 0x469   : > { %v2475_v13 = vmul.f32 %v3360_v17, %v4121_v26  ;;  %3369 = vrsqrt.f32 %v2356_v19 }
 0x46a   : > { %2538 = vst [vmem:[%s4314_s13 + $0xc0] sm:$0xff] %v2474_v43  ;;  %3371 = vrsqrt.f32 %v2357_v48  ;;  %v2259_v22 = vpop.xlane.xlu0 %2258 }
 0x46b   : > { %v3362_v5 = vpop.eup %3361  ;;  %2539 = vst [vmem:[%s4314_s13 + $0xc8] sm:$0xff] %v2475_v13  ;;  %v2354_v6 = vadd.f32 1e-12, %v2259_v22  ;;  %v2261_v1 = vpop.xlane.xlu1 %2260 }
 0x46c   : > { %v3364_v46 = vpop.eup %3363  ;;  %v2480_v24 = vmul.f32 %v3362_v5, %v4128_v33  ;;  %v2355_v28 = vadd.f32 1e-12, %v2261_v1 }
 0x46d   : > { %v2481_v25 = vmul.f32 %v3364_v46, %v4133_v38  ;;  %3373 = vrsqrt.f32 %v2354_v6 }
 0x46e   : > { %2544 = vst [vmem:[%s4314_s13 + $0xf0] sm:$0xff] %v2480_v24  ;;  %3375 = vrsqrt.f32 %v2355_v28  ;;  %v2271_v26 = vpop.xlane.xlu0 %2270 }
 0x46f   : > { %v3366_v49 = vpop.eup %3365  ;;  %2545 = vst [vmem:[%s4314_s13 + $0xf8] sm:$0xff] %v2481_v25  ;;  %v2360_v54 = vadd.f32 1e-12, %v2271_v26  ;;  %v2273_v60 = vpop.xlane.xlu1 %2272 }
 0x470   : > { %v3368_v47 = vpop.eup %3367  ;;  %v2478_v51 = vmul.f32 %v3366_v49, %v4138_v42  ;;  %v2361_v61 = vadd.f32 1e-12, %v2273_v60 }
 0x471   : > { %v2479_v33 = vmul.f32 %v3368_v47, %v4141_v44  ;;  %3377 = vrsqrt.f32 %v2360_v54 }
 0x472   : > { %2542 = vst [vmem:[%s4314_s13 + $0xe0] sm:$0xff] %v2478_v51  ;;  %3379 = vrsqrt.f32 %v2361_v61  ;;  %v2267_v38 = vpop.xlane.xlu0 %2266 }
 0x473   : > { %v3370_v3 = vpop.eup %3369  ;;  %2543 = vst [vmem:[%s4314_s13 + $0xe8] sm:$0xff] %v2479_v33  ;;  %v2358_v7 = vadd.f32 1e-12, %v2267_v38  ;;  %v2269_v57 = vpop.xlane.xlu1 %2268 }
 0x474   : > { %v3372_v58 = vpop.eup %3371  ;;  %v2484_v31 = vmul.f32 %v3370_v3, %v4148_v52  ;;  %v2359_v32 = vadd.f32 1e-12, %v2269_v57 }
 0x475   : > { %v2485_v42 = vmul.f32 %v3372_v58, %v4153_v59  ;;  %3381 = vrsqrt.f32 %v2358_v7 }
 0x476   : > { %2548 = vst [vmem:[%s4314_s13 + $0x110] sm:$0xff] %v2484_v31  ;;  %3383 = vrsqrt.f32 %v2359_v32  ;;  %v2279_v44 = vpop.xlane.xlu0 %2278 }
 0x477   : > { %v3374_v12 = vpop.eup %3373  ;;  %2549 = vst [vmem:[%s4314_s13 + $0x118] sm:$0xff] %v2485_v42  ;;  %v2364_v15 = vadd.f32 1e-12, %v2279_v44  ;;  %v2281_v10 = vpop.xlane.xlu1 %2280 }
 0x478   : > { %v3376_v21 = vpop.eup %3375  ;;  %v2482_v62 = vmul.f32 %v3374_v12, %v4158_v63  ;;  %v2365_v4 = vadd.f32 1e-12, %v2281_v10 }
 0x479   : > { %v2483_v52 = vmul.f32 %v3376_v21, %v4161_v0  ;;  %3385 = vrsqrt.f32 %v2364_v15 }
 0x47a   : > { %2546 = vst [vmem:[%s4314_s13 + $0x100] sm:$0xff] %v2482_v62  ;;  %3387 = vrsqrt.f32 %v2365_v4  ;;  %v2275_v59 = vpop.xlane.xlu0 %2274 }
 0x47b   : > { %v3378_v14 = vpop.eup %3377  ;;  %2547 = vst [vmem:[%s4314_s13 + $0x108] sm:$0xff] %v2483_v52  ;;  %v2362_v30 = vadd.f32 1e-12, %v2275_v59  ;;  %v2277_v50 = vpop.xlane.xlu1 %2276  ;;  %v4541_v52 = vld [vmem:[#allocation5_spill] sm:$0xff] }
 0x47c   : > { %v3380_v40 = vpop.eup %3379  ;;  %v2488_v41 = vmul.f32 %v3378_v14, %v4168_v9  ;;  %v2363_v34 = vadd.f32 1e-12, %v2277_v50 }
 0x47d   : > { %v2489_v63 = vmul.f32 %v3380_v40, %v4173_v16  ;;  %3389 = vrsqrt.f32 %v2362_v30  ;;  %v4542_v30 = vld [vmem:[#allocation6_spill] sm:$0xff] }
 0x47e   : > { %2552 = vst [vmem:[%s4314_s13 + $0x130] sm:$0xff] %v2488_v41  ;;  %3391 = vrsqrt.f32 %v2363_v34  ;;  %v2287_v0 = vpop.xlane.xlu0 %2286 }
 0x47f   : > { %v3382_v8 = vpop.eup %3381  ;;  %2553 = vst [vmem:[%s4314_s13 + $0x138] sm:$0xff] %v2489_v63  ;;  %v2368_v20 = vadd.f32 1e-12, %v2287_v0  ;;  %v2289_v18 = vpop.xlane.xlu1 %2288  ;;  %v4543_v63 = vld [vmem:[#allocation7_spill] sm:$0xff] }
 0x480   : > { %v3384_v19 = vpop.eup %3383  ;;  %v2486_v37 = vmul.f32 %v3382_v8, %v4178_v23  ;;  %v2369_v17 = vadd.f32 1e-12, %v2289_v18 }
 0x481   : > { %v2487_v9 = vmul.f32 %v3384_v19, %v4181_v27  ;;  %3393 = vrsqrt.f32 %v2368_v20  ;;  %v4544_v20 = vld [vmem:[#allocation8_spill] sm:$0xff] }
 0x482   : > { %2550 = vst [vmem:[%s4314_s13 + $0x120] sm:$0xff] %v2486_v37  ;;  %3395 = vrsqrt.f32 %v2369_v17  ;;  %v2283_v16 = vpop.xlane.xlu0 %2282 }
 0x483   : > { %v3386_v43 = vpop.eup %3385  ;;  %2551 = vst [vmem:[%s4314_s13 + $0x128] sm:$0xff] %v2487_v9  ;;  %v2366_v48 = vadd.f32 1e-12, %v2283_v16  ;;  %v2285_v13 = vpop.xlane.xlu1 %2284  ;;  %v4545_v16 = vld [vmem:[#allocation9_spill] sm:$0xff] }
 0x484   : > { %v3388_v22 = vpop.eup %3387  ;;  %v2492_v5 = vmul.f32 %v3386_v43, %v4188_v35  ;;  %v2367_v6 = vadd.f32 1e-12, %v2285_v13  ;;  %v4546_v13 = vld [vmem:[#allocation10_spill] sm:$0xff] }
 0x485   : > { %v2493_v23 = vmul.f32 %v3388_v22, %v4193_v45  ;;  %3397 = vrsqrt.f32 %v2366_v48 }
 0x486   : > { %2556 = vst [vmem:[%s4314_s13 + $0x150] sm:$0xff] %v2492_v5  ;;  %3399 = vrsqrt.f32 %v2367_v6  ;;  %v2295_v27 = vpop.xlane.xlu0 %2294 }
 0x487   : > { %v3390_v1 = vpop.eup %3389  ;;  %2557 = vst [vmem:[%s4314_s13 + $0x158] sm:$0xff] %v2493_v23  ;;  %v2372_v46 = vadd.f32 1e-12, %v2295_v27  ;;  %v2297_v24 = vpop.xlane.xlu1 %2296 }
 0x488   : > { %v3392_v28 = vpop.eup %3391  ;;  %v2490_v25 = vmul.f32 %v3390_v1, %v4198_v53  ;;  %v2373_v26 = vadd.f32 1e-12, %v2297_v24 }
 0x489   : > { %v2491_v35 = vmul.f32 %v3392_v28, %v4201_v55  ;;  %3401 = vrsqrt.f32 %v2372_v46  ;;  %v4547_v46 = vld [vmem:[#allocation11_spill] sm:$0xff] }
 0x48a   : > { %2554 = vst [vmem:[%s4314_s13 + $0x140] sm:$0xff] %v2490_v25  ;;  %3403 = vrsqrt.f32 %v2373_v26  ;;  %v2291_v45 = vpop.xlane.xlu0 %2290  ;;  %v4548_v25 = vld [vmem:[#allocation12_spill] sm:$0xff] }
 0x48b   : > { %v3394_v49 = vpop.eup %3393  ;;  %2555 = vst [vmem:[%s4314_s13 + $0x148] sm:$0xff] %v2491_v35  ;;  %v2370_v54 = vadd.f32 1e-12, %v2291_v45  ;;  %v2293_v60 = vpop.xlane.xlu1 %2292 }
 0x48c   : > { %v3396_v47 = vpop.eup %3395  ;;  %v2496_v51 = vmul.f32 %v3394_v49, %v4208_v2  ;;  %v2371_v61 = vadd.f32 1e-12, %v2293_v60 }
 0x48d   : > { %v2497_v53 = vmul.f32 %v3396_v47, %v4213_v11  ;;  %3405 = vrsqrt.f32 %v2370_v54  ;;  %v4549_v54 = vld [vmem:[#allocation13_spill] sm:$0xff]  ;;  %v4550_v47 = vld [vmem:[#allocation14_spill] sm:$0xff] }
 0x48e   : > { %2560 = vst [vmem:[%s4314_s13 + $0x170] sm:$0xff] %v2496_v51  ;;  %3407 = vrsqrt.f32 %v2371_v61  ;;  %v2303_v55 = vpop.xlane.xlu0 %2302 }
 0x48f   : > { %v3398_v33 = vpop.eup %3397  ;;  %2561 = vst [vmem:[%s4314_s13 + $0x178] sm:$0xff] %v2497_v53  ;;  %v2376_v38 = vadd.f32 1e-12, %v2303_v55  ;;  %v2305_v3 = vpop.xlane.xlu1 %2304  ;;  %v4551_v53 = vld [vmem:[#allocation15_spill] sm:$0xff] }
 0x490   : > { %v3400_v7 = vpop.eup %3399  ;;  %v2494_v57 = vmul.f32 %v3398_v33, %v4218_v36  ;;  %v2377_v58 = vadd.f32 1e-12, %v2305_v3 }
 0x491   : > { %v2495_v2 = vmul.f32 %v3400_v7, %v4221_v29  ;;  %3409 = vrsqrt.f32 %v2376_v38  ;;  %v4552_v38 = vld [vmem:[#allocation17_spill] sm:$0xff] }
 0x492   : > { %2558 = vst [vmem:[%s4314_s13 + $0x160] sm:$0xff] %v2494_v57  ;;  %3411 = vrsqrt.f32 %v2377_v58  ;;  %v2299_v11 = vpop.xlane.xlu0 %2298  ;;  %v4553_v57 = vld [vmem:[#allocation16_spill] sm:$0xff] }
 0x493   : > { %v3402_v31 = vpop.eup %3401  ;;  %2559 = vst [vmem:[%s4314_s13 + $0x168] sm:$0xff] %v2495_v2  ;;  %v2374_v32 = vadd.f32 1e-12, %v2299_v11  ;;  %v2301_v42 = vpop.xlane.xlu1 %2300  ;;  %v4554_v11 = vld [vmem:[#allocation18_spill] sm:$0xff] }
 0x494   : > { %v3404_v44 = vpop.eup %3403  ;;  %v2500_v12 = vmul.f32 %v3402_v31, %v4228_v39  ;;  %v2375_v15 = vadd.f32 1e-12, %v2301_v42 }
 0x495   : > { %v2501_v36 = vmul.f32 %v3404_v44, %v4234_v56  ;;  %3413 = vrsqrt.f32 %v2374_v32 }
 0x496   : > { %2564 = vst [vmem:[%s4314_s13 + $0x190] sm:$0xff] %v2500_v12  ;;  %3415 = vrsqrt.f32 %v2375_v15  ;;  %v2311_v29 = vpop.xlane.xlu0 %2310 }
 0x497   : > { %v3406_v10 = vpop.eup %3405  ;;  %2565 = vst [vmem:[%s4314_s13 + $0x198] sm:$0xff] %v2501_v36  ;;  %v2380_v21 = vadd.f32 1e-12, %v2311_v29  ;;  %v2313_v62 = vpop.xlane.xlu1 %2312 }
 0x498   : > { %v3408_v4 = vpop.eup %3407  ;;  %v2498_v59 = vmul.f32 %v3406_v10, %v4541_v52  ;;  %v2381_v14 = vadd.f32 1e-12, %v2313_v62 }
 0x499   : > { %v2499_v39 = vmul.f32 %v3408_v4, %v4542_v30  ;;  %3417 = vrsqrt.f32 %v2380_v21 }
 0x49a   : > { %2562 = vst [vmem:[%s4314_s13 + $0x180] sm:$0xff] %v2498_v59  ;;  %3419 = vrsqrt.f32 %v2381_v14  ;;  %v2307_v56 = vpop.xlane.xlu0 %2306 }
 0x49b   : > { %v3410_v50 = vpop.eup %3409  ;;  %2563 = vst [vmem:[%s4314_s13 + $0x188] sm:$0xff] %v2499_v39  ;;  %v2378_v40 = vadd.f32 1e-12, %v2307_v56  ;;  %v2309_v41 = vpop.xlane.xlu1 %2308 }
 0x49c   : > { %v3412_v34 = vpop.eup %3411  ;;  %v2504_v0 = vmul.f32 %v3410_v50, %v4543_v63  ;;  %v2379_v8 = vadd.f32 1e-12, %v2309_v41 }
 0x49d   : > { %v2505_v18 = vmul.f32 %v3412_v34, %v4544_v20  ;;  %3421 = vrsqrt.f32 %v2378_v40 }
 0x49e   : > { %2568 = vst [vmem:[%s4314_s13 + $0x1b0] sm:$0xff] %v2504_v0  ;;  %3423 = vrsqrt.f32 %v2379_v8  ;;  %v2315_v19 = vpop.xlane.xlu0 %2314 }
 0x49f   : > { %v3414_v37 = vpop.eup %3413  ;;  %2569 = vst [vmem:[%s4314_s13 + $0x1b8] sm:$0xff] %v2505_v18  ;;  %v2382_v17 = vadd.f32 1e-12, %v2315_v19 }
 0x4a0   : > { %v3416_v9 = vpop.eup %3415  ;;  %v2502_v43 = vmul.f32 %v3414_v37, %v4545_v16  ;;  %v2317_v48 = vpop.xlane.xlu1 %2316 }
 0x4a1   : > { %v2503_v22 = vmul.f32 %v3416_v9, %v4546_v13  ;;  %3425 = vrsqrt.f32 %v2382_v17  ;;  %v2383_v5 = vadd.f32 1e-12, %v2317_v48 }
 0x4a2   : > { %2566 = vst [vmem:[%s4314_s13 + $0x1a0] sm:$0xff] %v2502_v43  ;;  %v2319_v6 = vpop.xlane.xlu0 %2318 }
 0x4a3   : > { %v3418_v23 = vpop.eup %3417  ;;  %2567 = vst [vmem:[%s4314_s13 + $0x1a8] sm:$0xff] %v2503_v22  ;;  %3427 = vrsqrt.f32 %v2383_v5  ;;  %v2384_v27 = vadd.f32 1e-12, %v2319_v6 }
 0x4a4   : > { %v3420_v1 = vpop.eup %3419  ;;  %v2508_v24 = vmul.f32 %v3418_v23, %v4547_v46  ;;  %v2321_v28 = vpop.xlane.xlu1 %2320 }
 0x4a5   : > { %v2509_v26 = vmul.f32 %v3420_v1, %v4548_v25  ;;  %3429 = vrsqrt.f32 %v2384_v27  ;;  %v2385_v35 = vadd.f32 1e-12, %v2321_v28 }
 0x4a6   : > { %2572 = vst [vmem:[%s4314_s13 + $0x1d0] sm:$0xff] %v2508_v24 }
 0x4a7   : > { %v3422_v45 = vpop.eup %3421  ;;  %2573 = vst [vmem:[%s4314_s13 + $0x1d8] sm:$0xff] %v2509_v26  ;;  %3431 = vrsqrt.f32 %v2385_v35 }
 0x4a8   : > { %v3424_v49 = vpop.eup %3423  ;;  %v2506_v60 = vmul.f32 %v3422_v45, %v4549_v54 }
 0x4a9   : > { %v2507_v51 = vmul.f32 %v3424_v49, %v4550_v47 }
 0x4aa   : > { %2570 = vst [vmem:[%s4314_s13 + $0x1c0] sm:$0xff] %v2506_v60 }
 0x4ab   : > { %v3426_v61 = vpop.eup %3425  ;;  %2571 = vst [vmem:[%s4314_s13 + $0x1c8] sm:$0xff] %v2507_v51 }
 0x4ac   : > { %v2510_v55 = vmul.f32 %v3426_v61, %v4551_v53 }
 0x4ad   : > { %v3428_v33 = vpop.eup %3427 }
 0x4ae   : > { %2574 = vst [vmem:[%s4314_s13 + $0x1e0] sm:$0xff] %v2510_v55  ;;  %v2511_v3 = vmul.f32 %v3428_v33, %v4552_v38  ;;  %2585 = sbr.rel (!%p3569_p5) target bundleno = 1233 (0x4d1), region = 44 }
 0x4af   : > { %v3430_v7 = vpop.eup %3429 }
 0x4b0   : > { %2575 = vst [vmem:[%s4314_s13 + $0x1e8] sm:$0xff] %v2511_v3  ;;  %v2512_v58 = vmul.f32 %v3430_v7, %v4553_v57 }
 0x4b1   : > { %v3432_v2 = vpop.eup %3431 }
 0x4b2   : > { %2576 = vst [vmem:[%s4314_s13 + $0x1f0] sm:$0xff] %v2512_v58  ;;  %v2513_v31 = vmul.f32 %v3432_v2, %v4554_v11 }
 0x4b4   : > { %2577 = vst [vmem:[%s4314_s13 + $0x1f8] sm:$0xff] %v2513_v31 }
 0x4b5   : > { %s4560_s15 = smov (!%p2588_p11, %s2587_s15), 64 }
 0x4b6   : > { %s4449_s17 = sshll.u32 %s4560_s15, 7 }
 0x4b7   : > { %s2592_s23 = ssub.s32 8192, %s4449_s17 }
 0x4b8   : > { %2593 = vsyncadd %s4444_s14, %s2592_s23  ;;  %p2746_p12 = scmp.ne.s32.totalorder %s4449_s17, 0  ;;  %s2752_s25 = sshll.u32 %s3552_s22, 13 }
 0x4b9   : > { %s4458_s30 = scalar_lea.hbm %s4510_s5, %s2752_s25  ;;  %s2598_s7 = sshll.u32 %s4314_s13, 4  ;;  %s4461_s7 = int_to_ptr.vmem [resolvable:$true] %s2598_s7 }
 0x4ba   : > { %s3434_s6 = scalar_lea.vmem %s4461_s7, %s4449_s17  ;;  %s3498_s8 = smov [#allocation2]  }
 0x4bb   : > { %p3435_p13 = scmp.ne.s32.totalorder %s4461_s7, %s3434_s6  ;;  %s3438_s9 = sshll.u32 %s3498_s8, 4  ;;  %s3439_s9 = int_to_ptr.vmem [resolvable:$false] %s3438_s9 }
 0x4bc   : > { %s3440_s22 = scalar_lea.vmem %s3439_s9, 16384  ;;  %p3441_p2 = scmp.lt.s32.totalorder %s4461_s7, %s3439_s9 }
 0x4bd   : > { %p3436_p0 = pnand %p3435_p13, %p2746_p12  ;;  %p3442_p3 = scmp.lt.s32.totalorder %s3440_s22, %s3434_s6 }
 0x4bf   : > { %p3437_p1 = pneg %p3436_p0  ;;  %p3443_p4 = por %p3442_p3, %p3441_p2 }
 0x4c1   : > { %p3444_p5 = pnand %p3443_p4, %p3437_p1 }
 0x4c3   : > { %3447 = shalt.err (!%p3444_p5)
}
 0x4c4   : > { %s3448_s16 = scalar_lea.hbm %s4458_s30, %s4449_s17  ;;  %s3452_s12 = scalar_lea.hbm %s4510_s5, 16000 }
 0x4c5   : > { %p3449_p7 = scmp.ne.s32.totalorder %s4458_s30, %s3448_s16  ;;  %p3453_p10 = scmp.lt.u32.totalorder %s4458_s30, %s4510_s5 }
 0x4c6   : > { %p3454_p11 = scmp.lt.u32.totalorder %s3452_s12, %s3448_s16  ;;  %p3456_p0 = scmp.lt.u32.totalorder %s3448_s16, %s4458_s30 }
 0x4c7   : > { %p3450_p8 = pnand %p3449_p7, %p2746_p12 }
 0x4c8   : > { %p3455_p13 = por %p3454_p11, %p3453_p10 }
 0x4c9   : > { %p3451_p9 = pneg %p3450_p8 }
 0x4ca   : > { %p3457_p1 = por %p3456_p0, %p3455_p13 }
 0x4cc   : > { %p3458_p2 = pnand %p3457_p1, %p3451_p9 }
 0x4ce   : > { %3461 = shalt.err (!%p3458_p2)
}
 0x4cf   : > { %s3499_s23 = smov 128   ;;  %s3500_s25 = smov 8  }
 0x4d0   : > { %2604 = dma.vmem_to_hbm [thread:$0]  (%p2746_p12), %s4461_s7, %s4449_s17, %s4458_s30, %s4444_s14, %s3499_s23, %s3499_s23, %s3500_s25  }
 0x4d1 PF: > { %p3242_p3 = scmp.ge.s32.totalorder %s3496_s21, 2  ;;  %s2613_s26 = sand.u32 1, %s3484_s18  }
 0x4d2   : > { %s2614_s28 = scalar_lea.sflag [#allocation3], %s2613_s26 }
 0x4d3   : > { %p3239_p4 = pnand %p3242_p3, %p3573_p6 }
 0x4d5   : > { %3479 = dma.done.wait (!%p3239_p4), %s2614_s28, 8192  }
 0x4d6   : > { %3481 = vsyncadd (!%p3239_p4), %s2614_s28, 4294959104  ;;  %p15_p5 = scmp.ge.s32.totalorder %s3556_s24, 4   ;;  %s4555_s18 = smov %s3488_s19 }
 0x4d7   : > { %s4556_s19 = smov %s3492_s20  ;;  %s4557_s20 = smov %s3567_s27 }
 0x4d8   : > { %s4558_s21 = smov %s3556_s24  ;;  %17 = sbr.rel (!%p15_p5) target bundleno = 3 (0x3), region = 76 }
 0x4df   :  { %2619 = vsyncpa [#allocation3], 1 }
 0x4e0   :  { %2621 = vsyncpa [#allocation3 + $0x1], 1 }

// kernel: tpu_custom_call.1
= control target key start
LH: loop header
LB: loop body
LE: loop exit
PB: predicated region body
PF: predicated region fallthrough
CT: control target
= control target key end

     0   :  { %10 = vsyncpa [#allocation3], 0  ;;  %s4505_s0 = inlined_call_operand.vmem [shape: f32[1000,64], index: 0, kind: input, shape index: {}]   ;;  %s4506_s1 = inlined_call_operand.vmem [shape: f32[4,128], index: 1, kind: input, shape index: {}]   ;;  %s4507_s2 = inlined_call_operand.vmem [shape: bf16[64,128], index: 2, kind: input, shape index: {}]   ;;  %s4508_s3 = inlined_call_operand.vmem [shape: bf16[2,128,128], index: 3, kind: input, shape index: {}]   ;;  %s4509_s4 = inlined_call_operand.vmem [shape: bf16[128,128], index: 4, kind: input, shape index: {}]   ;;  %s4510_s5 = inlined_call_operand.hbm [shape: f32[1000,128], index: 5, kind: output, shape index: {}]  }
   0x1   :  { %12 = vsyncpa [#allocation3 + $0x1], 0  ;;  %s3531_s18 = smov 0   ;;  %s3533_s19 = smov 0  }
   0x2   :  { %s3535_s20 = smov 0   ;;  %s3537_s21 = smov 0  }
   0x3 LB: > { %s3552_s22 = sadd.s32 4294967295, %s3496_s21   ;;  %s2660_s23 = sadd.s32 4294967294, %s3496_s21   ;;  %s3496_s21 = sphi %s3537_s21, %s4558_s21   ;;  %s3492_s20 = sphi %s3535_s20, %s4557_s20   ;;  %s3488_s19 = sphi %s3533_s19, %s4556_s19   ;;  %s3484_s18 = sphi %s3531_s18, %s4555_s18  }
   0x4   : > { %s3556_s24 = sadd.s32 1, %s3496_s21   ;;  %s135_s25 = sadd.s32 1, %s3492_s20 }
   0x5   : > { %s132_s26 = ssub.s32 %s3496_s21, %s3556_s24  ;;  %p145_p0 = scmp.ne.s32.totalorder %s3492_s20, %s3488_s19 }
   0x6   : > { %p133_p1 = scmp.eq.s32.totalorder %s132_s26, 0  ;;  %p146_p2 = scmp.eq.s32.totalorder %s3552_s22, 1 }
   0x7   : > { %p151_p3 = scmp.ne.s32.totalorder %s3488_s19, %s3484_s18  ;;  %p152_p4 = scmp.eq.s32.totalorder %s2660_s23, 1 }
   0x8   : > { %s3567_s27 = scalar_select %p133_p1, %s3492_s20, %s135_s25  }
   0x9   : > { %p3569_p5 = por %p146_p2, %p145_p0  ;;  %p3573_p6 = por %p152_p4, %p151_p3 }
   0xa   : > { %p2663_p7 = scmp.ge.s32.totalorder %s3496_s21, 1  ;;  %p199_p8 = scmp.lt.s32.totalorder %s3496_s21, 3 }
   0xc   : > { %p200_p9 = pnand %p2663_p7, %p199_p8 }
   0xe   : > { %203 = sbr.rel (%p200_p9) target bundleno = 1233 (0x4d1), region = 40 }
  0x15   : > { %v3277_v0 = vld [vmem:[%s4507_s2] sm:$0xff]   ;;  %s3583_s7 = sshll.u32 %s3552_s22, 6  ;;  %v3278_v1 = vld [vmem:[%s4507_s2 + $0x8] sm:$0xff]   ;;  %v3279_v2 = vld [vmem:[%s4507_s2 + $0x10] sm:$0xff]   ;;  %vm384_vm0 = vcmask 523264   ;;  %s228_s11 = sand.u32 1, %s3488_s19  }
  0x16   : > { %p236_p10 = scmp.lt.s32.totalorder %s3583_s7, 124  ;;  %2909 = vmatprep.subr.bf16.mxu0 %v3277_v0  ;;  %v3280_v5 = vld [vmem:[%s4507_s2 + $0x18] sm:$0xff]   ;;  %v3281_v23 = vld [vmem:[%s4508_s3] sm:$0xff]   ;;  %v3282_v24 = vld [vmem:[%s4508_s3 + $0x8] sm:$0xff]   ;;  %s4444_s14 = scalar_lea.sflag [#allocation3], %s228_s11 }
  0x17   : > { %2910 = vmatpush3.bf16.msra.mxu0 %v3277_v0  ;;  %2981 = vmatprep.subr.bf16.mxu1 %v3281_v23  ;;  %v3283_v27 = vld [vmem:[%s4508_s3 + $0x10] sm:$0xff]   ;;  %v3284_v32 = vld [vmem:[%s4508_s3 + $0x18] sm:$0xff]   ;;  %v3285_v34 = vld [vmem:[%s4508_s3 + $0x20] sm:$0xff]   ;;  %s2587_s15 = ssub.s32 (%p3569_p5), 125, %s3583_s7 }
  0x18   : > { %s237_s12 = scalar_select %p236_p10, %s3583_s7, 124  ;;  %2911 = vmatprep.subr.bf16.mxu0 %v3278_v1  ;;  %2982 = vmatpush3.bf16.msra.mxu1 %v3281_v23  ;;  %v3286_v40 = vld [vmem:[%s4508_s3 + $0x28] sm:$0xff]  }
  0x19   : > { %2983 = vmatprep.subr.bf16.mxu1 %v3282_v24  ;;  %p2588_p11 = scmp.lt.s32.totalorder (%p3569_p5), %s2587_s15, 64 }
  0x1a   : > { %s2666_s13 = sshll.u32 %s237_s12, 3  ;;  %s2664_s12 = sshll.u32 %s228_s11, 9 }
  0x1b   : > { %s3596_s16 = scalar_lea.vmem %s4505_s0, %s2666_s13  ;;  %2912 = vmatpush3.bf16.msra.mxu0 %v3278_v1  ;;  %s4314_s13 = scalar_lea.vmem [#allocation2], %s2664_s12 }
  0x1c   : > { %v252_v3 = vld [vmem:[%s3596_s16] sm:$0xff]  ;;  %v253_v4 = vld [vmem:[%s3596_s16 + $0x8] sm:$0xff]  ;;  %2913 = vmatprep.subr.bf16.mxu0 %v3279_v2  ;;  %v254_v7 = vld [vmem:[%s3596_s16 + $0x10] sm:$0xff]  ;;  %2984 = vmatpush3.bf16.msra.mxu1 %v3282_v24 }
  0x1d   : > { %v316_v6 = vpack.c.bf16 %v253_v4, %v252_v3  ;;  %v255_v8 = vld [vmem:[%s3596_s16 + $0x18] sm:$0xff]  ;;  %v256_v9 = vld [vmem:[%s3596_s16 + $0x20] sm:$0xff]  ;;  %v257_v10 = vld [vmem:[%s3596_s16 + $0x28] sm:$0xff]  ;;  %2985 = vmatprep.subr.bf16.mxu1 %v3283_v27 }
  0x1e   : > { %v317_v11 = vpack.c.bf16 %v255_v8, %v254_v7  ;;  %v318_v12 = vpack.c.bf16 %v257_v10, %v256_v9  ;;  %v258_v13 = vld [vmem:[%s3596_s16 + $0x30] sm:$0xff]  ;;  %v259_v14 = vld [vmem:[%s3596_s16 + $0x38] sm:$0xff]  ;;  %v260_v15 = vld [vmem:[%s3596_s16 + $0x40] sm:$0xff] }
  0x1f   : > { %2917 = vmatprep.mubr.msk.bf16.mxu0 %vm384_vm0, %v316_v6  ;;  %2914 = vmatpush3.bf16.msra.mxu0 %v3279_v2  ;;  %v261_v16 = vld [vmem:[%s3596_s16 + $0x48] sm:$0xff]  ;;  %v319_v17 = vpack.c.bf16 %v259_v14, %v258_v13  ;;  %v262_v19 = vld [vmem:[%s3596_s16 + $0x50] sm:$0xff]  ;;  %v263_v20 = vld [vmem:[%s3596_s16 + $0x58] sm:$0xff] }
  0x20   : > { %2915 = vmatprep.subr.bf16.mxu0 %v3280_v5  ;;  %v320_v18 = vpack.c.bf16 %v261_v16, %v260_v15  ;;  %v264_v21 = vld [vmem:[%s3596_s16 + $0x60] sm:$0xff]  ;;  %v265_v22 = vld [vmem:[%s3596_s16 + $0x68] sm:$0xff]  ;;  %v321_v25 = vpack.c.bf16 %v263_v20, %v262_v19  ;;  %v266_v28 = vld [vmem:[%s3596_s16 + $0x70] sm:$0xff]  ;;  %2986 = vmatpush3.bf16.msra.mxu1 %v3283_v27 }
  0x21   : > { %v322_v26 = vpack.c.bf16 %v265_v22, %v264_v21  ;;  %v267_v29 = vld [vmem:[%s3596_s16 + $0x78] sm:$0xff]  ;;  %v268_v30 = vld [vmem:[%s3596_s16 + $0x80] sm:$0xff]  ;;  %v269_v31 = vld [vmem:[%s3596_s16 + $0x88] sm:$0xff]  ;;  %2987 = vmatprep.subr.bf16.mxu1 %v3284_v32 }
  0x22   : > { %v323_v33 = vpack.c.bf16 %v267_v29, %v266_v28  ;;  %v324_v35 = vpack.c.bf16 %v269_v31, %v268_v30  ;;  %v270_v36 = vld [vmem:[%s3596_s16 + $0x90] sm:$0xff]  ;;  %v271_v37 = vld [vmem:[%s3596_s16 + $0x98] sm:$0xff]  ;;  %v272_v38 = vld [vmem:[%s3596_s16 + $0xa0] sm:$0xff] }
  0x23   : > { %2916 = vmatpush3.bf16.msra.mxu0 %v3280_v5  ;;  %v273_v39 = vld [vmem:[%s3596_s16 + $0xa8] sm:$0xff]  ;;  %v325_v41 = vpack.c.bf16 %v271_v37, %v270_v36  ;;  %v274_v43 = vld [vmem:[%s3596_s16 + $0xb0] sm:$0xff]  ;;  %v275_v44 = vld [vmem:[%s3596_s16 + $0xb8] sm:$0xff] }
  0x24   : > { %2988 = vmatpush3.bf16.msra.mxu1 %v3284_v32  ;;  %v326_v42 = vpack.c.bf16 %v273_v39, %v272_v38  ;;  %v276_v45 = vld [vmem:[%s3596_s16 + $0xc0] sm:$0xff]  ;;  %v277_v46 = vld [vmem:[%s3596_s16 + $0xc8] sm:$0xff]  ;;  %v327_v47 = vpack.c.bf16 %v275_v44, %v274_v43  ;;  %v278_v49 = vld [vmem:[%s3596_s16 + $0xd0] sm:$0xff] }
  0x25   : > { %2989 = vmatprep.subr.bf16.mxu1 %v3285_v34  ;;  %v328_v48 = vpack.c.bf16 %v277_v46, %v276_v45  ;;  %v279_v50 = vld [vmem:[%s3596_s16 + $0xd8] sm:$0xff]  ;;  %v280_v51 = vld [vmem:[%s3596_s16 + $0xe0] sm:$0xff]  ;;  %v281_v52 = vld [vmem:[%s3596_s16 + $0xe8] sm:$0xff]  ;;  %v356_v45 = vlaneseq }
  0x26   : > { %2918 = vmatmul.mubr.msk.bf16.vlgmr.msra.gmra.mrb[0].mxu0 %vm384_vm0, %v317_v11  ;;  %v329_v53 = vpack.c.bf16 %v279_v50, %v278_v49  ;;  %v330_v54 = vpack.c.bf16 %v281_v52, %v280_v51  ;;  %v282_v55 = vld [vmem:[%s3596_s16 + $0xf0] sm:$0xff]  ;;  %v283_v56 = vld [vmem:[%s3596_s16 + $0xf8] sm:$0xff]  ;;  %v284_v57 = vld [vmem:[%s3596_s16 + $0x100] sm:$0xff] }
  0x27   : > { %2921 = vmatprep.mubr.msk.bf16.mxu0 %vm384_vm0, %v318_v12  ;;  %v285_v58 = vld [vmem:[%s3596_s16 + $0x108] sm:$0xff]  ;;  %v331_v59 = vpack.c.bf16 %v283_v56, %v282_v55  ;;  %v286_v61 = vld [vmem:[%s3596_s16 + $0x110] sm:$0xff]  ;;  %v287_v62 = vld [vmem:[%s3596_s16 + $0x118] sm:$0xff]  ;;  %v3724_v46 = vshrl.u32 %v356_v45, 7 }
  0x28   : > { %2990 = vmatpush3.bf16.msra.mxu1 %v3285_v34  ;;  %v332_v60 = vpack.c.bf16 %v285_v58, %v284_v57  ;;  %v288_v63 = vld [vmem:[%s3596_s16 + $0x120] sm:$0xff]  ;;  %v289_v0 = vld [vmem:[%s3596_s16 + $0x128] sm:$0xff]  ;;  %v333_v1 = vpack.c.bf16 %v287_v62, %v286_v61  ;;  %v290_v3 = vld [vmem:[%s3596_s16 + $0x130] sm:$0xff] }
  0x29   : > { %2991 = vmatprep.subr.bf16.mxu1 %v3286_v40  ;;  %v334_v2 = vpack.c.bf16 %v289_v0, %v288_v63  ;;  %v291_v4 = vld [vmem:[%s3596_s16 + $0x138] sm:$0xff]  ;;  %v292_v5 = vld [vmem:[%s3596_s16 + $0x140] sm:$0xff]  ;;  %v293_v6 = vld [vmem:[%s3596_s16 + $0x148] sm:$0xff] }
  0x2a   : > { %v335_v7 = vpack.c.bf16 %v291_v4, %v290_v3  ;;  %v336_v8 = vpack.c.bf16 %v293_v6, %v292_v5  ;;  %v294_v9 = vld [vmem:[%s3596_s16 + $0x150] sm:$0xff]  ;;  %v295_v10 = vld [vmem:[%s3596_s16 + $0x158] sm:$0xff]  ;;  %v296_v11 = vld [vmem:[%s3596_s16 + $0x160] sm:$0xff] }
  0x2b   : > { %v297_v12 = vld [vmem:[%s3596_s16 + $0x168] sm:$0xff]  ;;  %v337_v13 = vpack.c.bf16 %v295_v10, %v294_v9  ;;  %v298_v15 = vld [vmem:[%s3596_s16 + $0x170] sm:$0xff]  ;;  %v299_v16 = vld [vmem:[%s3596_s16 + $0x178] sm:$0xff] }
  0x2c   : > { %2992 = vmatpush3.bf16.msra.mxu1 %v3286_v40  ;;  %v338_v14 = vpack.c.bf16 %v297_v12, %v296_v11  ;;  %v339_v19 = vpack.c.bf16 %v299_v16, %v298_v15  ;;  %v3287_v20 = vld [vmem:[%s4508_s3 + $0x30] sm:$0xff]   ;;  %v3288_v22 = vld [vmem:[%s4508_s3 + $0x38] sm:$0xff]   ;;  %v308_v31 = vld [vmem:[%s3596_s16 + $0x1c0] sm:$0xff] }
  0x2d   : > { %2993 = vmatprep.subr.bf16.mxu1 %v3287_v20  ;;  %v302_v23 = vld [vmem:[%s3596_s16 + $0x190] sm:$0xff]  ;;  %v303_v24 = vld [vmem:[%s3596_s16 + $0x198] sm:$0xff]  ;;  %v309_v32 = vld [vmem:[%s3596_s16 + $0x1c8] sm:$0xff] }
  0x2e   : > { %2922 = vmatmul.mubr.msk.bf16.gmra.mrb[4].mxu0 %vm384_vm0, %v319_v17  ;;  %v300_v17 = vld [vmem:[%s3596_s16 + $0x180] sm:$0xff]  ;;  %v341_v27 = vpack.c.bf16 %v303_v24, %v302_v23  ;;  %v306_v29 = vld [vmem:[%s3596_s16 + $0x1b0] sm:$0xff]  ;;  %v307_v30 = vld [vmem:[%s3596_s16 + $0x1b8] sm:$0xff]  ;;  %v344_v34 = vpack.c.bf16 %v309_v32, %v308_v31 }
  0x2f   : > { %2925 = vmatprep.mubr.msk.bf16.mxu0 %vm384_vm0, %v320_v18  ;;  %v301_v18 = vld [vmem:[%s3596_s16 + $0x188] sm:$0xff]  ;;  %v311_v36 = vld [vmem:[%s3596_s16 + $0x1d8] sm:$0xff]  ;;  %v312_v37 = vld [vmem:[%s3596_s16 + $0x1e0] sm:$0xff] }
  0x30   : > { %v340_v21 = vpack.c.bf16 %v301_v18, %v300_v17  ;;  %2994 = vmatpush3.bf16.msra.mxu1 %v3287_v20  ;;  %v313_v38 = vld [vmem:[%s3596_s16 + $0x1e8] sm:$0xff]  ;;  %v3289_v44 = vld [vmem:[%s4508_s3 + $0x40] sm:$0xff]   ;;  %v3291_v58 = vld [vmem:[%s4508_s3 + $0x50] sm:$0xff]  }
  0x31   : > { %2995 = vmatprep.subr.bf16.mxu1 %v3288_v22  ;;  %v346_v40 = vpack.c.bf16 %v313_v38, %v312_v37  ;;  %3061 = vmatprep.subr.bf16.mxu0 %v3289_v44  ;;  %v3290_v49 = vld [vmem:[%s4508_s3 + $0x48] sm:$0xff]   ;;  %v3295_v18 = vld [vmem:[%s4508_s3 + $0x70] sm:$0xff]  }
  0x32   : > { %3062 = vmatpush3.bf16.msra.mxu0 %v3289_v44  ;;  %v3294_v11 = vld [vmem:[%s4508_s3 + $0x68] sm:$0xff]  }
  0x33   : > { %3063 = vmatprep.subr.bf16.mxu0 %v3290_v49 }
  0x34   : > { %2996 = vmatpush3.bf16.msra.mxu1 %v3288_v22 }
  0x36   : > { %2926 = vmatmul.mubr.msk.bf16.gmra.mrb[8].mxu0 %vm384_vm0, %v321_v25  ;;  %v304_v25 = vld [vmem:[%s3596_s16 + $0x1a0] sm:$0xff] }
  0x37   : > { %2929 = vmatprep.mubr.msk.bf16.mxu0 %vm384_vm0, %v322_v26  ;;  %v305_v26 = vld [vmem:[%s3596_s16 + $0x1a8] sm:$0xff]  ;;  %3064 = vmatpush3.bf16.msra.mxu0 %v3290_v49 }
  0x38   : > { %v342_v28 = vpack.c.bf16 %v305_v26, %v304_v25  ;;  %3065 = vmatprep.subr.bf16.mxu0 %v3291_v58 }
  0x3b   : > { %3066 = vmatpush3.bf16.msra.mxu0 %v3291_v58 }
  0x3e   : > { %2930 = vmatmul.mubr.msk.bf16.gmra.mrb[12].mxu0 %vm384_vm0, %v323_v33  ;;  %v343_v33 = vpack.c.bf16 %v307_v30, %v306_v29 }
  0x3f   : > { %2933 = vmatprep.mubr.msk.bf16.mxu0 %vm384_vm0, %v324_v35  ;;  %v310_v35 = vld [vmem:[%s3596_s16 + $0x1d0] sm:$0xff] }
  0x40   : > { %v345_v39 = vpack.c.bf16 %v311_v36, %v310_v35 }
  0x46   : > { %2934 = vmatmul.mubr.msk.bf16.gmra.mrb[16].mxu0 %vm384_vm0, %v325_v41  ;;  %v314_v41 = vld [vmem:[%s3596_s16 + $0x1f0] sm:$0xff] }
  0x47   : > { %2937 = vmatprep.mubr.msk.bf16.mxu0 %vm384_vm0, %v326_v42  ;;  %v315_v42 = vld [vmem:[%s3596_s16 + $0x1f8] sm:$0xff] }
  0x48   : > { %v347_v43 = vpack.c.bf16 %v315_v42, %v314_v41 }
  0x4e   : > { %2938 = vmatmul.mubr.msk.bf16.gmra.mrb[20].mxu0 %vm384_vm0, %v327_v47  ;;  %v358_v47 = vsub.s32 0, %v3724_v46 }
  0x4f   : > { %2941 = vmatprep.mubr.msk.bf16.mxu0 %vm384_vm0, %v328_v48  ;;  %v3730_v48 = vld [vmem:[%s4506_s1] sm:$0xf] }
  0x50   : > { %v3736_v50 = vrot.slane %v3730_v48, %v358_v47 }
  0x56   : > { %2942 = vmatmul.mubr.msk.bf16.gmra.mrb[24].mxu0 %vm384_vm0, %v329_v53 }
  0x57   : > { %2945 = vmatprep.mubr.msk.bf16.mxu0 %vm384_vm0, %v330_v54 }
  0x5e   : > { %2946 = vmatmul.mubr.msk.bf16.gmra.mrb[28].mxu0 %vm384_vm0, %v331_v59  ;;  %v3292_v59 = vld [vmem:[%s4508_s3 + $0x58] sm:$0xff]  }
  0x5f   : > { %2949 = vmatprep.mubr.msk.bf16.mxu0 %vm384_vm0, %v332_v60  ;;  %3067 = vmatprep.subr.bf16.mxu0 %v3292_v59 }
  0x60   : > { %3068 = vmatpush3.bf16.msra.mxu0 %v3292_v59 }
  0x66   : > { %2950 = vmatmul.mubr.msk.bf16.gmra.mrb[32].mxu0 %vm384_vm0, %v333_v1 }
  0x67   : > { %2953 = vmatprep.mubr.msk.bf16.mxu0 %vm384_vm0, %v334_v2  ;;  %v3293_v2 = vld [vmem:[%s4508_s3 + $0x60] sm:$0xff]  }
  0x68   : > { %3069 = vmatprep.subr.bf16.mxu0 %v3293_v2 }
  0x69   : > { %3070 = vmatpush3.bf16.msra.mxu0 %v3293_v2 }
  0x6a   : > { %3071 = vmatprep.subr.bf16.mxu0 %v3294_v11 }
  0x6d   : > { %3072 = vmatpush3.bf16.msra.mxu0 %v3294_v11 }
  0x6e   : > { %2954 = vmatmul.mubr.msk.bf16.gmra.mrb[36].mxu0 %vm384_vm0, %v335_v7  ;;  %3073 = vmatprep.subr.bf16.mxu0 %v3295_v18 }
  0x6f   : > { %2957 = vmatprep.mubr.msk.bf16.mxu0 %vm384_vm0, %v336_v8 }
  0x71   : > { %3074 = vmatpush3.bf16.msra.mxu0 %v3295_v18 }
  0x76   : > { %2958 = vmatmul.mubr.msk.bf16.gmra.mrb[40].mxu0 %vm384_vm0, %v337_v13 }
  0x77   : > { %2961 = vmatprep.mubr.msk.bf16.mxu0 %vm384_vm0, %v338_v14 }
  0x7e   : > { %2962 = vmatmul.mubr.msk.bf16.gmra.mrb[44].mxu0 %vm384_vm0, %v339_v19 }
  0x7f   : > { %2965 = vmatprep.mubr.msk.bf16.mxu0 %vm384_vm0, %v340_v21 }
  0x86   : > { %2966 = vmatmul.mubr.msk.bf16.gmra.mrb[48].mxu0 %vm384_vm0, %v341_v27  ;;  %v3296_v27 = vld [vmem:[%s4508_s3 + $0x78] sm:$0xff]  }
  0x87   : > { %2969 = vmatprep.mubr.msk.bf16.mxu0 %vm384_vm0, %v342_v28  ;;  %3075 = vmatprep.subr.bf16.mxu0 %v3296_v27 }
  0x88   : > { %3076 = vmatpush3.bf16.msra.mxu0 %v3296_v27 }
  0x8e   : > { %2970 = vmatmul.mubr.msk.bf16.gmra.mrb[52].mxu0 %vm384_vm0, %v343_v33 }
  0x8f   : > { %2973 = vmatprep.mubr.msk.bf16.mxu0 %vm384_vm0, %v344_v34 }
  0x96   : > { %2974 = vmatmul.mubr.msk.bf16.gmra.mrb[56].mxu0 %vm384_vm0, %v345_v39 }
  0x97   : > { %2977 = vmatprep.mubr.msk.bf16.mxu0 %vm384_vm0, %v346_v40 }
  0x9e   : > { %2978 = vmatmul.mubr.msk.bf16.gmra.mrb[60].mxu0 %vm384_vm0, %v347_v43 }
  0xf9   : > { %v2919_v51 = vpop.f32.mrb[0].mxu0 }
  0xfa   : > { %v524_v52 = vadd.f32 %v2919_v51, %v3736_v50  ;;  %v515_v53 = vpop.f32.mrb[1].mxu0 }
  0xfb   : > { %v516_v54 = vadd.f32 %v515_v53, %v3736_v50  ;;  %v2920_v55 = vpop.f32.mrb[2].mxu0 }
  0xfc   : > { %v527_v56 = vadd.f32 %v2920_v55, %v3736_v50  ;;  %v518_v57 = vpop.f32.mrb[3].mxu0  ;;  %v772_v61 = vmax.f32 %v524_v52, 0.0 }
  0xfd   : > { %v519_v60 = vadd.f32 %v518_v57, %v3736_v50  ;;  %v770_v63 = vmax.f32 %v516_v54, 0.0 }
  0xfe   : > { %v773_v62 = vmax.f32 %v527_v56, 0.0 }
  0xff   : > { %v771_v0 = vmax.f32 %v519_v60, 0.0 }
 0x100   : > { %v851_v1 = vpack.c.bf16 %v773_v62, %v772_v61 }
 0x101   : > { %v2923_v3 = vpop.f32.mrb[4].mxu0  ;;  %v850_v4 = vpack.c.bf16 %v771_v0, %v770_v63 }
 0x102   : > { %v540_v5 = vadd.f32 %v2923_v3, %v3736_v50  ;;  %v531_v6 = vpop.f32.mrb[5].mxu0 }
 0x103   : > { %v532_v7 = vadd.f32 %v531_v6, %v3736_v50  ;;  %v2924_v8 = vpop.f32.mrb[6].mxu0  ;;  %2997 = vmatprep.mubr.bf16.mxu1 %v850_v4 }
 0x104   : > { %v543_v9 = vadd.f32 %v2924_v8, %v3736_v50  ;;  %v534_v10 = vpop.f32.mrb[7].mxu0  ;;  %2998 = vmatmul.mubr.bf16.vlgmr.msra.gmra.mrb[0].mxu1 %v851_v1  ;;  %v776_v13 = vmax.f32 %v540_v5, 0.0 }
 0x105   : > { %v535_v12 = vadd.f32 %v534_v10, %v3736_v50  ;;  %v774_v15 = vmax.f32 %v532_v7, 0.0 }
 0x106   : > { %v777_v14 = vmax.f32 %v543_v9, 0.0 }
 0x107   : > { %v775_v16 = vmax.f32 %v535_v12, 0.0 }
 0x108   : > { %v853_v17 = vpack.c.bf16 %v777_v14, %v776_v13 }
 0x109   : > { %v852_v19 = vpack.c.bf16 %v775_v16, %v774_v15  ;;  %v2927_v20 = vpop.f32.mrb[8].mxu0 }
 0x10a   : > { %v556_v21 = vadd.f32 %v2927_v20, %v3736_v50  ;;  %v547_v22 = vpop.f32.mrb[9].mxu0 }
 0x10b   : > { %v548_v23 = vadd.f32 %v547_v22, %v3736_v50  ;;  %v2928_v24 = vpop.f32.mrb[10].mxu0  ;;  %3001 = vmatprep.mubr.bf16.mxu1 %v852_v19 }
 0x10c   : > { %v559_v25 = vadd.f32 %v2928_v24, %v3736_v50  ;;  %v550_v26 = vpop.f32.mrb[11].mxu0  ;;  %3002 = vmatmul.mubr.bf16.gmra.mrb[4].mxu1 %v853_v17  ;;  %v780_v29 = vmax.f32 %v556_v21, 0.0 }
 0x10d   : > { %v551_v28 = vadd.f32 %v550_v26, %v3736_v50  ;;  %v778_v31 = vmax.f32 %v548_v23, 0.0 }
 0x10e   : > { %v781_v30 = vmax.f32 %v559_v25, 0.0 }
 0x10f   : > { %v779_v32 = vmax.f32 %v551_v28, 0.0 }
 0x110   : > { %v855_v33 = vpack.c.bf16 %v781_v30, %v780_v29 }
 0x111   : > { %v854_v34 = vpack.c.bf16 %v779_v32, %v778_v31  ;;  %v2931_v35 = vpop.f32.mrb[12].mxu0 }
 0x112   : > { %v572_v36 = vadd.f32 %v2931_v35, %v3736_v50  ;;  %v563_v37 = vpop.f32.mrb[13].mxu0 }
 0x113   : > { %v564_v38 = vadd.f32 %v563_v37, %v3736_v50  ;;  %v2932_v39 = vpop.f32.mrb[14].mxu0  ;;  %3005 = vmatprep.mubr.bf16.mxu1 %v854_v34 }
 0x114   : > { %v575_v40 = vadd.f32 %v2932_v39, %v3736_v50  ;;  %v566_v41 = vpop.f32.mrb[15].mxu0  ;;  %3006 = vmatmul.mubr.bf16.gmra.mrb[8].mxu1 %v855_v33  ;;  %v784_v43 = vmax.f32 %v572_v36, 0.0 }
 0x115   : > { %v567_v42 = vadd.f32 %v566_v41, %v3736_v50  ;;  %v782_v45 = vmax.f32 %v564_v38, 0.0 }
 0x116   : > { %v785_v44 = vmax.f32 %v575_v40, 0.0 }
 0x117   : > { %v783_v47 = vmax.f32 %v567_v42, 0.0 }
 0x118   : > { %v857_v49 = vpack.c.bf16 %v785_v44, %v784_v43 }
 0x119   : > { %v856_v51 = vpack.c.bf16 %v783_v47, %v782_v45  ;;  %v2935_v52 = vpop.f32.mrb[16].mxu0 }
 0x11a   : > { %v588_v53 = vadd.f32 %v2935_v52, %v3736_v50  ;;  %v579_v54 = vpop.f32.mrb[17].mxu0 }
 0x11b   : > { %v580_v55 = vadd.f32 %v579_v54, %v3736_v50  ;;  %v2936_v56 = vpop.f32.mrb[18].mxu0  ;;  %3009 = vmatprep.mubr.bf16.mxu1 %v856_v51 }
 0x11c   : > { %v591_v57 = vadd.f32 %v2936_v56, %v3736_v50  ;;  %v582_v58 = vpop.f32.mrb[19].mxu0  ;;  %3010 = vmatmul.mubr.bf16.gmra.mrb[12].mxu1 %v857_v49  ;;  %v788_v60 = vmax.f32 %v588_v53, 0.0 }
 0x11d   : > { %v583_v59 = vadd.f32 %v582_v58, %v3736_v50  ;;  %v786_v62 = vmax.f32 %v580_v55, 0.0 }
 0x11e   : > { %v789_v61 = vmax.f32 %v591_v57, 0.0 }
 0x11f   : > { %v787_v63 = vmax.f32 %v583_v59, 0.0 }
 0x120   : > { %v859_v0 = vpack.c.bf16 %v789_v61, %v788_v60 }
 0x121   : > { %v858_v1 = vpack.c.bf16 %v787_v63, %v786_v62  ;;  %v2939_v2 = vpop.f32.mrb[20].mxu0 }
 0x122   : > { %v604_v3 = vadd.f32 %v2939_v2, %v3736_v50  ;;  %v595_v4 = vpop.f32.mrb[21].mxu0 }
 0x123   : > { %v596_v5 = vadd.f32 %v595_v4, %v3736_v50  ;;  %v2940_v6 = vpop.f32.mrb[22].mxu0  ;;  %3013 = vmatprep.mubr.bf16.mxu1 %v858_v1 }
 0x124   : > { %v607_v7 = vadd.f32 %v2940_v6, %v3736_v50  ;;  %v598_v8 = vpop.f32.mrb[23].mxu0  ;;  %3014 = vmatmul.mubr.bf16.gmra.mrb[16].mxu1 %v859_v0  ;;  %v792_v10 = vmax.f32 %v604_v3, 0.0 }
 0x125   : > { %v599_v9 = vadd.f32 %v598_v8, %v3736_v50  ;;  %v790_v12 = vmax.f32 %v596_v5, 0.0 }
 0x126   : > { %v793_v11 = vmax.f32 %v607_v7, 0.0 }
 0x127   : > { %v791_v13 = vmax.f32 %v599_v9, 0.0 }
 0x128   : > { %v861_v14 = vpack.c.bf16 %v793_v11, %v792_v10 }
 0x129   : > { %v860_v15 = vpack.c.bf16 %v791_v13, %v790_v12  ;;  %v2943_v16 = vpop.f32.mrb[24].mxu0 }
 0x12a   : > { %v620_v17 = vadd.f32 %v2943_v16, %v3736_v50  ;;  %v611_v18 = vpop.f32.mrb[25].mxu0 }
 0x12b   : > { %v612_v19 = vadd.f32 %v611_v18, %v3736_v50  ;;  %v2944_v20 = vpop.f32.mrb[26].mxu0  ;;  %3017 = vmatprep.mubr.bf16.mxu1 %v860_v15 }
 0x12c   : > { %v623_v21 = vadd.f32 %v2944_v20, %v3736_v50  ;;  %v614_v22 = vpop.f32.mrb[27].mxu0  ;;  %3018 = vmatmul.mubr.bf16.gmra.mrb[20].mxu1 %v861_v14  ;;  %v796_v24 = vmax.f32 %v620_v17, 0.0 }
 0x12d   : > { %v615_v23 = vadd.f32 %v614_v22, %v3736_v50  ;;  %v794_v26 = vmax.f32 %v612_v19, 0.0 }
 0x12e   : > { %v797_v25 = vmax.f32 %v623_v21, 0.0 }
 0x12f   : > { %v795_v27 = vmax.f32 %v615_v23, 0.0 }
 0x130   : > { %v863_v28 = vpack.c.bf16 %v797_v25, %v796_v24 }
 0x131   : > { %v862_v29 = vpack.c.bf16 %v795_v27, %v794_v26  ;;  %v2947_v30 = vpop.f32.mrb[28].mxu0 }
 0x132   : > { %v636_v31 = vadd.f32 %v2947_v30, %v3736_v50  ;;  %v627_v32 = vpop.f32.mrb[29].mxu0 }
 0x133   : > { %v628_v33 = vadd.f32 %v627_v32, %v3736_v50  ;;  %v2948_v34 = vpop.f32.mrb[30].mxu0  ;;  %3021 = vmatprep.mubr.bf16.mxu1 %v862_v29 }
 0x134   : > { %v639_v35 = vadd.f32 %v2948_v34, %v3736_v50  ;;  %v630_v36 = vpop.f32.mrb[31].mxu0  ;;  %3022 = vmatmul.mubr.bf16.gmra.mrb[24].mxu1 %v863_v28  ;;  %v800_v38 = vmax.f32 %v636_v31, 0.0 }
 0x135   : > { %v631_v37 = vadd.f32 %v630_v36, %v3736_v50  ;;  %v798_v40 = vmax.f32 %v628_v33, 0.0 }
 0x136   : > { %v801_v39 = vmax.f32 %v639_v35, 0.0 }
 0x137   : > { %v799_v41 = vmax.f32 %v631_v37, 0.0 }
 0x138   : > { %v865_v42 = vpack.c.bf16 %v801_v39, %v800_v38 }
 0x139   : > { %v864_v43 = vpack.c.bf16 %v799_v41, %v798_v40  ;;  %v2951_v44 = vpop.f32.mrb[32].mxu0 }
 0x13a   : > { %v652_v45 = vadd.f32 %v2951_v44, %v3736_v50  ;;  %v643_v47 = vpop.f32.mrb[33].mxu0 }
 0x13b   : > { %v644_v49 = vadd.f32 %v643_v47, %v3736_v50  ;;  %v2952_v51 = vpop.f32.mrb[34].mxu0  ;;  %3025 = vmatprep.mubr.bf16.mxu1 %v864_v43 }
 0x13c   : > { %v655_v52 = vadd.f32 %v2952_v51, %v3736_v50  ;;  %v646_v53 = vpop.f32.mrb[35].mxu0  ;;  %3026 = vmatmul.mubr.bf16.gmra.mrb[28].mxu1 %v865_v42  ;;  %v804_v55 = vmax.f32 %v652_v45, 0.0 }
 0x13d   : > { %v647_v54 = vadd.f32 %v646_v53, %v3736_v50  ;;  %v802_v57 = vmax.f32 %v644_v49, 0.0 }
 0x13e   : > { %v805_v56 = vmax.f32 %v655_v52, 0.0 }
 0x13f   : > { %v803_v58 = vmax.f32 %v647_v54, 0.0 }
 0x140   : > { %v867_v59 = vpack.c.bf16 %v805_v56, %v804_v55 }
 0x141   : > { %v866_v60 = vpack.c.bf16 %v803_v58, %v802_v57  ;;  %v2955_v61 = vpop.f32.mrb[36].mxu0 }
 0x142   : > { %v668_v62 = vadd.f32 %v2955_v61, %v3736_v50  ;;  %v659_v63 = vpop.f32.mrb[37].mxu0 }
 0x143   : > { %v660_v0 = vadd.f32 %v659_v63, %v3736_v50  ;;  %v2956_v1 = vpop.f32.mrb[38].mxu0  ;;  %3029 = vmatprep.mubr.bf16.mxu1 %v866_v60 }
 0x144   : > { %v671_v2 = vadd.f32 %v2956_v1, %v3736_v50  ;;  %v662_v3 = vpop.f32.mrb[39].mxu0  ;;  %3030 = vmatmul.mubr.bf16.gmra.mrb[32].mxu1 %v867_v59  ;;  %v808_v5 = vmax.f32 %v668_v62, 0.0 }
 0x145   : > { %v663_v4 = vadd.f32 %v662_v3, %v3736_v50  ;;  %v806_v7 = vmax.f32 %v660_v0, 0.0 }
 0x146   : > { %v809_v6 = vmax.f32 %v671_v2, 0.0 }
 0x147   : > { %v807_v8 = vmax.f32 %v663_v4, 0.0 }
 0x148   : > { %v869_v9 = vpack.c.bf16 %v809_v6, %v808_v5 }
 0x149   : > { %v868_v10 = vpack.c.bf16 %v807_v8, %v806_v7  ;;  %v2959_v11 = vpop.f32.mrb[40].mxu0 }
 0x14a   : > { %v684_v12 = vadd.f32 %v2959_v11, %v3736_v50  ;;  %v675_v13 = vpop.f32.mrb[41].mxu0 }
 0x14b   : > { %v676_v14 = vadd.f32 %v675_v13, %v3736_v50  ;;  %v2960_v15 = vpop.f32.mrb[42].mxu0  ;;  %3033 = vmatprep.mubr.bf16.mxu1 %v868_v10 }
 0x14c   : > { %v687_v16 = vadd.f32 %v2960_v15, %v3736_v50  ;;  %v678_v17 = vpop.f32.mrb[43].mxu0  ;;  %3034 = vmatmul.mubr.bf16.gmra.mrb[36].mxu1 %v869_v9  ;;  %v812_v19 = vmax.f32 %v684_v12, 0.0 }
 0x14d   : > { %v679_v18 = vadd.f32 %v678_v17, %v3736_v50  ;;  %v810_v21 = vmax.f32 %v676_v14, 0.0 }
 0x14e   : > { %v813_v20 = vmax.f32 %v687_v16, 0.0 }
 0x14f   : > { %v811_v22 = vmax.f32 %v679_v18, 0.0 }
 0x150   : > { %v871_v23 = vpack.c.bf16 %v813_v20, %v812_v19 }
 0x151   : > { %v870_v24 = vpack.c.bf16 %v811_v22, %v810_v21  ;;  %v2963_v25 = vpop.f32.mrb[44].mxu0 }
 0x152   : > { %v700_v26 = vadd.f32 %v2963_v25, %v3736_v50  ;;  %v691_v27 = vpop.f32.mrb[45].mxu0 }
 0x153   : > { %v692_v28 = vadd.f32 %v691_v27, %v3736_v50  ;;  %v2964_v29 = vpop.f32.mrb[46].mxu0  ;;  %3037 = vmatprep.mubr.bf16.mxu1 %v870_v24 }
 0x154   : > { %v703_v30 = vadd.f32 %v2964_v29, %v3736_v50  ;;  %v694_v31 = vpop.f32.mrb[47].mxu0  ;;  %3038 = vmatmul.mubr.bf16.gmra.mrb[40].mxu1 %v871_v23  ;;  %v816_v33 = vmax.f32 %v700_v26, 0.0 }
 0x155   : > { %v695_v32 = vadd.f32 %v694_v31, %v3736_v50  ;;  %v814_v35 = vmax.f32 %v692_v28, 0.0 }
 0x156   : > { %v817_v34 = vmax.f32 %v703_v30, 0.0 }
 0x157   : > { %v815_v36 = vmax.f32 %v695_v32, 0.0 }
 0x158   : > { %v873_v37 = vpack.c.bf16 %v817_v34, %v816_v33  ;;  %v3297_v34 = vld [vmem:[%s4509_s4] sm:$0xff]  }
 0x159   : > { %v872_v38 = vpack.c.bf16 %v815_v36, %v814_v35  ;;  %v2967_v39 = vpop.f32.mrb[48].mxu0  ;;  %3141 = vmatprep.subr.bf16.mxu0 %v3297_v34  ;;  %3221 = vmatprep.subr.bf16.mxu1 %v3297_v34  ;;  %v884_v35 = vsub.s32 1, %v3724_v46 }
 0x15a   : > { %v716_v40 = vadd.f32 %v2967_v39, %v3736_v50  ;;  %v707_v41 = vpop.f32.mrb[49].mxu0  ;;  %3229 = vmatpush3.bf16.msra.mxu1 %v3297_v34 }
 0x15b   : > { %v708_v42 = vadd.f32 %v707_v41, %v3736_v50  ;;  %v2968_v43 = vpop.f32.mrb[50].mxu0  ;;  %3041 = vmatprep.mubr.bf16.mxu1 %v872_v38  ;;  %v3825_v36 = vrot.slane %v3730_v48, %v884_v35  ;;  %v3299_v48 = vld [vmem:[%s4509_s4 + $0x10] sm:$0xff]  }
 0x15c   : > { %v719_v44 = vadd.f32 %v2968_v43, %v3736_v50  ;;  %v710_v45 = vpop.f32.mrb[51].mxu0  ;;  %3042 = vmatmul.mubr.bf16.gmra.mrb[44].mxu1 %v873_v37  ;;  %v820_v49 = vmax.f32 %v716_v40, 0.0 }
 0x15d   : > { %v711_v47 = vadd.f32 %v710_v45, %v3736_v50  ;;  %v818_v52 = vmax.f32 %v708_v42, 0.0 }
 0x15e   : > { %v821_v51 = vmax.f32 %v719_v44, 0.0 }
 0x15f   : > { %v819_v53 = vmax.f32 %v711_v47, 0.0 }
 0x160   : > { %v875_v54 = vpack.c.bf16 %v821_v51, %v820_v49  ;;  %v3300_v49 = vld [vmem:[%s4509_s4 + $0x18] sm:$0xff]  }
 0x161   : > { %v874_v55 = vpack.c.bf16 %v819_v53, %v818_v52  ;;  %v2971_v56 = vpop.f32.mrb[52].mxu0 }
 0x162   : > { %v732_v57 = vadd.f32 %v2971_v56, %v3736_v50  ;;  %v723_v58 = vpop.f32.mrb[53].mxu0 }
 0x163   : > { %v724_v59 = vadd.f32 %v723_v58, %v3736_v50  ;;  %v2972_v60 = vpop.f32.mrb[54].mxu0  ;;  %3045 = vmatprep.mubr.bf16.mxu1 %v874_v55  ;;  %v3301_v58 = vld [vmem:[%s4509_s4 + $0x20] sm:$0xff]  }
 0x164   : > { %v735_v61 = vadd.f32 %v2972_v60, %v3736_v50  ;;  %v726_v62 = vpop.f32.mrb[55].mxu0  ;;  %3046 = vmatmul.mubr.bf16.gmra.mrb[48].mxu1 %v875_v54  ;;  %v824_v0 = vmax.f32 %v732_v57, 0.0 }
 0x165   : > { %v727_v63 = vadd.f32 %v726_v62, %v3736_v50  ;;  %v822_v2 = vmax.f32 %v724_v59, 0.0 }
 0x166   : > { %v825_v1 = vmax.f32 %v735_v61, 0.0 }
 0x167   : > { %v823_v3 = vmax.f32 %v727_v63, 0.0 }
 0x168   : > { %v877_v4 = vpack.c.bf16 %v825_v1, %v824_v0 }
 0x169   : > { %v876_v5 = vpack.c.bf16 %v823_v3, %v822_v2  ;;  %v2975_v6 = vpop.f32.mrb[56].mxu0  ;;  %v3302_v2 = vld [vmem:[%s4509_s4 + $0x28] sm:$0xff]  }
 0x16a   : > { %v748_v7 = vadd.f32 %v2975_v6, %v3736_v50  ;;  %v739_v8 = vpop.f32.mrb[57].mxu0 }
 0x16b   : > { %v740_v9 = vadd.f32 %v739_v8, %v3736_v50  ;;  %v2976_v10 = vpop.f32.mrb[58].mxu0  ;;  %3049 = vmatprep.mubr.bf16.mxu1 %v876_v5 }
 0x16c   : > { %v751_v11 = vadd.f32 %v2976_v10, %v3736_v50  ;;  %v742_v12 = vpop.f32.mrb[59].mxu0  ;;  %3050 = vmatmul.mubr.bf16.gmra.mrb[52].mxu1 %v877_v4  ;;  %v828_v14 = vmax.f32 %v748_v7, 0.0  ;;  %v3303_v10 = vld [vmem:[%s4509_s4 + $0x30] sm:$0xff]  }
 0x16d   : > { %v743_v13 = vadd.f32 %v742_v12, %v3736_v50  ;;  %v826_v16 = vmax.f32 %v740_v9, 0.0 }
 0x16e   : > { %v829_v15 = vmax.f32 %v751_v11, 0.0 }
 0x16f   : > { %v827_v17 = vmax.f32 %v743_v13, 0.0 }
 0x170   : > { %v879_v18 = vpack.c.bf16 %v829_v15, %v828_v14 }
 0x171   : > { %v878_v19 = vpack.c.bf16 %v827_v17, %v826_v16  ;;  %v2979_v20 = vpop.f32.mrb[60].mxu0 }
 0x172   : > { %v764_v21 = vadd.f32 %v2979_v20, %v3736_v50  ;;  %v755_v22 = vpop.f32.mrb[61].mxu0 }
 0x173   : > { %v756_v23 = vadd.f32 %v755_v22, %v3736_v50  ;;  %v2980_v24 = vpop.f32.mrb[62].mxu0  ;;  %3053 = vmatprep.mubr.bf16.mxu1 %v878_v19 }
 0x174   : > { %v767_v25 = vadd.f32 %v2980_v24, %v3736_v50  ;;  %v758_v26 = vpop.f32.mrb[63].mxu0  ;;  %3054 = vmatmul.mubr.bf16.gmra.mrb[56].mxu1 %v879_v18  ;;  %v832_v28 = vmax.f32 %v764_v21, 0.0  ;;  %v3304_v18 = vld [vmem:[%s4509_s4 + $0x38] sm:$0xff]  }
 0x175   : > { %v759_v27 = vadd.f32 %v758_v26, %v3736_v50  ;;  %v830_v30 = vmax.f32 %v756_v23, 0.0  ;;  %v3298_v50 = vld [vmem:[%s4509_s4 + $0x8] sm:$0xff]  }
 0x176   : > { %v833_v29 = vmax.f32 %v767_v25, 0.0  ;;  %3222 = vmatprep.subr.bf16.mxu1 %v3298_v50 }
 0x177   : > { %v831_v31 = vmax.f32 %v759_v27, 0.0  ;;  %3230 = vmatpush3.bf16.msra.mxu1 %v3298_v50 }
 0x178   : > { %v881_v32 = vpack.c.bf16 %v833_v29, %v832_v28  ;;  %3223 = vmatprep.subr.bf16.mxu1 %v3299_v48 }
 0x179   : > { %v880_v33 = vpack.c.bf16 %v831_v31, %v830_v30 }
 0x17b   : > { %3057 = vmatprep.mubr.bf16.mxu1 %v880_v33  ;;  %3231 = vmatpush3.bf16.msra.mxu1 %v3299_v48 }
 0x17c   : > { %3058 = vmatmul.mubr.bf16.gmra.mrb[60].mxu1 %v881_v32  ;;  %3224 = vmatprep.subr.bf16.mxu1 %v3300_v49 }
 0x17f   : > { %3232 = vmatpush3.bf16.msra.mxu1 %v3300_v49 }
 0x180   : > { %3225 = vmatprep.subr.bf16.mxu1 %v3301_v58 }
 0x183   : > { %3233 = vmatpush3.bf16.msra.mxu1 %v3301_v58 }
 0x184   : > { %3226 = vmatprep.subr.bf16.mxu1 %v3302_v2 }
 0x187   : > { %3234 = vmatpush3.bf16.msra.mxu1 %v3302_v2 }
 0x188   : > { %3227 = vmatprep.subr.bf16.mxu1 %v3303_v10 }
 0x18b   : > { %3235 = vmatpush3.bf16.msra.mxu1 %v3303_v10 }
 0x18c   : > { %3228 = vmatprep.subr.bf16.mxu1 %v3304_v18 }
 0x18f   : > { %3236 = vmatpush3.bf16.msra.mxu1 %v3304_v18 }
 0x1d7   : > { %v2999_v37 = vpop.f32.mrb[0].mxu1 }
 0x1d8   : > { %v977_v38 = vadd.f32 %v2999_v37, %v3825_v36  ;;  %v968_v39 = vpop.f32.mrb[1].mxu1 }
 0x1d9   : > { %v969_v40 = vadd.f32 %v968_v39, %v3825_v36  ;;  %v3000_v41 = vpop.f32.mrb[2].mxu1 }
 0x1da   : > { %v980_v42 = vadd.f32 %v3000_v41, %v3825_v36  ;;  %v971_v43 = vpop.f32.mrb[3].mxu1  ;;  %v1225_v45 = vmax.f32 %v977_v38, 0.0 }
 0x1db   : > { %v972_v44 = vadd.f32 %v971_v43, %v3825_v36  ;;  %v1223_v51 = vmax.f32 %v969_v40, 0.0 }
 0x1dc   : > { %v1226_v47 = vmax.f32 %v980_v42, 0.0 }
 0x1dd   : > { %v1224_v52 = vmax.f32 %v972_v44, 0.0 }
 0x1de   : > { %v1305_v53 = vpack.c.bf16 %v1226_v47, %v1225_v45 }
 0x1df   : > { %v1304_v54 = vpack.c.bf16 %v1224_v52, %v1223_v51  ;;  %v3003_v55 = vpop.f32.mrb[4].mxu1 }
 0x1e0   : > { %v993_v56 = vadd.f32 %v3003_v55, %v3825_v36  ;;  %v984_v57 = vpop.f32.mrb[5].mxu1 }
 0x1e1   : > { %v985_v59 = vadd.f32 %v984_v57, %v3825_v36  ;;  %v3004_v60 = vpop.f32.mrb[6].mxu1  ;;  %3077 = vmatprep.mubr.bf16.mxu0 %v1304_v54 }
 0x1e2   : > { %v996_v61 = vadd.f32 %v3004_v60, %v3825_v36  ;;  %v987_v62 = vpop.f32.mrb[7].mxu1  ;;  %3078 = vmatmul.mubr.bf16.vlgmr.msra.gmra.mrb[64].mxu0 %v1305_v53  ;;  %v1229_v0 = vmax.f32 %v993_v56, 0.0 }
 0x1e3   : > { %v988_v63 = vadd.f32 %v987_v62, %v3825_v36  ;;  %3142 = vmatpush3.bf16.msra.mxu0 %v3297_v34  ;;  %v1227_v3 = vmax.f32 %v985_v59, 0.0 }
 0x1e4   : > { %v1230_v1 = vmax.f32 %v996_v61, 0.0  ;;  %3143 = vmatprep.subr.bf16.mxu0 %v3298_v50 }
 0x1e5   : > { %v1228_v4 = vmax.f32 %v988_v63, 0.0 }
 0x1e6   : > { %v1307_v5 = vpack.c.bf16 %v1230_v1, %v1229_v0 }
 0x1e7   : > { %v1306_v6 = vpack.c.bf16 %v1228_v4, %v1227_v3  ;;  %v3007_v7 = vpop.f32.mrb[8].mxu1  ;;  %3144 = vmatpush3.bf16.msra.mxu0 %v3298_v50 }
 0x1e8   : > { %v1009_v8 = vadd.f32 %v3007_v7, %v3825_v36  ;;  %v1000_v9 = vpop.f32.mrb[9].mxu1  ;;  %3145 = vmatprep.subr.bf16.mxu0 %v3299_v48 }
 0x1e9   : > { %v1001_v11 = vadd.f32 %v1000_v9, %v3825_v36  ;;  %v3008_v12 = vpop.f32.mrb[10].mxu1  ;;  %3081 = vmatprep.mubr.bf16.mxu0 %v1306_v6 }
 0x1ea   : > { %v1012_v13 = vadd.f32 %v3008_v12, %v3825_v36  ;;  %v1003_v14 = vpop.f32.mrb[11].mxu1  ;;  %3082 = vmatmul.mubr.bf16.gmra.mrb[68].mxu0 %v1307_v5  ;;  %v1233_v16 = vmax.f32 %v1009_v8, 0.0 }
 0x1eb   : > { %v1004_v15 = vadd.f32 %v1003_v14, %v3825_v36  ;;  %3146 = vmatpush3.bf16.msra.mxu0 %v3299_v48  ;;  %v1231_v19 = vmax.f32 %v1001_v11, 0.0 }
 0x1ec   : > { %v1234_v17 = vmax.f32 %v1012_v13, 0.0  ;;  %3147 = vmatprep.subr.bf16.mxu0 %v3300_v49 }
 0x1ed   : > { %v1232_v20 = vmax.f32 %v1004_v15, 0.0 }
 0x1ee   : > { %v1309_v21 = vpack.c.bf16 %v1234_v17, %v1233_v16 }
 0x1ef   : > { %v1308_v22 = vpack.c.bf16 %v1232_v20, %v1231_v19  ;;  %v3011_v23 = vpop.f32.mrb[12].mxu1  ;;  %3148 = vmatpush3.bf16.msra.mxu0 %v3300_v49 }
 0x1f0   : > { %v1025_v24 = vadd.f32 %v3011_v23, %v3825_v36  ;;  %v1016_v25 = vpop.f32.mrb[13].mxu1  ;;  %3149 = vmatprep.subr.bf16.mxu0 %v3301_v58 }
 0x1f1   : > { %v1017_v26 = vadd.f32 %v1016_v25, %v3825_v36  ;;  %v3012_v27 = vpop.f32.mrb[14].mxu1  ;;  %3085 = vmatprep.mubr.bf16.mxu0 %v1308_v22 }
 0x1f2   : > { %v1028_v28 = vadd.f32 %v3012_v27, %v3825_v36  ;;  %v1019_v29 = vpop.f32.mrb[15].mxu1  ;;  %3086 = vmatmul.mubr.bf16.gmra.mrb[72].mxu0 %v1309_v21  ;;  %v1237_v31 = vmax.f32 %v1025_v24, 0.0 }
 0x1f3   : > { %v1020_v30 = vadd.f32 %v1019_v29, %v3825_v36  ;;  %3150 = vmatpush3.bf16.msra.mxu0 %v3301_v58  ;;  %v1235_v33 = vmax.f32 %v1017_v26, 0.0 }
 0x1f4   : > { %v1238_v32 = vmax.f32 %v1028_v28, 0.0  ;;  %3151 = vmatprep.subr.bf16.mxu0 %v3302_v2 }
 0x1f5   : > { %v1236_v34 = vmax.f32 %v1020_v30, 0.0 }
 0x1f6   : > { %v1311_v35 = vpack.c.bf16 %v1238_v32, %v1237_v31 }
 0x1f7   : > { %v1310_v50 = vpack.c.bf16 %v1236_v34, %v1235_v33  ;;  %v3015_v37 = vpop.f32.mrb[16].mxu1  ;;  %3152 = vmatpush3.bf16.msra.mxu0 %v3302_v2 }
 0x1f8   : > { %v1041_v38 = vadd.f32 %v3015_v37, %v3825_v36  ;;  %v1032_v39 = vpop.f32.mrb[17].mxu1  ;;  %3153 = vmatprep.subr.bf16.mxu0 %v3303_v10 }
 0x1f9   : > { %v1033_v40 = vadd.f32 %v1032_v39, %v3825_v36  ;;  %v3016_v41 = vpop.f32.mrb[18].mxu1  ;;  %3089 = vmatprep.mubr.bf16.mxu0 %v1310_v50 }
 0x1fa   : > { %v1044_v42 = vadd.f32 %v3016_v41, %v3825_v36  ;;  %v1035_v43 = vpop.f32.mrb[19].mxu1  ;;  %3090 = vmatmul.mubr.bf16.gmra.mrb[76].mxu0 %v1311_v35  ;;  %v1241_v44 = vmax.f32 %v1041_v38, 0.0 }
 0x1fb   : > { %v1036_v48 = vadd.f32 %v1035_v43, %v3825_v36  ;;  %3154 = vmatpush3.bf16.msra.mxu0 %v3303_v10  ;;  %v1239_v47 = vmax.f32 %v1033_v40, 0.0 }
 0x1fc   : > { %v1242_v45 = vmax.f32 %v1044_v42, 0.0  ;;  %3155 = vmatprep.subr.bf16.mxu0 %v3304_v18 }
 0x1fd   : > { %v1240_v49 = vmax.f32 %v1036_v48, 0.0 }
 0x1fe   : > { %v1313_v51 = vpack.c.bf16 %v1242_v45, %v1241_v44 }
 0x1ff   : > { %v1312_v52 = vpack.c.bf16 %v1240_v49, %v1239_v47  ;;  %v3019_v53 = vpop.f32.mrb[20].mxu1  ;;  %3156 = vmatpush3.bf16.msra.mxu0 %v3304_v18 }
 0x200   : > { %v1057_v54 = vadd.f32 %v3019_v53, %v3825_v36  ;;  %v1048_v55 = vpop.f32.mrb[21].mxu1 }
 0x201   : > { %v1049_v56 = vadd.f32 %v1048_v55, %v3825_v36  ;;  %v3020_v57 = vpop.f32.mrb[22].mxu1  ;;  %3093 = vmatprep.mubr.bf16.mxu0 %v1312_v52 }
 0x202   : > { %v1060_v58 = vadd.f32 %v3020_v57, %v3825_v36  ;;  %v1051_v59 = vpop.f32.mrb[23].mxu1  ;;  %3094 = vmatmul.mubr.bf16.gmra.mrb[80].mxu0 %v1313_v51  ;;  %v1245_v61 = vmax.f32 %v1057_v54, 0.0 }
 0x203   : > { %v1052_v60 = vadd.f32 %v1051_v59, %v3825_v36  ;;  %v1243_v63 = vmax.f32 %v1049_v56, 0.0 }
 0x204   : > { %v1246_v62 = vmax.f32 %v1060_v58, 0.0 }
 0x205   : > { %v1244_v0 = vmax.f32 %v1052_v60, 0.0 }
 0x206   : > { %v1315_v1 = vpack.c.bf16 %v1246_v62, %v1245_v61 }
 0x207   : > { %v1314_v2 = vpack.c.bf16 %v1244_v0, %v1243_v63  ;;  %v3023_v3 = vpop.f32.mrb[24].mxu1 }
 0x208   : > { %v1073_v4 = vadd.f32 %v3023_v3, %v3825_v36  ;;  %v1064_v5 = vpop.f32.mrb[25].mxu1 }
 0x209   : > { %v1065_v6 = vadd.f32 %v1064_v5, %v3825_v36  ;;  %v3024_v7 = vpop.f32.mrb[26].mxu1  ;;  %3097 = vmatprep.mubr.bf16.mxu0 %v1314_v2 }
 0x20a   : > { %v1076_v8 = vadd.f32 %v3024_v7, %v3825_v36  ;;  %v1067_v9 = vpop.f32.mrb[27].mxu1  ;;  %3098 = vmatmul.mubr.bf16.gmra.mrb[84].mxu0 %v1315_v1  ;;  %v1249_v11 = vmax.f32 %v1073_v4, 0.0 }
 0x20b   : > { %v1068_v10 = vadd.f32 %v1067_v9, %v3825_v36  ;;  %v1247_v13 = vmax.f32 %v1065_v6, 0.0 }
 0x20c   : > { %v1250_v12 = vmax.f32 %v1076_v8, 0.0 }
 0x20d   : > { %v1248_v14 = vmax.f32 %v1068_v10, 0.0 }
 0x20e   : > { %v1317_v15 = vpack.c.bf16 %v1250_v12, %v1249_v11 }
 0x20f   : > { %v1316_v16 = vpack.c.bf16 %v1248_v14, %v1247_v13  ;;  %v3027_v17 = vpop.f32.mrb[28].mxu1 }
 0x210   : > { %v1089_v18 = vadd.f32 %v3027_v17, %v3825_v36  ;;  %v1080_v19 = vpop.f32.mrb[29].mxu1 }
 0x211   : > { %v1081_v20 = vadd.f32 %v1080_v19, %v3825_v36  ;;  %v3028_v21 = vpop.f32.mrb[30].mxu1  ;;  %3101 = vmatprep.mubr.bf16.mxu0 %v1316_v16 }
 0x212   : > { %v1092_v22 = vadd.f32 %v3028_v21, %v3825_v36  ;;  %v1083_v23 = vpop.f32.mrb[31].mxu1  ;;  %3102 = vmatmul.mubr.bf16.gmra.mrb[88].mxu0 %v1317_v15  ;;  %v1253_v25 = vmax.f32 %v1089_v18, 0.0 }
 0x213   : > { %v1084_v24 = vadd.f32 %v1083_v23, %v3825_v36  ;;  %v1251_v27 = vmax.f32 %v1081_v20, 0.0 }
 0x214   : > { %v1254_v26 = vmax.f32 %v1092_v22, 0.0 }
 0x215   : > { %v1252_v28 = vmax.f32 %v1084_v24, 0.0 }
 0x216   : > { %v1319_v29 = vpack.c.bf16 %v1254_v26, %v1253_v25 }
 0x217   : > { %v1318_v30 = vpack.c.bf16 %v1252_v28, %v1251_v27  ;;  %v3031_v31 = vpop.f32.mrb[32].mxu1 }
 0x218   : > { %v1105_v32 = vadd.f32 %v3031_v31, %v3825_v36  ;;  %v1096_v33 = vpop.f32.mrb[33].mxu1 }
 0x219   : > { %v1097_v34 = vadd.f32 %v1096_v33, %v3825_v36  ;;  %v3032_v35 = vpop.f32.mrb[34].mxu1  ;;  %3105 = vmatprep.mubr.bf16.mxu0 %v1318_v30 }
 0x21a   : > { %v1108_v50 = vadd.f32 %v3032_v35, %v3825_v36  ;;  %v1099_v37 = vpop.f32.mrb[35].mxu1  ;;  %3106 = vmatmul.mubr.bf16.gmra.mrb[92].mxu0 %v1319_v29  ;;  %v1257_v39 = vmax.f32 %v1105_v32, 0.0 }
 0x21b   : > { %v1100_v38 = vadd.f32 %v1099_v37, %v3825_v36  ;;  %v1255_v41 = vmax.f32 %v1097_v34, 0.0 }
 0x21c   : > { %v1258_v40 = vmax.f32 %v1108_v50, 0.0 }
 0x21d   : > { %v1256_v42 = vmax.f32 %v1100_v38, 0.0 }
 0x21e   : > { %v1321_v43 = vpack.c.bf16 %v1258_v40, %v1257_v39 }
 0x21f   : > { %v1320_v48 = vpack.c.bf16 %v1256_v42, %v1255_v41  ;;  %v3035_v44 = vpop.f32.mrb[36].mxu1 }
 0x220   : > { %v1121_v45 = vadd.f32 %v3035_v44, %v3825_v36  ;;  %v1112_v47 = vpop.f32.mrb[37].mxu1 }
 0x221   : > { %v1113_v49 = vadd.f32 %v1112_v47, %v3825_v36  ;;  %v3036_v51 = vpop.f32.mrb[38].mxu1  ;;  %3109 = vmatprep.mubr.bf16.mxu0 %v1320_v48 }
 0x222   : > { %v1124_v52 = vadd.f32 %v3036_v51, %v3825_v36  ;;  %v1115_v53 = vpop.f32.mrb[39].mxu1  ;;  %3110 = vmatmul.mubr.bf16.gmra.mrb[96].mxu0 %v1321_v43  ;;  %v1261_v55 = vmax.f32 %v1121_v45, 0.0 }
 0x223   : > { %v1116_v54 = vadd.f32 %v1115_v53, %v3825_v36  ;;  %v1259_v57 = vmax.f32 %v1113_v49, 0.0 }
 0x224   : > { %v1262_v56 = vmax.f32 %v1124_v52, 0.0 }
 0x225   : > { %v1260_v58 = vmax.f32 %v1116_v54, 0.0 }
 0x226   : > { %v1323_v59 = vpack.c.bf16 %v1262_v56, %v1261_v55 }
 0x227   : > { %v1322_v60 = vpack.c.bf16 %v1260_v58, %v1259_v57  ;;  %v3039_v61 = vpop.f32.mrb[40].mxu1 }
 0x228   : > { %v1137_v62 = vadd.f32 %v3039_v61, %v3825_v36  ;;  %v1128_v63 = vpop.f32.mrb[41].mxu1 }
 0x229   : > { %v1129_v0 = vadd.f32 %v1128_v63, %v3825_v36  ;;  %v3040_v1 = vpop.f32.mrb[42].mxu1  ;;  %3113 = vmatprep.mubr.bf16.mxu0 %v1322_v60 }
 0x22a   : > { %v1140_v2 = vadd.f32 %v3040_v1, %v3825_v36  ;;  %v1131_v3 = vpop.f32.mrb[43].mxu1  ;;  %3114 = vmatmul.mubr.bf16.gmra.mrb[100].mxu0 %v1323_v59  ;;  %v1265_v5 = vmax.f32 %v1137_v62, 0.0 }
 0x22b   : > { %v1132_v4 = vadd.f32 %v1131_v3, %v3825_v36  ;;  %v1263_v7 = vmax.f32 %v1129_v0, 0.0 }
 0x22c   : > { %v1266_v6 = vmax.f32 %v1140_v2, 0.0 }
 0x22d   : > { %v1264_v8 = vmax.f32 %v1132_v4, 0.0 }
 0x22e   : > { %v1325_v9 = vpack.c.bf16 %v1266_v6, %v1265_v5 }
 0x22f   : > { %v1324_v10 = vpack.c.bf16 %v1264_v8, %v1263_v7  ;;  %v3043_v11 = vpop.f32.mrb[44].mxu1 }
 0x230   : > { %v1153_v12 = vadd.f32 %v3043_v11, %v3825_v36  ;;  %v1144_v13 = vpop.f32.mrb[45].mxu1 }
 0x231   : > { %v1145_v14 = vadd.f32 %v1144_v13, %v3825_v36  ;;  %v3044_v15 = vpop.f32.mrb[46].mxu1  ;;  %3117 = vmatprep.mubr.bf16.mxu0 %v1324_v10 }
 0x232   : > { %v1156_v16 = vadd.f32 %v3044_v15, %v3825_v36  ;;  %v1147_v17 = vpop.f32.mrb[47].mxu1  ;;  %3118 = vmatmul.mubr.bf16.gmra.mrb[104].mxu0 %v1325_v9  ;;  %v1269_v19 = vmax.f32 %v1153_v12, 0.0 }
 0x233   : > { %v1148_v18 = vadd.f32 %v1147_v17, %v3825_v36  ;;  %v1267_v21 = vmax.f32 %v1145_v14, 0.0 }
 0x234   : > { %v1270_v20 = vmax.f32 %v1156_v16, 0.0 }
 0x235   : > { %v1268_v22 = vmax.f32 %v1148_v18, 0.0 }
 0x236   : > { %v1327_v23 = vpack.c.bf16 %v1270_v20, %v1269_v19  ;;  %v1338_v19 = vsub.s32 2, %v3724_v46  ;;  %v3916_v20 = vld [vmem:[%s4506_s1] sm:$0xf] }
 0x237   : > { %v1326_v24 = vpack.c.bf16 %v1268_v22, %v1267_v21  ;;  %v3047_v25 = vpop.f32.mrb[48].mxu1 }
 0x238   : > { %v1169_v26 = vadd.f32 %v3047_v25, %v3825_v36  ;;  %v1160_v27 = vpop.f32.mrb[49].mxu1  ;;  %v3919_v21 = vrot.slane %v3916_v20, %v1338_v19 }
 0x239   : > { %v1161_v28 = vadd.f32 %v1160_v27, %v3825_v36  ;;  %v3048_v29 = vpop.f32.mrb[50].mxu1  ;;  %3121 = vmatprep.mubr.bf16.mxu0 %v1326_v24 }
 0x23a   : > { %v1172_v30 = vadd.f32 %v3048_v29, %v3825_v36  ;;  %v1163_v31 = vpop.f32.mrb[51].mxu1  ;;  %3122 = vmatmul.mubr.bf16.gmra.mrb[108].mxu0 %v1327_v23  ;;  %v1273_v33 = vmax.f32 %v1169_v26, 0.0 }
 0x23b   : > { %v1164_v32 = vadd.f32 %v1163_v31, %v3825_v36  ;;  %v1271_v35 = vmax.f32 %v1161_v28, 0.0 }
 0x23c   : > { %v1274_v34 = vmax.f32 %v1172_v30, 0.0 }
 0x23d   : > { %v1272_v50 = vmax.f32 %v1164_v32, 0.0 }
 0x23e   : > { %v1329_v37 = vpack.c.bf16 %v1274_v34, %v1273_v33 }
 0x23f   : > { %v1328_v38 = vpack.c.bf16 %v1272_v50, %v1271_v35  ;;  %v3051_v39 = vpop.f32.mrb[52].mxu1 }
 0x240   : > { %v1185_v40 = vadd.f32 %v3051_v39, %v3825_v36  ;;  %v1176_v41 = vpop.f32.mrb[53].mxu1 }
 0x241   : > { %v1177_v42 = vadd.f32 %v1176_v41, %v3825_v36  ;;  %v3052_v43 = vpop.f32.mrb[54].mxu1  ;;  %3125 = vmatprep.mubr.bf16.mxu0 %v1328_v38 }
 0x242   : > { %v1188_v48 = vadd.f32 %v3052_v43, %v3825_v36  ;;  %v1179_v44 = vpop.f32.mrb[55].mxu1  ;;  %3126 = vmatmul.mubr.bf16.gmra.mrb[112].mxu0 %v1329_v37  ;;  %v1277_v47 = vmax.f32 %v1185_v40, 0.0 }
 0x243   : > { %v1180_v45 = vadd.f32 %v1179_v44, %v3825_v36  ;;  %v1275_v51 = vmax.f32 %v1177_v42, 0.0 }
 0x244   : > { %v1278_v49 = vmax.f32 %v1188_v48, 0.0 }
 0x245   : > { %v1276_v52 = vmax.f32 %v1180_v45, 0.0 }
 0x246   : > { %v1331_v53 = vpack.c.bf16 %v1278_v49, %v1277_v47 }
 0x247   : > { %v1330_v54 = vpack.c.bf16 %v1276_v52, %v1275_v51  ;;  %v3055_v55 = vpop.f32.mrb[56].mxu1 }
 0x248   : > { %v1201_v56 = vadd.f32 %v3055_v55, %v3825_v36  ;;  %v1192_v57 = vpop.f32.mrb[57].mxu1 }
 0x249   : > { %v1193_v58 = vadd.f32 %v1192_v57, %v3825_v36  ;;  %v3056_v59 = vpop.f32.mrb[58].mxu1  ;;  %3129 = vmatprep.mubr.bf16.mxu0 %v1330_v54 }
 0x24a   : > { %v1204_v60 = vadd.f32 %v3056_v59, %v3825_v36  ;;  %v1195_v61 = vpop.f32.mrb[59].mxu1  ;;  %3130 = vmatmul.mubr.bf16.gmra.mrb[116].mxu0 %v1331_v53  ;;  %v1281_v63 = vmax.f32 %v1201_v56, 0.0 }
 0x24b   : > { %v1196_v62 = vadd.f32 %v1195_v61, %v3825_v36  ;;  %v1279_v1 = vmax.f32 %v1193_v58, 0.0 }
 0x24c   : > { %v1282_v0 = vmax.f32 %v1204_v60, 0.0 }
 0x24d   : > { %v1280_v2 = vmax.f32 %v1196_v62, 0.0 }
 0x24e   : > { %v1333_v3 = vpack.c.bf16 %v1282_v0, %v1281_v63 }
 0x24f   : > { %v1332_v4 = vpack.c.bf16 %v1280_v2, %v1279_v1  ;;  %v3059_v5 = vpop.f32.mrb[60].mxu1 }
 0x250   : > { %v1217_v6 = vadd.f32 %v3059_v5, %v3825_v36  ;;  %v1208_v7 = vpop.f32.mrb[61].mxu1 }
 0x251   : > { %v1209_v8 = vadd.f32 %v1208_v7, %v3825_v36  ;;  %v3060_v9 = vpop.f32.mrb[62].mxu1  ;;  %3133 = vmatprep.mubr.bf16.mxu0 %v1332_v4 }
 0x252   : > { %v1220_v10 = vadd.f32 %v3060_v9, %v3825_v36  ;;  %v1211_v11 = vpop.f32.mrb[63].mxu1  ;;  %3134 = vmatmul.mubr.bf16.gmra.mrb[120].mxu0 %v1333_v3  ;;  %v1285_v13 = vmax.f32 %v1217_v6, 0.0 }
 0x253   : > { %v1212_v12 = vadd.f32 %v1211_v11, %v3825_v36  ;;  %v1283_v15 = vmax.f32 %v1209_v8, 0.0 }
 0x254   : > { %v1286_v14 = vmax.f32 %v1220_v10, 0.0 }
 0x255   : > { %v1284_v16 = vmax.f32 %v1212_v12, 0.0 }
 0x256   : > { %v1335_v17 = vpack.c.bf16 %v1286_v14, %v1285_v13 }
 0x257   : > { %v1334_v18 = vpack.c.bf16 %v1284_v16, %v1283_v15 }
 0x259   : > { %3137 = vmatprep.mubr.bf16.mxu0 %v1334_v18 }
 0x25a   : > { %3138 = vmatmul.mubr.bf16.gmra.mrb[124].mxu0 %v1335_v17 }
 0x2b5   : > { %v3079_v22 = vpop.f32.mrb[64].mxu0 }
 0x2b6   : > { %v1431_v36 = vadd.f32 %v3079_v22, %v3919_v21  ;;  %v1422_v23 = vpop.f32.mrb[65].mxu0 }
 0x2b7   : > { %v1423_v24 = vadd.f32 %v1422_v23, %v3919_v21  ;;  %v3080_v25 = vpop.f32.mrb[66].mxu0 }
 0x2b8   : > { %v1434_v26 = vadd.f32 %v3080_v25, %v3919_v21  ;;  %v1425_v27 = vpop.f32.mrb[67].mxu0  ;;  %v1679_v29 = vmax.f32 %v1431_v36, 0.0 }
 0x2b9   : > { %v1426_v28 = vadd.f32 %v1425_v27, %v3919_v21  ;;  %v1677_v31 = vmax.f32 %v1423_v24, 0.0 }
 0x2ba   : > { %v1680_v30 = vmax.f32 %v1434_v26, 0.0 }
 0x2bb   : > { %v1678_v32 = vmax.f32 %v1426_v28, 0.0 }
 0x2bc   : > { %v1758_v33 = vpack.c.bf16 %v1680_v30, %v1679_v29 }
 0x2bd   : > { %v1757_v34 = vpack.c.bf16 %v1678_v32, %v1677_v31  ;;  %v3083_v35 = vpop.f32.mrb[68].mxu0 }
 0x2be   : > { %v1447_v50 = vadd.f32 %v3083_v35, %v3919_v21  ;;  %v1438_v37 = vpop.f32.mrb[69].mxu0 }
 0x2bf   : > { %v1439_v38 = vadd.f32 %v1438_v37, %v3919_v21  ;;  %v3084_v39 = vpop.f32.mrb[70].mxu0  ;;  %3157 = vmatprep.mubr.bf16.mxu0 %v1757_v34 }
 0x2c0   : > { %v1450_v40 = vadd.f32 %v3084_v39, %v3919_v21  ;;  %v1441_v41 = vpop.f32.mrb[71].mxu0  ;;  %3158 = vmatmul.mubr.bf16.vlgmr.msra.gmra.mrb[128].mxu0 %v1758_v33  ;;  %v1683_v43 = vmax.f32 %v1447_v50, 0.0 }
 0x2c1   : > { %v1442_v42 = vadd.f32 %v1441_v41, %v3919_v21  ;;  %v1681_v44 = vmax.f32 %v1439_v38, 0.0 }
 0x2c2   : > { %v1684_v48 = vmax.f32 %v1450_v40, 0.0 }
 0x2c3   : > { %v1682_v45 = vmax.f32 %v1442_v42, 0.0 }
 0x2c4   : > { %v1760_v47 = vpack.c.bf16 %v1684_v48, %v1683_v43 }
 0x2c5   : > { %v1759_v49 = vpack.c.bf16 %v1682_v45, %v1681_v44  ;;  %v3087_v51 = vpop.f32.mrb[72].mxu0 }
 0x2c6   : > { %v1463_v52 = vadd.f32 %v3087_v51, %v3919_v21  ;;  %v1454_v53 = vpop.f32.mrb[73].mxu0 }
 0x2c7   : > { %v1455_v54 = vadd.f32 %v1454_v53, %v3919_v21  ;;  %v3088_v55 = vpop.f32.mrb[74].mxu0  ;;  %3161 = vmatprep.mubr.bf16.mxu1 %v1759_v49 }
 0x2c8   : > { %v1466_v56 = vadd.f32 %v3088_v55, %v3919_v21  ;;  %v1457_v57 = vpop.f32.mrb[75].mxu0  ;;  %3162 = vmatmul.mubr.bf16.vlgmr.msra.gmra.mrb[64].mxu1 %v1760_v47  ;;  %v1687_v59 = vmax.f32 %v1463_v52, 0.0 }
 0x2c9   : > { %v1458_v58 = vadd.f32 %v1457_v57, %v3919_v21  ;;  %v1685_v61 = vmax.f32 %v1455_v54, 0.0 }
 0x2ca   : > { %v1688_v60 = vmax.f32 %v1466_v56, 0.0 }
 0x2cb   : > { %v1686_v62 = vmax.f32 %v1458_v58, 0.0 }
 0x2cc   : > { %v1762_v63 = vpack.c.bf16 %v1688_v60, %v1687_v59 }
 0x2cd   : > { %v1761_v0 = vpack.c.bf16 %v1686_v62, %v1685_v61  ;;  %v3091_v1 = vpop.f32.mrb[76].mxu0 }
 0x2ce   : > { %v1479_v2 = vadd.f32 %v3091_v1, %v3919_v21  ;;  %v1470_v3 = vpop.f32.mrb[77].mxu0 }
 0x2cf   : > { %v1471_v4 = vadd.f32 %v1470_v3, %v3919_v21  ;;  %v3092_v5 = vpop.f32.mrb[78].mxu0  ;;  %3165 = vmatprep.mubr.bf16.mxu1 %v1761_v0 }
 0x2d0   : > { %v1482_v6 = vadd.f32 %v3092_v5, %v3919_v21  ;;  %v1473_v7 = vpop.f32.mrb[79].mxu0  ;;  %3166 = vmatmul.mubr.bf16.gmra.mrb[68].mxu1 %v1762_v63  ;;  %v1691_v9 = vmax.f32 %v1479_v2, 0.0 }
 0x2d1   : > { %v1474_v8 = vadd.f32 %v1473_v7, %v3919_v21  ;;  %v1689_v11 = vmax.f32 %v1471_v4, 0.0 }
 0x2d2   : > { %v1692_v10 = vmax.f32 %v1482_v6, 0.0 }
 0x2d3   : > { %v1690_v12 = vmax.f32 %v1474_v8, 0.0 }
 0x2d4   : > { %v1764_v13 = vpack.c.bf16 %v1692_v10, %v1691_v9 }
 0x2d5   : > { %v1763_v14 = vpack.c.bf16 %v1690_v12, %v1689_v11  ;;  %v3095_v15 = vpop.f32.mrb[80].mxu0 }
 0x2d6   : > { %v1495_v16 = vadd.f32 %v3095_v15, %v3919_v21  ;;  %v1486_v17 = vpop.f32.mrb[81].mxu0 }
 0x2d7   : > { %v1487_v18 = vadd.f32 %v1486_v17, %v3919_v21  ;;  %v3096_v19 = vpop.f32.mrb[82].mxu0  ;;  %3169 = vmatprep.mubr.bf16.mxu1 %v1763_v14 }
 0x2d8   : > { %v1498_v22 = vadd.f32 %v3096_v19, %v3919_v21  ;;  %v1489_v36 = vpop.f32.mrb[83].mxu0  ;;  %3170 = vmatmul.mubr.bf16.gmra.mrb[72].mxu1 %v1764_v13  ;;  %v1695_v24 = vmax.f32 %v1495_v16, 0.0 }
 0x2d9   : > { %v1490_v23 = vadd.f32 %v1489_v36, %v3919_v21  ;;  %v1693_v26 = vmax.f32 %v1487_v18, 0.0 }
 0x2da   : > { %v1696_v25 = vmax.f32 %v1498_v22, 0.0 }
 0x2db   : > { %v1694_v27 = vmax.f32 %v1490_v23, 0.0 }
 0x2dc   : > { %v1766_v28 = vpack.c.bf16 %v1696_v25, %v1695_v24 }
 0x2dd   : > { %v1765_v29 = vpack.c.bf16 %v1694_v27, %v1693_v26  ;;  %v3099_v30 = vpop.f32.mrb[84].mxu0 }
 0x2de   : > { %v1511_v31 = vadd.f32 %v3099_v30, %v3919_v21  ;;  %v1502_v32 = vpop.f32.mrb[85].mxu0 }
 0x2df   : > { %v1503_v33 = vadd.f32 %v1502_v32, %v3919_v21  ;;  %v3100_v34 = vpop.f32.mrb[86].mxu0  ;;  %3173 = vmatprep.mubr.bf16.mxu1 %v1765_v29 }
 0x2e0   : > { %v1514_v35 = vadd.f32 %v3100_v34, %v3919_v21  ;;  %v1505_v50 = vpop.f32.mrb[87].mxu0  ;;  %3174 = vmatmul.mubr.bf16.gmra.mrb[76].mxu1 %v1766_v28  ;;  %v1699_v38 = vmax.f32 %v1511_v31, 0.0 }
 0x2e1   : > { %v1506_v37 = vadd.f32 %v1505_v50, %v3919_v21  ;;  %v1697_v40 = vmax.f32 %v1503_v33, 0.0 }
 0x2e2   : > { %v1700_v39 = vmax.f32 %v1514_v35, 0.0 }
 0x2e3   : > { %v1698_v41 = vmax.f32 %v1506_v37, 0.0 }
 0x2e4   : > { %v1768_v42 = vpack.c.bf16 %v1700_v39, %v1699_v38 }
 0x2e5   : > { %v1767_v43 = vpack.c.bf16 %v1698_v41, %v1697_v40  ;;  %v3103_v48 = vpop.f32.mrb[88].mxu0 }
 0x2e6   : > { %v1527_v44 = vadd.f32 %v3103_v48, %v3919_v21  ;;  %v1518_v45 = vpop.f32.mrb[89].mxu0 }
 0x2e7   : > { %v1519_v47 = vadd.f32 %v1518_v45, %v3919_v21  ;;  %v3104_v49 = vpop.f32.mrb[90].mxu0  ;;  %3177 = vmatprep.mubr.bf16.mxu1 %v1767_v43 }
 0x2e8   : > { %v1530_v51 = vadd.f32 %v3104_v49, %v3919_v21  ;;  %v1521_v52 = vpop.f32.mrb[91].mxu0  ;;  %3178 = vmatmul.mubr.bf16.gmra.mrb[80].mxu1 %v1768_v42  ;;  %v1703_v54 = vmax.f32 %v1527_v44, 0.0 }
 0x2e9   : > { %v1522_v53 = vadd.f32 %v1521_v52, %v3919_v21  ;;  %v1701_v56 = vmax.f32 %v1519_v47, 0.0 }
 0x2ea   : > { %v1704_v55 = vmax.f32 %v1530_v51, 0.0 }
 0x2eb   : > { %v1702_v57 = vmax.f32 %v1522_v53, 0.0 }
 0x2ec   : > { %v1770_v58 = vpack.c.bf16 %v1704_v55, %v1703_v54 }
 0x2ed   : > { %v1769_v59 = vpack.c.bf16 %v1702_v57, %v1701_v56  ;;  %v3107_v60 = vpop.f32.mrb[92].mxu0 }
 0x2ee   : > { %v1543_v61 = vadd.f32 %v3107_v60, %v3919_v21  ;;  %v1534_v62 = vpop.f32.mrb[93].mxu0 }
 0x2ef   : > { %v1535_v63 = vadd.f32 %v1534_v62, %v3919_v21  ;;  %v3108_v0 = vpop.f32.mrb[94].mxu0  ;;  %3181 = vmatprep.mubr.bf16.mxu1 %v1769_v59 }
 0x2f0   : > { %v1546_v1 = vadd.f32 %v3108_v0, %v3919_v21  ;;  %v1537_v2 = vpop.f32.mrb[95].mxu0  ;;  %3182 = vmatmul.mubr.bf16.gmra.mrb[84].mxu1 %v1770_v58  ;;  %v1707_v4 = vmax.f32 %v1543_v61, 0.0 }
 0x2f1   : > { %v1538_v3 = vadd.f32 %v1537_v2, %v3919_v21  ;;  %v1705_v6 = vmax.f32 %v1535_v63, 0.0 }
 0x2f2   : > { %v1708_v5 = vmax.f32 %v1546_v1, 0.0 }
 0x2f3   : > { %v1706_v7 = vmax.f32 %v1538_v3, 0.0 }
 0x2f4   : > { %v1772_v8 = vpack.c.bf16 %v1708_v5, %v1707_v4 }
 0x2f5   : > { %v1771_v9 = vpack.c.bf16 %v1706_v7, %v1705_v6  ;;  %v3111_v10 = vpop.f32.mrb[96].mxu0 }
 0x2f6   : > { %v1559_v11 = vadd.f32 %v3111_v10, %v3919_v21  ;;  %v1550_v12 = vpop.f32.mrb[97].mxu0 }
 0x2f7   : > { %v1551_v13 = vadd.f32 %v1550_v12, %v3919_v21  ;;  %v3112_v14 = vpop.f32.mrb[98].mxu0  ;;  %3185 = vmatprep.mubr.bf16.mxu1 %v1771_v9 }
 0x2f8   : > { %v1562_v15 = vadd.f32 %v3112_v14, %v3919_v21  ;;  %v1553_v16 = vpop.f32.mrb[99].mxu0  ;;  %3186 = vmatmul.mubr.bf16.gmra.mrb[88].mxu1 %v1772_v8  ;;  %v1711_v18 = vmax.f32 %v1559_v11, 0.0 }
 0x2f9   : > { %v1554_v17 = vadd.f32 %v1553_v16, %v3919_v21  ;;  %v1709_v22 = vmax.f32 %v1551_v13, 0.0 }
 0x2fa   : > { %v1712_v19 = vmax.f32 %v1562_v15, 0.0 }
 0x2fb   : > { %v1710_v36 = vmax.f32 %v1554_v17, 0.0 }
 0x2fc   : > { %v1774_v23 = vpack.c.bf16 %v1712_v19, %v1711_v18 }
 0x2fd   : > { %v1773_v24 = vpack.c.bf16 %v1710_v36, %v1709_v22  ;;  %v3115_v25 = vpop.f32.mrb[100].mxu0 }
 0x2fe   : > { %v1575_v26 = vadd.f32 %v3115_v25, %v3919_v21  ;;  %v1566_v27 = vpop.f32.mrb[101].mxu0 }
 0x2ff   : > { %v1567_v28 = vadd.f32 %v1566_v27, %v3919_v21  ;;  %v3116_v29 = vpop.f32.mrb[102].mxu0  ;;  %3189 = vmatprep.mubr.bf16.mxu1 %v1773_v24 }
 0x300   : > { %v1578_v30 = vadd.f32 %v3116_v29, %v3919_v21  ;;  %v1569_v31 = vpop.f32.mrb[103].mxu0  ;;  %3190 = vmatmul.mubr.bf16.gmra.mrb[92].mxu1 %v1774_v23  ;;  %v1715_v33 = vmax.f32 %v1575_v26, 0.0 }
 0x301   : > { %v1570_v32 = vadd.f32 %v1569_v31, %v3919_v21  ;;  %v1713_v35 = vmax.f32 %v1567_v28, 0.0 }
 0x302   : > { %v1716_v34 = vmax.f32 %v1578_v30, 0.0 }
 0x303   : > { %v1714_v50 = vmax.f32 %v1570_v32, 0.0 }
 0x304   : > { %v1776_v37 = vpack.c.bf16 %v1716_v34, %v1715_v33 }
 0x305   : > { %v1775_v38 = vpack.c.bf16 %v1714_v50, %v1713_v35  ;;  %v3119_v39 = vpop.f32.mrb[104].mxu0 }
 0x306   : > { %v1591_v40 = vadd.f32 %v3119_v39, %v3919_v21  ;;  %v1582_v41 = vpop.f32.mrb[105].mxu0 }
 0x307   : > { %v1583_v42 = vadd.f32 %v1582_v41, %v3919_v21  ;;  %v3120_v43 = vpop.f32.mrb[106].mxu0  ;;  %3193 = vmatprep.mubr.bf16.mxu1 %v1775_v38 }
 0x308   : > { %v1594_v48 = vadd.f32 %v3120_v43, %v3919_v21  ;;  %v1585_v44 = vpop.f32.mrb[107].mxu0  ;;  %3194 = vmatmul.mubr.bf16.gmra.mrb[96].mxu1 %v1776_v37  ;;  %v1719_v47 = vmax.f32 %v1591_v40, 0.0 }
 0x309   : > { %v1586_v45 = vadd.f32 %v1585_v44, %v3919_v21  ;;  %v1717_v51 = vmax.f32 %v1583_v42, 0.0 }
 0x30a   : > { %v1720_v49 = vmax.f32 %v1594_v48, 0.0 }
 0x30b   : > { %v1718_v52 = vmax.f32 %v1586_v45, 0.0 }
 0x30c   : > { %v1778_v53 = vpack.c.bf16 %v1720_v49, %v1719_v47 }
 0x30d   : > { %v1777_v54 = vpack.c.bf16 %v1718_v52, %v1717_v51  ;;  %v3123_v55 = vpop.f32.mrb[108].mxu0 }
 0x30e   : > { %v1607_v56 = vadd.f32 %v3123_v55, %v3919_v21  ;;  %v1598_v57 = vpop.f32.mrb[109].mxu0 }
 0x30f   : > { %v1599_v58 = vadd.f32 %v1598_v57, %v3919_v21  ;;  %v3124_v59 = vpop.f32.mrb[110].mxu0  ;;  %3197 = vmatprep.mubr.bf16.mxu1 %v1777_v54 }
 0x310   : > { %v1610_v60 = vadd.f32 %v3124_v59, %v3919_v21  ;;  %v1601_v61 = vpop.f32.mrb[111].mxu0  ;;  %3198 = vmatmul.mubr.bf16.gmra.mrb[100].mxu1 %v1778_v53  ;;  %v1723_v63 = vmax.f32 %v1607_v56, 0.0 }
 0x311   : > { %v1602_v62 = vadd.f32 %v1601_v61, %v3919_v21  ;;  %v1721_v1 = vmax.f32 %v1599_v58, 0.0 }
 0x312   : > { %v1724_v0 = vmax.f32 %v1610_v60, 0.0 }
 0x313   : > { %v1722_v2 = vmax.f32 %v1602_v62, 0.0 }
 0x314   : > { %v1780_v3 = vpack.c.bf16 %v1724_v0, %v1723_v63  ;;  %v1791_v0 = vsub.s32 3, %v3724_v46 }
 0x315   : > { %v1779_v4 = vpack.c.bf16 %v1722_v2, %v1721_v1  ;;  %v3127_v5 = vpop.f32.mrb[112].mxu0 }
 0x316   : > { %v1623_v6 = vadd.f32 %v3127_v5, %v3919_v21  ;;  %v1614_v7 = vpop.f32.mrb[113].mxu0  ;;  %v3987_v1 = vrot.slane %v3916_v20, %v1791_v0 }
 0x317   : > { %v1615_v8 = vadd.f32 %v1614_v7, %v3919_v21  ;;  %v3128_v9 = vpop.f32.mrb[114].mxu0  ;;  %3201 = vmatprep.mubr.bf16.mxu1 %v1779_v4 }
 0x318   : > { %v1626_v10 = vadd.f32 %v3128_v9, %v3919_v21  ;;  %v1617_v11 = vpop.f32.mrb[115].mxu0  ;;  %3202 = vmatmul.mubr.bf16.gmra.mrb[104].mxu1 %v1780_v3  ;;  %v1727_v13 = vmax.f32 %v1623_v6, 0.0 }
 0x319   : > { %v1618_v12 = vadd.f32 %v1617_v11, %v3919_v21  ;;  %v1725_v15 = vmax.f32 %v1615_v8, 0.0 }
 0x31a   : > { %v1728_v14 = vmax.f32 %v1626_v10, 0.0 }
 0x31b   : > { %v1726_v16 = vmax.f32 %v1618_v12, 0.0 }
 0x31c   : > { %v1782_v17 = vpack.c.bf16 %v1728_v14, %v1727_v13 }
 0x31d   : > { %v1781_v18 = vpack.c.bf16 %v1726_v16, %v1725_v15  ;;  %v3131_v19 = vpop.f32.mrb[116].mxu0 }
 0x31e   : > { %v1639_v22 = vadd.f32 %v3131_v19, %v3919_v21  ;;  %v1630_v36 = vpop.f32.mrb[117].mxu0 }
 0x31f   : > { %v1631_v23 = vadd.f32 %v1630_v36, %v3919_v21  ;;  %v3132_v24 = vpop.f32.mrb[118].mxu0  ;;  %3205 = vmatprep.mubr.bf16.mxu1 %v1781_v18 }
 0x320   : > { %v1642_v25 = vadd.f32 %v3132_v24, %v3919_v21  ;;  %v1633_v26 = vpop.f32.mrb[119].mxu0  ;;  %3206 = vmatmul.mubr.bf16.gmra.mrb[108].mxu1 %v1782_v17  ;;  %v1731_v28 = vmax.f32 %v1639_v22, 0.0 }
 0x321   : > { %v1634_v27 = vadd.f32 %v1633_v26, %v3919_v21  ;;  %v1729_v30 = vmax.f32 %v1631_v23, 0.0 }
 0x322   : > { %v1732_v29 = vmax.f32 %v1642_v25, 0.0 }
 0x323   : > { %v1730_v31 = vmax.f32 %v1634_v27, 0.0 }
 0x324   : > { %v1784_v32 = vpack.c.bf16 %v1732_v29, %v1731_v28 }
 0x325   : > { %v1783_v33 = vpack.c.bf16 %v1730_v31, %v1729_v30  ;;  %v3135_v34 = vpop.f32.mrb[120].mxu0 }
 0x326   : > { %v1655_v35 = vadd.f32 %v3135_v34, %v3919_v21  ;;  %v1646_v50 = vpop.f32.mrb[121].mxu0 }
 0x327   : > { %v1647_v37 = vadd.f32 %v1646_v50, %v3919_v21  ;;  %v3136_v38 = vpop.f32.mrb[122].mxu0  ;;  %3209 = vmatprep.mubr.bf16.mxu1 %v1783_v33 }
 0x328   : > { %v1658_v39 = vadd.f32 %v3136_v38, %v3919_v21  ;;  %v1649_v40 = vpop.f32.mrb[123].mxu0  ;;  %3210 = vmatmul.mubr.bf16.gmra.mrb[112].mxu1 %v1784_v32  ;;  %v1735_v42 = vmax.f32 %v1655_v35, 0.0 }
 0x329   : > { %v1650_v41 = vadd.f32 %v1649_v40, %v3919_v21  ;;  %v1733_v48 = vmax.f32 %v1647_v37, 0.0 }
 0x32a   : > { %v1736_v43 = vmax.f32 %v1658_v39, 0.0 }
 0x32b   : > { %v1734_v44 = vmax.f32 %v1650_v41, 0.0 }
 0x32c   : > { %v1786_v45 = vpack.c.bf16 %v1736_v43, %v1735_v42 }
 0x32d   : > { %v1785_v47 = vpack.c.bf16 %v1734_v44, %v1733_v48  ;;  %v3139_v49 = vpop.f32.mrb[124].mxu0 }
 0x32e   : > { %v1671_v51 = vadd.f32 %v3139_v49, %v3919_v21  ;;  %v1662_v52 = vpop.f32.mrb[125].mxu0 }
 0x32f   : > { %v1663_v53 = vadd.f32 %v1662_v52, %v3919_v21  ;;  %v3140_v54 = vpop.f32.mrb[126].mxu0  ;;  %3213 = vmatprep.mubr.bf16.mxu1 %v1785_v47 }
 0x330   : > { %v1674_v55 = vadd.f32 %v3140_v54, %v3919_v21  ;;  %v1665_v56 = vpop.f32.mrb[127].mxu0  ;;  %3214 = vmatmul.mubr.bf16.gmra.mrb[116].mxu1 %v1786_v45  ;;  %v1739_v58 = vmax.f32 %v1671_v51, 0.0 }
 0x331   : > { %v1666_v57 = vadd.f32 %v1665_v56, %v3919_v21  ;;  %v1737_v60 = vmax.f32 %v1663_v53, 0.0 }
 0x332   : > { %v1740_v59 = vmax.f32 %v1674_v55, 0.0 }
 0x333   : > { %v1738_v61 = vmax.f32 %v1666_v57, 0.0 }
 0x334   : > { %v1788_v62 = vpack.c.bf16 %v1740_v59, %v1739_v58 }
 0x335   : > { %v1787_v63 = vpack.c.bf16 %v1738_v61, %v1737_v60 }
 0x337   : > { %3217 = vmatprep.mubr.bf16.mxu1 %v1787_v63 }
 0x338   : > { %3218 = vmatmul.mubr.bf16.gmra.mrb[120].mxu1 %v1788_v62 }
 0x393   : > { %v3159_v2 = vpop.f32.mrb[128].mxu0 }
 0x394   : > { %v3990_v3 = vadd.f32 %v3159_v2, %v3987_v1  ;;  %v1875_v4 = vpop.f32.mrb[129].mxu0 }
 0x395   : > { %v3993_v21 = vadd.f32 %v1875_v4, %v3987_v1  ;;  %v3160_v5 = vpop.f32.mrb[130].mxu0 }
 0x396   : > { %v3996_v6 = vadd.f32 %v3160_v5, %v3987_v1  ;;  %v1878_v7 = vpop.f32.mrb[131].mxu0  ;;  %v2132_v8 = vmul.f32 %v3990_v3, %v3990_v3 }
 0x397   : > { %v4001_v46 = vadd.f32 %v1878_v7, %v3987_v1  ;;  %v2130_v20 = vmul.f32 %v3993_v21, %v3993_v21 }
 0x398   : > { %2198 = vadd.xlane.f32.xlu1 %v2132_v8  ;;  %v2133_v9 = vmul.f32 %v3996_v6, %v3996_v6 }
 0x399   : > { %2194 = vadd.xlane.f32.xlu0 %v2130_v20  ;;  %v2131_v11 = vmul.f32 %v4001_v46, %v4001_v46 }
 0x39b   : > { %v3163_v10 = vpop.f32.mrb[64].mxu1 }
 0x39c   : > { %v4010_v12 = vadd.f32 %v3163_v10, %v3987_v1  ;;  %v1891_v13 = vpop.f32.mrb[65].mxu1  ;;  %2200 = vadd.xlane.f32.xlu1 %v2133_v9 }
 0x39d   : > { %v3164_v14 = vpop.f32.mrb[66].mxu1  ;;  %2196 = vadd.xlane.f32.xlu0 %v2131_v11  ;;  %v4018_v18 = vadd.f32 %v1891_v13, %v3987_v1 }
 0x39e   : > { %v4013_v15 = vadd.f32 %v3164_v14, %v3987_v1  ;;  %v1894_v16 = vpop.f32.mrb[67].mxu1  ;;  %v2136_v17 = vmul.f32 %v4010_v12, %v4010_v12 }
 0x39f   : > { %v4021_v19 = vadd.f32 %v1894_v16, %v3987_v1  ;;  %v2134_v23 = vmul.f32 %v4018_v18, %v4018_v18 }
 0x3a0   : > { %v2137_v22 = vmul.f32 %v4013_v15, %v4013_v15 }
 0x3a1   : > { %2206 = vadd.xlane.f32.xlu0 %v2136_v17  ;;  %v2135_v26 = vmul.f32 %v4021_v19, %v4021_v19 }
 0x3a2   : > { %2208 = vadd.xlane.f32.xlu1 %v2137_v22 }
 0x3a3   : > { %v3167_v36 = vpop.f32.mrb[68].mxu1 }
 0x3a4   : > { %v4028_v24 = vadd.f32 %v3167_v36, %v3987_v1  ;;  %v1907_v25 = vpop.f32.mrb[69].mxu1 }
 0x3a5   : > { %v3168_v27 = vpop.f32.mrb[70].mxu1  ;;  %2202 = vadd.xlane.f32.xlu0 %v2134_v23  ;;  %v4038_v31 = vadd.f32 %v1907_v25, %v3987_v1 }
 0x3a6   : > { %v4033_v28 = vadd.f32 %v3168_v27, %v3987_v1  ;;  %v1910_v29 = vpop.f32.mrb[71].mxu1  ;;  %2204 = vadd.xlane.f32.xlu1 %v2135_v26  ;;  %v2140_v30 = vmul.f32 %v4028_v24, %v4028_v24 }
 0x3a7   : > { %v4041_v32 = vadd.f32 %v1910_v29, %v3987_v1  ;;  %v2138_v35 = vmul.f32 %v4038_v31, %v4038_v31 }
 0x3a8   : > { %v2141_v33 = vmul.f32 %v4033_v28, %v4033_v28 }
 0x3a9   : > { %2214 = vadd.xlane.f32.xlu0 %v2140_v30  ;;  %v2139_v38 = vmul.f32 %v4041_v32, %v4041_v32 }
 0x3aa   : > { %2216 = vadd.xlane.f32.xlu1 %v2141_v33 }
 0x3ab   : > { %v3171_v34 = vpop.f32.mrb[72].mxu1 }
 0x3ac   : > { %v4048_v50 = vadd.f32 %v3171_v34, %v3987_v1  ;;  %v1923_v37 = vpop.f32.mrb[73].mxu1 }
 0x3ad   : > { %v3172_v39 = vpop.f32.mrb[74].mxu1  ;;  %2210 = vadd.xlane.f32.xlu0 %v2138_v35  ;;  %v4058_v43 = vadd.f32 %v1923_v37, %v3987_v1 }
 0x3ae   : > { %v4053_v40 = vadd.f32 %v3172_v39, %v3987_v1  ;;  %v1926_v41 = vpop.f32.mrb[75].mxu1  ;;  %2212 = vadd.xlane.f32.xlu1 %v2139_v38  ;;  %v2144_v42 = vmul.f32 %v4048_v50, %v4048_v50 }
 0x3af   : > { %v4061_v48 = vadd.f32 %v1926_v41, %v3987_v1  ;;  %v2142_v47 = vmul.f32 %v4058_v43, %v4058_v43 }
 0x3b0   : > { %v2145_v44 = vmul.f32 %v4053_v40, %v4053_v40 }
 0x3b1   : > { %2222 = vadd.xlane.f32.xlu0 %v2144_v42  ;;  %v2143_v52 = vmul.f32 %v4061_v48, %v4061_v48 }
 0x3b2   : > { %2224 = vadd.xlane.f32.xlu1 %v2145_v44 }
 0x3b3   : > { %v3175_v45 = vpop.f32.mrb[76].mxu1 }
 0x3b4   : > { %v4068_v49 = vadd.f32 %v3175_v45, %v3987_v1  ;;  %v1939_v51 = vpop.f32.mrb[77].mxu1 }
 0x3b5   : > { %v3176_v53 = vpop.f32.mrb[78].mxu1  ;;  %2218 = vadd.xlane.f32.xlu0 %v2142_v47  ;;  %v4078_v57 = vadd.f32 %v1939_v51, %v3987_v1 }
 0x3b6   : > { %v4073_v54 = vadd.f32 %v3176_v53, %v3987_v1  ;;  %v1942_v55 = vpop.f32.mrb[79].mxu1  ;;  %2220 = vadd.xlane.f32.xlu1 %v2143_v52  ;;  %v2148_v56 = vmul.f32 %v4068_v49, %v4068_v49 }
 0x3b7   : > { %v4081_v58 = vadd.f32 %v1942_v55, %v3987_v1  ;;  %v2146_v61 = vmul.f32 %v4078_v57, %v4078_v57 }
 0x3b8   : > { %v2149_v59 = vmul.f32 %v4073_v54, %v4073_v54 }
 0x3b9   : > { %2230 = vadd.xlane.f32.xlu0 %v2148_v56  ;;  %v2147_v0 = vmul.f32 %v4081_v58, %v4081_v58 }
 0x3ba   : > { %2232 = vadd.xlane.f32.xlu1 %v2149_v59 }
 0x3bb   : > { %v3179_v60 = vpop.f32.mrb[80].mxu1 }
 0x3bc   : > { %v4088_v62 = vadd.f32 %v3179_v60, %v3987_v1  ;;  %v1955_v63 = vpop.f32.mrb[81].mxu1 }
 0x3bd   : > { %v3180_v2 = vpop.f32.mrb[82].mxu1  ;;  %2226 = vadd.xlane.f32.xlu0 %v2146_v61  ;;  %v4098_v8 = vadd.f32 %v1955_v63, %v3987_v1 }
 0x3be   : > { %v4093_v4 = vadd.f32 %v3180_v2, %v3987_v1  ;;  %v1958_v5 = vpop.f32.mrb[83].mxu1  ;;  %2228 = vadd.xlane.f32.xlu1 %v2147_v0  ;;  %v2152_v7 = vmul.f32 %v4088_v62, %v4088_v62 }
 0x3bf   : > { %v4101_v20 = vadd.f32 %v1958_v5, %v3987_v1  ;;  %v2150_v11 = vmul.f32 %v4098_v8, %v4098_v8 }
 0x3c0   : > { %v2153_v9 = vmul.f32 %v4093_v4, %v4093_v4 }
 0x3c1   : > { %2238 = vadd.xlane.f32.xlu0 %v2152_v7  ;;  %v2151_v16 = vmul.f32 %v4101_v20, %v4101_v20 }
 0x3c2   : > { %2240 = vadd.xlane.f32.xlu1 %v2153_v9 }
 0x3c3   : > { %v3183_v10 = vpop.f32.mrb[84].mxu1 }
 0x3c4   : > { %v4108_v13 = vadd.f32 %v3183_v10, %v3987_v1  ;;  %v1971_v14 = vpop.f32.mrb[85].mxu1 }
 0x3c5   : > { %v3184_v17 = vpop.f32.mrb[86].mxu1  ;;  %2234 = vadd.xlane.f32.xlu0 %v2150_v11  ;;  %v4118_v25 = vadd.f32 %v1971_v14, %v3987_v1 }
 0x3c6   : > { %v4113_v22 = vadd.f32 %v3184_v17, %v3987_v1  ;;  %v1974_v36 = vpop.f32.mrb[87].mxu1  ;;  %2236 = vadd.xlane.f32.xlu1 %v2151_v16  ;;  %v2156_v23 = vmul.f32 %v4108_v13, %v4108_v13 }
 0x3c7   : > { %v4121_v26 = vadd.f32 %v1974_v36, %v3987_v1  ;;  %v2154_v30 = vmul.f32 %v4118_v25, %v4118_v25 }
 0x3c8   : > { %v2157_v27 = vmul.f32 %v4113_v22, %v4113_v22 }
 0x3c9   : > { %2246 = vadd.xlane.f32.xlu0 %v2156_v23  ;;  %v2155_v35 = vmul.f32 %v4121_v26, %v4121_v26 }
 0x3ca   : > { %2248 = vadd.xlane.f32.xlu1 %v2157_v27 }
 0x3cb   : > { %v3187_v29 = vpop.f32.mrb[88].mxu1 }
 0x3cc   : > { %v4128_v33 = vadd.f32 %v3187_v29, %v3987_v1  ;;  %v1987_v34 = vpop.f32.mrb[89].mxu1 }
 0x3cd   : > { %v3188_v37 = vpop.f32.mrb[90].mxu1  ;;  %2242 = vadd.xlane.f32.xlu0 %v2154_v30  ;;  %v4138_v42 = vadd.f32 %v1987_v34, %v3987_v1 }
 0x3ce   : > { %v4133_v38 = vadd.f32 %v3188_v37, %v3987_v1  ;;  %v1990_v39 = vpop.f32.mrb[91].mxu1  ;;  %2244 = vadd.xlane.f32.xlu1 %v2155_v35  ;;  %v2160_v41 = vmul.f32 %v4128_v33, %v4128_v33 }
 0x3cf   : > { %v4141_v44 = vadd.f32 %v1990_v39, %v3987_v1  ;;  %v2158_v51 = vmul.f32 %v4138_v42, %v4138_v42 }
 0x3d0   : > { %v2161_v45 = vmul.f32 %v4133_v38, %v4133_v38 }
 0x3d1   : > { %2254 = vadd.xlane.f32.xlu0 %v2160_v41  ;;  %v2159_v55 = vmul.f32 %v4141_v44, %v4141_v44 }
 0x3d2   : > { %2256 = vadd.xlane.f32.xlu1 %v2161_v45 }
 0x3d3   : > { %v3191_v47 = vpop.f32.mrb[92].mxu1 }
 0x3d4   : > { %v4148_v52 = vadd.f32 %v3191_v47, %v3987_v1  ;;  %v2003_v53 = vpop.f32.mrb[93].mxu1 }
 0x3d5   : > { %v3192_v56 = vpop.f32.mrb[94].mxu1  ;;  %2250 = vadd.xlane.f32.xlu0 %v2158_v51  ;;  %v4158_v63 = vadd.f32 %v2003_v53, %v3987_v1 }
 0x3d6   : > { %v4153_v59 = vadd.f32 %v3192_v56, %v3987_v1  ;;  %v2006_v60 = vpop.f32.mrb[95].mxu1  ;;  %2252 = vadd.xlane.f32.xlu1 %v2159_v55  ;;  %v2164_v61 = vmul.f32 %v4148_v52, %v4148_v52 }
 0x3d7   : > { %v4161_v0 = vadd.f32 %v2006_v60, %v3987_v1  ;;  %v2162_v7 = vmul.f32 %v4158_v63, %v4158_v63 }
 0x3d8   : > { %v2165_v2 = vmul.f32 %v4153_v59, %v4153_v59 }
 0x3d9   : > { %2262 = vadd.xlane.f32.xlu0 %v2164_v61  ;;  %v2163_v11 = vmul.f32 %v4161_v0, %v4161_v0 }
 0x3da   : > { %2264 = vadd.xlane.f32.xlu1 %v2165_v2 }
 0x3db   : > { %v3195_v5 = vpop.f32.mrb[96].mxu1 }
 0x3dc   : > { %v4168_v9 = vadd.f32 %v3195_v5, %v3987_v1  ;;  %v2019_v10 = vpop.f32.mrb[97].mxu1 }
 0x3dd   : > { %v3196_v14 = vpop.f32.mrb[98].mxu1  ;;  %2258 = vadd.xlane.f32.xlu0 %v2162_v7  ;;  %v4178_v23 = vadd.f32 %v2019_v10, %v3987_v1 }
 0x3de   : > { %v4173_v16 = vadd.f32 %v3196_v14, %v3987_v1  ;;  %v2022_v17 = vpop.f32.mrb[99].mxu1  ;;  %2260 = vadd.xlane.f32.xlu1 %v2163_v11  ;;  %v2168_v36 = vmul.f32 %v4168_v9, %v4168_v9 }
 0x3df   : > { %v4181_v27 = vadd.f32 %v2022_v17, %v3987_v1  ;;  %v2166_v34 = vmul.f32 %v4178_v23, %v4178_v23 }
 0x3e0   : > { %v2169_v29 = vmul.f32 %v4173_v16, %v4173_v16 }
 0x3e1   : > { %2270 = vadd.xlane.f32.xlu0 %v2168_v36  ;;  %v2167_v39 = vmul.f32 %v4181_v27, %v4181_v27 }
 0x3e2   : > { %2272 = vadd.xlane.f32.xlu1 %v2169_v29 }
 0x3e3   : > { %v3199_v30 = vpop.f32.mrb[100].mxu1 }
 0x3e4   : > { %v4188_v35 = vadd.f32 %v3199_v30, %v3987_v1  ;;  %v2035_v37 = vpop.f32.mrb[101].mxu1 }
 0x3e5   : > { %v3200_v41 = vpop.f32.mrb[102].mxu1  ;;  %2266 = vadd.xlane.f32.xlu0 %v2166_v34  ;;  %v4198_v53 = vadd.f32 %v2035_v37, %v3987_v1 }
 0x3e6   : > { %v4193_v45 = vadd.f32 %v3200_v41, %v3987_v1  ;;  %v2038_v47 = vpop.f32.mrb[103].mxu1  ;;  %2268 = vadd.xlane.f32.xlu1 %v2167_v39  ;;  %v2172_v51 = vmul.f32 %v4188_v35, %v4188_v35 }
 0x3e7   : > { %v4201_v55 = vadd.f32 %v2038_v47, %v3987_v1  ;;  %v2170_v61 = vmul.f32 %v4198_v53, %v4198_v53 }
 0x3e8   : > { %v2173_v56 = vmul.f32 %v4193_v45, %v4193_v45 }
 0x3e9   : > { %2278 = vadd.xlane.f32.xlu0 %v2172_v51  ;;  %v2171_v7 = vmul.f32 %v4201_v55, %v4201_v55 }
 0x3ea   : > { %2280 = vadd.xlane.f32.xlu1 %v2173_v56 }
 0x3eb   : > { %v3203_v60 = vpop.f32.mrb[104].mxu1 }
 0x3ec   : > { %v4208_v2 = vadd.f32 %v3203_v60, %v3987_v1  ;;  %v2051_v5 = vpop.f32.mrb[105].mxu1 }
 0x3ed   : > { %v3204_v10 = vpop.f32.mrb[106].mxu1  ;;  %2274 = vadd.xlane.f32.xlu0 %v2170_v61  ;;  %v4218_v36 = vadd.f32 %v2051_v5, %v3987_v1 }
 0x3ee   : > { %v4213_v11 = vadd.f32 %v3204_v10, %v3987_v1  ;;  %v2054_v14 = vpop.f32.mrb[107].mxu1  ;;  %2276 = vadd.xlane.f32.xlu1 %v2171_v7  ;;  %v2176_v17 = vmul.f32 %v4208_v2, %v4208_v2 }
 0x3ef   : > { %v4221_v29 = vadd.f32 %v2054_v14, %v3987_v1  ;;  %v2174_v37 = vmul.f32 %v4218_v36, %v4218_v36 }
 0x3f0   : > { %v2177_v30 = vmul.f32 %v4213_v11, %v4213_v11 }
 0x3f1   : > { %2286 = vadd.xlane.f32.xlu0 %v2176_v17  ;;  %v2175_v47 = vmul.f32 %v4221_v29, %v4221_v29 }
 0x3f2   : > { %2288 = vadd.xlane.f32.xlu1 %v2177_v30 }
 0x3f3   : > { %v3207_v34 = vpop.f32.mrb[108].mxu1 }
 0x3f4   : > { %v4228_v39 = vadd.f32 %v3207_v34, %v3987_v1  ;;  %v2067_v41 = vpop.f32.mrb[109].mxu1 }
 0x3f5   : > { %v3208_v51 = vpop.f32.mrb[110].mxu1  ;;  %2282 = vadd.xlane.f32.xlu0 %v2174_v37  ;;  %v4239_v5 = vadd.f32 %v2067_v41, %v3987_v1 }
 0x3f6   : > { %v4234_v56 = vadd.f32 %v3208_v51, %v3987_v1  ;;  %v2070_v60 = vpop.f32.mrb[111].mxu1  ;;  %2284 = vadd.xlane.f32.xlu1 %v2175_v47  ;;  %v2180_v61 = vmul.f32 %v4228_v39, %v4228_v39 }
 0x3f7   : > { %4527 = vst [vmem:[#allocation5_spill] sm:$0xff] %v4239_v5  ;;  %v4242_v7 = vadd.f32 %v2070_v60, %v3987_v1  ;;  %v2178_v17 = vmul.f32 %v4239_v5, %v4239_v5 }
 0x3f8   : > { %v2181_v10 = vmul.f32 %v4234_v56, %v4234_v56 }
 0x3f9   : > { %4528 = vst [vmem:[#allocation6_spill] sm:$0xff] %v4242_v7  ;;  %2294 = vadd.xlane.f32.xlu0 %v2180_v61  ;;  %v2179_v37 = vmul.f32 %v4242_v7, %v4242_v7 }
 0x3fa   : > { %2296 = vadd.xlane.f32.xlu1 %v2181_v10 }
 0x3fb   : > { %v3211_v14 = vpop.f32.mrb[112].mxu1 }
 0x3fc   : > { %v4249_v30 = vadd.f32 %v3211_v14, %v3987_v1  ;;  %v2083_v34 = vpop.f32.mrb[113].mxu1 }
 0x3fd   : > { %v3212_v41 = vpop.f32.mrb[114].mxu1  ;;  %2290 = vadd.xlane.f32.xlu0 %v2178_v17  ;;  %v4259_v61 = vadd.f32 %v2083_v34, %v3987_v1 }
 0x3fe   : > { %4529 = vst [vmem:[#allocation7_spill] sm:$0xff] %v4249_v30  ;;  %v4254_v47 = vadd.f32 %v3212_v41, %v3987_v1  ;;  %v2086_v51 = vpop.f32.mrb[115].mxu1  ;;  %2292 = vadd.xlane.f32.xlu1 %v2179_v37  ;;  %v2184_v60 = vmul.f32 %v4249_v30, %v4249_v30 }
 0x3ff   : > { %4531 = vst [vmem:[#allocation9_spill] sm:$0xff] %v4259_v61  ;;  %v4262_v10 = vadd.f32 %v2086_v51, %v3987_v1  ;;  %v2182_v41 = vmul.f32 %v4259_v61, %v4259_v61 }
 0x400   : > { %4530 = vst [vmem:[#allocation8_spill] sm:$0xff] %v4254_v47  ;;  %v2185_v14 = vmul.f32 %v4254_v47, %v4254_v47 }
 0x401   : > { %4532 = vst [vmem:[#allocation10_spill] sm:$0xff] %v4262_v10  ;;  %2302 = vadd.xlane.f32.xlu0 %v2184_v60  ;;  %v2183_v34 = vmul.f32 %v4262_v10, %v4262_v10 }
 0x402   : > { %2304 = vadd.xlane.f32.xlu1 %v2185_v14 }
 0x403   : > { %v3215_v17 = vpop.f32.mrb[116].mxu1 }
 0x404   : > { %v4269_v37 = vadd.f32 %v3215_v17, %v3987_v1  ;;  %v2099_v7 = vpop.f32.mrb[117].mxu1 }
 0x405   : > { %v3216_v30 = vpop.f32.mrb[118].mxu1  ;;  %2298 = vadd.xlane.f32.xlu0 %v2182_v41  ;;  %v4279_v14 = vadd.f32 %v2099_v7, %v3987_v1 }
 0x406   : > { %4533 = vst [vmem:[#allocation11_spill] sm:$0xff] %v4269_v37  ;;  %v4274_v51 = vadd.f32 %v3216_v30, %v3987_v1  ;;  %v2102_v5 = vpop.f32.mrb[119].mxu1  ;;  %2300 = vadd.xlane.f32.xlu1 %v2183_v34  ;;  %v2188_v60 = vmul.f32 %v4269_v37, %v4269_v37 }
 0x407   : > { %4535 = vst [vmem:[#allocation13_spill] sm:$0xff] %v4279_v14  ;;  %v4282_v17 = vadd.f32 %v2102_v5, %v3987_v1  ;;  %v2186_v30 = vmul.f32 %v4279_v14, %v4279_v14 }
 0x408   : > { %4534 = vst [vmem:[#allocation12_spill] sm:$0xff] %v4274_v51  ;;  %v2189_v61 = vmul.f32 %v4274_v51, %v4274_v51 }
 0x409   : > { %4536 = vst [vmem:[#allocation14_spill] sm:$0xff] %v4282_v17  ;;  %2310 = vadd.xlane.f32.xlu0 %v2188_v60  ;;  %v2187_v34 = vmul.f32 %v4282_v17, %v4282_v17 }
 0x40a   : > { %2312 = vadd.xlane.f32.xlu1 %v2189_v61 }
 0x40b   : > { %v3219_v41 = vpop.f32.mrb[120].mxu1 }
 0x40c   : > { %v2115_v10 = vpop.f32.mrb[121].mxu1  ;;  %v4294_v47 = vadd.f32 %v3219_v41, %v3987_v1 }
 0x40d   : > { %v4291_v37 = vadd.f32 %v2115_v10, %v3987_v1  ;;  %v3220_v7 = vpop.f32.mrb[122].mxu1  ;;  %2306 = vadd.xlane.f32.xlu0 %v2186_v30 }
 0x40e   : > { %v2118_v5 = vpop.f32.mrb[123].mxu1  ;;  %2308 = vadd.xlane.f32.xlu1 %v2187_v34  ;;  %4538 = vst [vmem:[#allocation16_spill] sm:$0xff] %v4294_v47  ;;  %v4302_v14 = vadd.f32 %v3220_v7, %v3987_v1  ;;  %v2192_v30 = vmul.f32 %v4294_v47, %v4294_v47 }
 0x40f   : > { %4537 = vst [vmem:[#allocation15_spill] sm:$0xff] %v4291_v37  ;;  %v4297_v61 = vadd.f32 %v2118_v5, %v3987_v1  ;;  %v2190_v60 = vmul.f32 %v4291_v37, %v4291_v37 }
 0x410   : > { %4540 = vst [vmem:[#allocation18_spill] sm:$0xff] %v4302_v14  ;;  %v2193_v41 = vmul.f32 %v4302_v14, %v4302_v14 }
 0x411   : > { %4539 = vst [vmem:[#allocation17_spill] sm:$0xff] %v4297_v61  ;;  %2314 = vadd.xlane.f32.xlu0 %v2190_v60  ;;  %v2191_v10 = vmul.f32 %v4297_v61, %v4297_v61 }
 0x413   : > { %2316 = vadd.xlane.f32.xlu1 %v2191_v10 }
 0x415   : > { %2318 = vadd.xlane.f32.xlu0 %v2192_v30 }
 0x417   : > { %2320 = vadd.xlane.f32.xlu1 %v2193_v41 }
 0x425   : > { %v2199_v34 = vpop.xlane.xlu1 %2198 }
 0x426   : > { %v2324_v5 = vadd.f32 1e-12, %v2199_v34  ;;  %v2195_v37 = vpop.xlane.xlu0 %2194 }
 0x427   : > { %v2322_v17 = vadd.f32 1e-12, %v2195_v37 }
 0x428   : > { %3305 = vrsqrt.f32 %v2324_v5 }
 0x429   : > { %3307 = vrsqrt.f32 %v2322_v17  ;;  %v2201_v1 = vpop.xlane.xlu1 %2200 }
 0x42a   : > { %v2325_v7 = vadd.f32 1e-12, %v2201_v1  ;;  %v2197_v60 = vpop.xlane.xlu0 %2196 }
 0x42b   : > { %v2323_v61 = vadd.f32 1e-12, %v2197_v60 }
 0x42c   : > { %3309 = vrsqrt.f32 %v2325_v7 }
 0x42d   : > { %3311 = vrsqrt.f32 %v2323_v61 }
 0x42e   : > { %v2207_v10 = vpop.xlane.xlu0 %2206 }
 0x42f   : > { %v2328_v30 = vadd.f32 1e-12, %v2207_v10  ;;  %v2209_v47 = vpop.xlane.xlu1 %2208 }
 0x430   : > { %v2329_v51 = vadd.f32 1e-12, %v2209_v47 }
 0x431   : > { %3313 = vrsqrt.f32 %v2328_v30 }
 0x432   : > { %v3306_v41 = vpop.eup %3305  ;;  %3315 = vrsqrt.f32 %v2329_v51  ;;  %v2203_v34 = vpop.xlane.xlu0 %2202 }
 0x433   : > { %v3308_v14 = vpop.eup %3307  ;;  %v2452_v37 = vmul.f32 %v3306_v41, %v3990_v3  ;;  %v2326_v17 = vadd.f32 1e-12, %v2203_v34  ;;  %v2205_v5 = vpop.xlane.xlu1 %2204 }
 0x434   : > { %v2450_v1 = vmul.f32 %v3308_v14, %v3993_v21  ;;  %v2327_v60 = vadd.f32 1e-12, %v2205_v5 }
 0x435   : > { %2516 = vst [vmem:[%s4314_s13 + $0x10] sm:$0xff] %v2452_v37  ;;  %3317 = vrsqrt.f32 %v2326_v17 }
 0x436   : > { %v3310_v47 = vpop.eup %3309  ;;  %2514 = vst [vmem:[%s4314_s13] sm:$0xff] %v2450_v1  ;;  %3319 = vrsqrt.f32 %v2327_v60  ;;  %v2215_v51 = vpop.xlane.xlu0 %2214 }
 0x437   : > { %v3312_v61 = vpop.eup %3311  ;;  %v2453_v3 = vmul.f32 %v3310_v47, %v3996_v6  ;;  %v2332_v7 = vadd.f32 1e-12, %v2215_v51  ;;  %v2217_v10 = vpop.xlane.xlu1 %2216 }
 0x438   : > { %v2451_v21 = vmul.f32 %v3312_v61, %v4001_v46  ;;  %v2333_v14 = vadd.f32 1e-12, %v2217_v10 }
 0x439   : > { %2517 = vst [vmem:[%s4314_s13 + $0x18] sm:$0xff] %v2453_v3  ;;  %3321 = vrsqrt.f32 %v2332_v7 }
 0x43a   : > { %2515 = vst [vmem:[%s4314_s13 + $0x8] sm:$0xff] %v2451_v21  ;;  %3323 = vrsqrt.f32 %v2333_v14  ;;  %v2211_v30 = vpop.xlane.xlu0 %2210 }
 0x43b   : > { %v3314_v41 = vpop.eup %3313  ;;  %v2330_v34 = vadd.f32 1e-12, %v2211_v30  ;;  %v2213_v37 = vpop.xlane.xlu1 %2212 }
 0x43c   : > { %v3316_v17 = vpop.eup %3315  ;;  %v2456_v5 = vmul.f32 %v3314_v41, %v4010_v12  ;;  %v2331_v6 = vadd.f32 1e-12, %v2213_v37 }
 0x43d   : > { %v2457_v1 = vmul.f32 %v3316_v17, %v4013_v15  ;;  %3325 = vrsqrt.f32 %v2330_v34 }
 0x43e   : > { %2520 = vst [vmem:[%s4314_s13 + $0x30] sm:$0xff] %v2456_v5  ;;  %3327 = vrsqrt.f32 %v2331_v6  ;;  %v2223_v46 = vpop.xlane.xlu0 %2222 }
 0x43f   : > { %v3318_v60 = vpop.eup %3317  ;;  %2521 = vst [vmem:[%s4314_s13 + $0x38] sm:$0xff] %v2457_v1  ;;  %v2336_v47 = vadd.f32 1e-12, %v2223_v46  ;;  %v2225_v51 = vpop.xlane.xlu1 %2224 }
 0x440   : > { %v3320_v61 = vpop.eup %3319  ;;  %v2454_v3 = vmul.f32 %v3318_v60, %v4018_v18  ;;  %v2337_v7 = vadd.f32 1e-12, %v2225_v51 }
 0x441   : > { %v2455_v12 = vmul.f32 %v3320_v61, %v4021_v19  ;;  %3329 = vrsqrt.f32 %v2336_v47 }
 0x442   : > { %2518 = vst [vmem:[%s4314_s13 + $0x20] sm:$0xff] %v2454_v3  ;;  %3331 = vrsqrt.f32 %v2337_v7  ;;  %v2219_v15 = vpop.xlane.xlu0 %2218 }
 0x443   : > { %v3322_v10 = vpop.eup %3321  ;;  %2519 = vst [vmem:[%s4314_s13 + $0x28] sm:$0xff] %v2455_v12  ;;  %v2334_v21 = vadd.f32 1e-12, %v2219_v15  ;;  %v2221_v14 = vpop.xlane.xlu1 %2220 }
 0x444   : > { %v3324_v30 = vpop.eup %3323  ;;  %v2460_v41 = vmul.f32 %v3322_v10, %v4028_v24  ;;  %v2335_v34 = vadd.f32 1e-12, %v2221_v14 }
 0x445   : > { %v2461_v18 = vmul.f32 %v3324_v30, %v4033_v28  ;;  %3333 = vrsqrt.f32 %v2334_v21 }
 0x446   : > { %2524 = vst [vmem:[%s4314_s13 + $0x50] sm:$0xff] %v2460_v41  ;;  %3335 = vrsqrt.f32 %v2335_v34  ;;  %v2231_v19 = vpop.xlane.xlu0 %2230 }
 0x447   : > { %v3326_v37 = vpop.eup %3325  ;;  %2525 = vst [vmem:[%s4314_s13 + $0x58] sm:$0xff] %v2461_v18  ;;  %v2340_v17 = vadd.f32 1e-12, %v2231_v19  ;;  %v2233_v5 = vpop.xlane.xlu1 %2232 }
 0x448   : > { %v3328_v6 = vpop.eup %3327  ;;  %v2458_v1 = vmul.f32 %v3326_v37, %v4038_v31  ;;  %v2341_v46 = vadd.f32 1e-12, %v2233_v5 }
 0x449   : > { %v2459_v24 = vmul.f32 %v3328_v6, %v4041_v32  ;;  %3337 = vrsqrt.f32 %v2340_v17 }
 0x44a   : > { %2522 = vst [vmem:[%s4314_s13 + $0x40] sm:$0xff] %v2458_v1  ;;  %3339 = vrsqrt.f32 %v2341_v46  ;;  %v2227_v28 = vpop.xlane.xlu0 %2226 }
 0x44b   : > { %v3330_v60 = vpop.eup %3329  ;;  %2523 = vst [vmem:[%s4314_s13 + $0x48] sm:$0xff] %v2459_v24  ;;  %v2338_v47 = vadd.f32 1e-12, %v2227_v28  ;;  %v2229_v51 = vpop.xlane.xlu1 %2228 }
 0x44c   : > { %v3332_v61 = vpop.eup %3331  ;;  %v2464_v3 = vmul.f32 %v3330_v60, %v4048_v50  ;;  %v2339_v7 = vadd.f32 1e-12, %v2229_v51 }
 0x44d   : > { %v2465_v31 = vmul.f32 %v3332_v61, %v4053_v40  ;;  %3341 = vrsqrt.f32 %v2338_v47 }
 0x44e   : > { %2528 = vst [vmem:[%s4314_s13 + $0x70] sm:$0xff] %v2464_v3  ;;  %3343 = vrsqrt.f32 %v2339_v7  ;;  %v2239_v32 = vpop.xlane.xlu0 %2238 }
 0x44f   : > { %v3334_v12 = vpop.eup %3333  ;;  %2529 = vst [vmem:[%s4314_s13 + $0x78] sm:$0xff] %v2465_v31  ;;  %v2344_v15 = vadd.f32 1e-12, %v2239_v32  ;;  %v2241_v10 = vpop.xlane.xlu1 %2240 }
 0x450   : > { %v3336_v21 = vpop.eup %3335  ;;  %v2462_v14 = vmul.f32 %v3334_v12, %v4058_v43  ;;  %v2345_v30 = vadd.f32 1e-12, %v2241_v10 }
 0x451   : > { %v2463_v50 = vmul.f32 %v3336_v21, %v4061_v48  ;;  %3345 = vrsqrt.f32 %v2344_v15 }
 0x452   : > { %2526 = vst [vmem:[%s4314_s13 + $0x60] sm:$0xff] %v2462_v14  ;;  %3347 = vrsqrt.f32 %v2345_v30  ;;  %v2235_v40 = vpop.xlane.xlu0 %2234 }
 0x453   : > { %v3338_v41 = vpop.eup %3337  ;;  %2527 = vst [vmem:[%s4314_s13 + $0x68] sm:$0xff] %v2463_v50  ;;  %v2342_v34 = vadd.f32 1e-12, %v2235_v40  ;;  %v2237_v18 = vpop.xlane.xlu1 %2236 }
 0x454   : > { %v3340_v19 = vpop.eup %3339  ;;  %v2468_v37 = vmul.f32 %v3338_v41, %v4068_v49  ;;  %v2343_v17 = vadd.f32 1e-12, %v2237_v18 }
 0x455   : > { %v2469_v43 = vmul.f32 %v3340_v19, %v4073_v54  ;;  %3349 = vrsqrt.f32 %v2342_v34 }
 0x456   : > { %2532 = vst [vmem:[%s4314_s13 + $0x90] sm:$0xff] %v2468_v37  ;;  %3351 = vrsqrt.f32 %v2343_v17  ;;  %v2247_v48 = vpop.xlane.xlu0 %2246 }
 0x457   : > { %v3342_v5 = vpop.eup %3341  ;;  %2533 = vst [vmem:[%s4314_s13 + $0x98] sm:$0xff] %v2469_v43  ;;  %v2348_v6 = vadd.f32 1e-12, %v2247_v48  ;;  %v2249_v1 = vpop.xlane.xlu1 %2248 }
 0x458   : > { %v3344_v46 = vpop.eup %3343  ;;  %v2466_v24 = vmul.f32 %v3342_v5, %v4078_v57  ;;  %v2349_v28 = vadd.f32 1e-12, %v2249_v1 }
 0x459   : > { %v2467_v49 = vmul.f32 %v3344_v46, %v4081_v58  ;;  %3353 = vrsqrt.f32 %v2348_v6 }
 0x45a   : > { %2530 = vst [vmem:[%s4314_s13 + $0x80] sm:$0xff] %v2466_v24  ;;  %3355 = vrsqrt.f32 %v2349_v28  ;;  %v2243_v54 = vpop.xlane.xlu0 %2242 }
 0x45b   : > { %v3346_v60 = vpop.eup %3345  ;;  %2531 = vst [vmem:[%s4314_s13 + $0x88] sm:$0xff] %v2467_v49  ;;  %v2346_v47 = vadd.f32 1e-12, %v2243_v54  ;;  %v2245_v51 = vpop.xlane.xlu1 %2244 }
 0x45c   : > { %v3348_v61 = vpop.eup %3347  ;;  %v2472_v3 = vmul.f32 %v3346_v60, %v4088_v62  ;;  %v2347_v7 = vadd.f32 1e-12, %v2245_v51 }
 0x45d   : > { %v2473_v57 = vmul.f32 %v3348_v61, %v4093_v4  ;;  %3357 = vrsqrt.f32 %v2346_v47 }
 0x45e   : > { %2536 = vst [vmem:[%s4314_s13 + $0xb0] sm:$0xff] %v2472_v3  ;;  %3359 = vrsqrt.f32 %v2347_v7  ;;  %v2255_v58 = vpop.xlane.xlu0 %2254 }
 0x45f   : > { %v3350_v31 = vpop.eup %3349  ;;  %2537 = vst [vmem:[%s4314_s13 + $0xb8] sm:$0xff] %v2473_v57  ;;  %v2352_v32 = vadd.f32 1e-12, %v2255_v58  ;;  %v2257_v12 = vpop.xlane.xlu1 %2256 }
 0x460   : > { %v3352_v15 = vpop.eup %3351  ;;  %v2470_v10 = vmul.f32 %v3350_v31, %v4098_v8  ;;  %v2353_v21 = vadd.f32 1e-12, %v2257_v12 }
 0x461   : > { %v2471_v62 = vmul.f32 %v3352_v15, %v4101_v20  ;;  %3361 = vrsqrt.f32 %v2352_v32 }
 0x462   : > { %2534 = vst [vmem:[%s4314_s13 + $0xa0] sm:$0xff] %v2470_v10  ;;  %3363 = vrsqrt.f32 %v2353_v21  ;;  %v2251_v4 = vpop.xlane.xlu0 %2250 }
 0x463   : > { %v3354_v14 = vpop.eup %3353  ;;  %2535 = vst [vmem:[%s4314_s13 + $0xa8] sm:$0xff] %v2471_v62  ;;  %v2350_v30 = vadd.f32 1e-12, %v2251_v4  ;;  %v2253_v50 = vpop.xlane.xlu1 %2252 }
 0x464   : > { %v3356_v40 = vpop.eup %3355  ;;  %v2476_v41 = vmul.f32 %v3354_v14, %v4108_v13  ;;  %v2351_v34 = vadd.f32 1e-12, %v2253_v50 }
 0x465   : > { %v2477_v8 = vmul.f32 %v3356_v40, %v4113_v22  ;;  %3365 = vrsqrt.f32 %v2350_v30 }
 0x466   : > { %2540 = vst [vmem:[%s4314_s13 + $0xd0] sm:$0xff] %v2476_v41  ;;  %3367 = vrsqrt.f32 %v2351_v34  ;;  %v2263_v20 = vpop.xlane.xlu0 %2262 }
 0x467   : > { %v3358_v18 = vpop.eup %3357  ;;  %2541 = vst [vmem:[%s4314_s13 + $0xd8] sm:$0xff] %v2477_v8  ;;  %v2356_v19 = vadd.f32 1e-12, %v2263_v20  ;;  %v2265_v37 = vpop.xlane.xlu1 %2264 }
 0x468   : > { %v3360_v17 = vpop.eup %3359  ;;  %v2474_v43 = vmul.f32 %v3358_v18, %v4118_v25  ;;  %v2357_v48 = vadd.f32 1e-12, %v2265_v37 }
 0x469   : > { %v2475_v13 = vmul.f32 %v3360_v17, %v4121_v26  ;;  %3369 = vrsqrt.f32 %v2356_v19 }
 0x46a   : > { %2538 = vst [vmem:[%s4314_s13 + $0xc0] sm:$0xff] %v2474_v43  ;;  %3371 = vrsqrt.f32 %v2357_v48  ;;  %v2259_v22 = vpop.xlane.xlu0 %2258 }
 0x46b   : > { %v3362_v5 = vpop.eup %3361  ;;  %2539 = vst [vmem:[%s4314_s13 + $0xc8] sm:$0xff] %v2475_v13  ;;  %v2354_v6 = vadd.f32 1e-12, %v2259_v22  ;;  %v2261_v1 = vpop.xlane.xlu1 %2260 }
 0x46c   : > { %v3364_v46 = vpop.eup %3363  ;;  %v2480_v24 = vmul.f32 %v3362_v5, %v4128_v33  ;;  %v2355_v28 = vadd.f32 1e-12, %v2261_v1 }
 0x46d   : > { %v2481_v25 = vmul.f32 %v3364_v46, %v4133_v38  ;;  %3373 = vrsqrt.f32 %v2354_v6 }
 0x46e   : > { %2544 = vst [vmem:[%s4314_s13 + $0xf0] sm:$0xff] %v2480_v24  ;;  %3375 = vrsqrt.f32 %v2355_v28  ;;  %v2271_v26 = vpop.xlane.xlu0 %2270 }
 0x46f   : > { %v3366_v49 = vpop.eup %3365  ;;  %2545 = vst [vmem:[%s4314_s13 + $0xf8] sm:$0xff] %v2481_v25  ;;  %v2360_v54 = vadd.f32 1e-12, %v2271_v26  ;;  %v2273_v60 = vpop.xlane.xlu1 %2272 }
 0x470   : > { %v3368_v47 = vpop.eup %3367  ;;  %v2478_v51 = vmul.f32 %v3366_v49, %v4138_v42  ;;  %v2361_v61 = vadd.f32 1e-12, %v2273_v60 }
 0x471   : > { %v2479_v33 = vmul.f32 %v3368_v47, %v4141_v44  ;;  %3377 = vrsqrt.f32 %v2360_v54 }
 0x472   : > { %2542 = vst [vmem:[%s4314_s13 + $0xe0] sm:$0xff] %v2478_v51  ;;  %3379 = vrsqrt.f32 %v2361_v61  ;;  %v2267_v38 = vpop.xlane.xlu0 %2266 }
 0x473   : > { %v3370_v3 = vpop.eup %3369  ;;  %2543 = vst [vmem:[%s4314_s13 + $0xe8] sm:$0xff] %v2479_v33  ;;  %v2358_v7 = vadd.f32 1e-12, %v2267_v38  ;;  %v2269_v57 = vpop.xlane.xlu1 %2268 }
 0x474   : > { %v3372_v58 = vpop.eup %3371  ;;  %v2484_v31 = vmul.f32 %v3370_v3, %v4148_v52  ;;  %v2359_v32 = vadd.f32 1e-12, %v2269_v57 }
 0x475   : > { %v2485_v42 = vmul.f32 %v3372_v58, %v4153_v59  ;;  %3381 = vrsqrt.f32 %v2358_v7 }
 0x476   : > { %2548 = vst [vmem:[%s4314_s13 + $0x110] sm:$0xff] %v2484_v31  ;;  %3383 = vrsqrt.f32 %v2359_v32  ;;  %v2279_v44 = vpop.xlane.xlu0 %2278 }
 0x477   : > { %v3374_v12 = vpop.eup %3373  ;;  %2549 = vst [vmem:[%s4314_s13 + $0x118] sm:$0xff] %v2485_v42  ;;  %v2364_v15 = vadd.f32 1e-12, %v2279_v44  ;;  %v2281_v10 = vpop.xlane.xlu1 %2280 }
 0x478   : > { %v3376_v21 = vpop.eup %3375  ;;  %v2482_v62 = vmul.f32 %v3374_v12, %v4158_v63  ;;  %v2365_v4 = vadd.f32 1e-12, %v2281_v10 }
 0x479   : > { %v2483_v52 = vmul.f32 %v3376_v21, %v4161_v0  ;;  %3385 = vrsqrt.f32 %v2364_v15 }
 0x47a   : > { %2546 = vst [vmem:[%s4314_s13 + $0x100] sm:$0xff] %v2482_v62  ;;  %3387 = vrsqrt.f32 %v2365_v4  ;;  %v2275_v59 = vpop.xlane.xlu0 %2274 }
 0x47b   : > { %v3378_v14 = vpop.eup %3377  ;;  %2547 = vst [vmem:[%s4314_s13 + $0x108] sm:$0xff] %v2483_v52  ;;  %v2362_v30 = vadd.f32 1e-12, %v2275_v59  ;;  %v2277_v50 = vpop.xlane.xlu1 %2276  ;;  %v4541_v52 = vld [vmem:[#allocation5_spill] sm:$0xff] }
 0x47c   : > { %v3380_v40 = vpop.eup %3379  ;;  %v2488_v41 = vmul.f32 %v3378_v14, %v4168_v9  ;;  %v2363_v34 = vadd.f32 1e-12, %v2277_v50 }
 0x47d   : > { %v2489_v63 = vmul.f32 %v3380_v40, %v4173_v16  ;;  %3389 = vrsqrt.f32 %v2362_v30  ;;  %v4542_v30 = vld [vmem:[#allocation6_spill] sm:$0xff] }
 0x47e   : > { %2552 = vst [vmem:[%s4314_s13 + $0x130] sm:$0xff] %v2488_v41  ;;  %3391 = vrsqrt.f32 %v2363_v34  ;;  %v2287_v0 = vpop.xlane.xlu0 %2286 }
 0x47f   : > { %v3382_v8 = vpop.eup %3381  ;;  %2553 = vst [vmem:[%s4314_s13 + $0x138] sm:$0xff] %v2489_v63  ;;  %v2368_v20 = vadd.f32 1e-12, %v2287_v0  ;;  %v2289_v18 = vpop.xlane.xlu1 %2288  ;;  %v4543_v63 = vld [vmem:[#allocation7_spill] sm:$0xff] }
 0x480   : > { %v3384_v19 = vpop.eup %3383  ;;  %v2486_v37 = vmul.f32 %v3382_v8, %v4178_v23  ;;  %v2369_v17 = vadd.f32 1e-12, %v2289_v18 }
 0x481   : > { %v2487_v9 = vmul.f32 %v3384_v19, %v4181_v27  ;;  %3393 = vrsqrt.f32 %v2368_v20  ;;  %v4544_v20 = vld [vmem:[#allocation8_spill] sm:$0xff] }
 0x482   : > { %2550 = vst [vmem:[%s4314_s13 + $0x120] sm:$0xff] %v2486_v37  ;;  %3395 = vrsqrt.f32 %v2369_v17  ;;  %v2283_v16 = vpop.xlane.xlu0 %2282 }
 0x483   : > { %v3386_v43 = vpop.eup %3385  ;;  %2551 = vst [vmem:[%s4314_s13 + $0x128] sm:$0xff] %v2487_v9  ;;  %v2366_v48 = vadd.f32 1e-12, %v2283_v16  ;;  %v2285_v13 = vpop.xlane.xlu1 %2284  ;;  %v4545_v16 = vld [vmem:[#allocation9_spill] sm:$0xff] }
 0x484   : > { %v3388_v22 = vpop.eup %3387  ;;  %v2492_v5 = vmul.f32 %v3386_v43, %v4188_v35  ;;  %v2367_v6 = vadd.f32 1e-12, %v2285_v13  ;;  %v4546_v13 = vld [vmem:[#allocation10_spill] sm:$0xff] }
 0x485   : > { %v2493_v23 = vmul.f32 %v3388_v22, %v4193_v45  ;;  %3397 = vrsqrt.f32 %v2366_v48 }
 0x486   : > { %2556 = vst [vmem:[%s4314_s13 + $0x150] sm:$0xff] %v2492_v5  ;;  %3399 = vrsqrt.f32 %v2367_v6  ;;  %v2295_v27 = vpop.xlane.xlu0 %2294 }
 0x487   : > { %v3390_v1 = vpop.eup %3389  ;;  %2557 = vst [vmem:[%s4314_s13 + $0x158] sm:$0xff] %v2493_v23  ;;  %v2372_v46 = vadd.f32 1e-12, %v2295_v27  ;;  %v2297_v24 = vpop.xlane.xlu1 %2296 }
 0x488   : > { %v3392_v28 = vpop.eup %3391  ;;  %v2490_v25 = vmul.f32 %v3390_v1, %v4198_v53  ;;  %v2373_v26 = vadd.f32 1e-12, %v2297_v24 }
 0x489   : > { %v2491_v35 = vmul.f32 %v3392_v28, %v4201_v55  ;;  %3401 = vrsqrt.f32 %v2372_v46  ;;  %v4547_v46 = vld [vmem:[#allocation11_spill] sm:$0xff] }
 0x48a   : > { %2554 = vst [vmem:[%s4314_s13 + $0x140] sm:$0xff] %v2490_v25  ;;  %3403 = vrsqrt.f32 %v2373_v26  ;;  %v2291_v45 = vpop.xlane.xlu0 %2290  ;;  %v4548_v25 = vld [vmem:[#allocation12_spill] sm:$0xff] }
 0x48b   : > { %v3394_v49 = vpop.eup %3393  ;;  %2555 = vst [vmem:[%s4314_s13 + $0x148] sm:$0xff] %v2491_v35  ;;  %v2370_v54 = vadd.f32 1e-12, %v2291_v45  ;;  %v2293_v60 = vpop.xlane.xlu1 %2292 }
 0x48c   : > { %v3396_v47 = vpop.eup %3395  ;;  %v2496_v51 = vmul.f32 %v3394_v49, %v4208_v2  ;;  %v2371_v61 = vadd.f32 1e-12, %v2293_v60 }
 0x48d   : > { %v2497_v53 = vmul.f32 %v3396_v47, %v4213_v11  ;;  %3405 = vrsqrt.f32 %v2370_v54  ;;  %v4549_v54 = vld [vmem:[#allocation13_spill] sm:$0xff]  ;;  %v4550_v47 = vld [vmem:[#allocation14_spill] sm:$0xff] }
 0x48e   : > { %2560 = vst [vmem:[%s4314_s13 + $0x170] sm:$0xff] %v2496_v51  ;;  %3407 = vrsqrt.f32 %v2371_v61  ;;  %v2303_v55 = vpop.xlane.xlu0 %2302 }
 0x48f   : > { %v3398_v33 = vpop.eup %3397  ;;  %2561 = vst [vmem:[%s4314_s13 + $0x178] sm:$0xff] %v2497_v53  ;;  %v2376_v38 = vadd.f32 1e-12, %v2303_v55  ;;  %v2305_v3 = vpop.xlane.xlu1 %2304  ;;  %v4551_v53 = vld [vmem:[#allocation15_spill] sm:$0xff] }
 0x490   : > { %v3400_v7 = vpop.eup %3399  ;;  %v2494_v57 = vmul.f32 %v3398_v33, %v4218_v36  ;;  %v2377_v58 = vadd.f32 1e-12, %v2305_v3 }
 0x491   : > { %v2495_v2 = vmul.f32 %v3400_v7, %v4221_v29  ;;  %3409 = vrsqrt.f32 %v2376_v38  ;;  %v4552_v38 = vld [vmem:[#allocation17_spill] sm:$0xff] }
 0x492   : > { %2558 = vst [vmem:[%s4314_s13 + $0x160] sm:$0xff] %v2494_v57  ;;  %3411 = vrsqrt.f32 %v2377_v58  ;;  %v2299_v11 = vpop.xlane.xlu0 %2298  ;;  %v4553_v57 = vld [vmem:[#allocation16_spill] sm:$0xff] }
 0x493   : > { %v3402_v31 = vpop.eup %3401  ;;  %2559 = vst [vmem:[%s4314_s13 + $0x168] sm:$0xff] %v2495_v2  ;;  %v2374_v32 = vadd.f32 1e-12, %v2299_v11  ;;  %v2301_v42 = vpop.xlane.xlu1 %2300  ;;  %v4554_v11 = vld [vmem:[#allocation18_spill] sm:$0xff] }
 0x494   : > { %v3404_v44 = vpop.eup %3403  ;;  %v2500_v12 = vmul.f32 %v3402_v31, %v4228_v39  ;;  %v2375_v15 = vadd.f32 1e-12, %v2301_v42 }
 0x495   : > { %v2501_v36 = vmul.f32 %v3404_v44, %v4234_v56  ;;  %3413 = vrsqrt.f32 %v2374_v32 }
 0x496   : > { %2564 = vst [vmem:[%s4314_s13 + $0x190] sm:$0xff] %v2500_v12  ;;  %3415 = vrsqrt.f32 %v2375_v15  ;;  %v2311_v29 = vpop.xlane.xlu0 %2310 }
 0x497   : > { %v3406_v10 = vpop.eup %3405  ;;  %2565 = vst [vmem:[%s4314_s13 + $0x198] sm:$0xff] %v2501_v36  ;;  %v2380_v21 = vadd.f32 1e-12, %v2311_v29  ;;  %v2313_v62 = vpop.xlane.xlu1 %2312 }
 0x498   : > { %v3408_v4 = vpop.eup %3407  ;;  %v2498_v59 = vmul.f32 %v3406_v10, %v4541_v52  ;;  %v2381_v14 = vadd.f32 1e-12, %v2313_v62 }
 0x499   : > { %v2499_v39 = vmul.f32 %v3408_v4, %v4542_v30  ;;  %3417 = vrsqrt.f32 %v2380_v21 }
 0x49a   : > { %2562 = vst [vmem:[%s4314_s13 + $0x180] sm:$0xff] %v2498_v59  ;;  %3419 = vrsqrt.f32 %v2381_v14  ;;  %v2307_v56 = vpop.xlane.xlu0 %2306 }
 0x49b   : > { %v3410_v50 = vpop.eup %3409  ;;  %2563 = vst [vmem:[%s4314_s13 + $0x188] sm:$0xff] %v2499_v39  ;;  %v2378_v40 = vadd.f32 1e-12, %v2307_v56  ;;  %v2309_v41 = vpop.xlane.xlu1 %2308 }
 0x49c   : > { %v3412_v34 = vpop.eup %3411  ;;  %v2504_v0 = vmul.f32 %v3410_v50, %v4543_v63  ;;  %v2379_v8 = vadd.f32 1e-12, %v2309_v41 }
 0x49d   : > { %v2505_v18 = vmul.f32 %v3412_v34, %v4544_v20  ;;  %3421 = vrsqrt.f32 %v2378_v40 }
 0x49e   : > { %2568 = vst [vmem:[%s4314_s13 + $0x1b0] sm:$0xff] %v2504_v0  ;;  %3423 = vrsqrt.f32 %v2379_v8  ;;  %v2315_v19 = vpop.xlane.xlu0 %2314 }
 0x49f   : > { %v3414_v37 = vpop.eup %3413  ;;  %2569 = vst [vmem:[%s4314_s13 + $0x1b8] sm:$0xff] %v2505_v18  ;;  %v2382_v17 = vadd.f32 1e-12, %v2315_v19 }
 0x4a0   : > { %v3416_v9 = vpop.eup %3415  ;;  %v2502_v43 = vmul.f32 %v3414_v37, %v4545_v16  ;;  %v2317_v48 = vpop.xlane.xlu1 %2316 }
 0x4a1   : > { %v2503_v22 = vmul.f32 %v3416_v9, %v4546_v13  ;;  %3425 = vrsqrt.f32 %v2382_v17  ;;  %v2383_v5 = vadd.f32 1e-12, %v2317_v48 }
 0x4a2   : > { %2566 = vst [vmem:[%s4314_s13 + $0x1a0] sm:$0xff] %v2502_v43  ;;  %v2319_v6 = vpop.xlane.xlu0 %2318 }
 0x4a3   : > { %v3418_v23 = vpop.eup %3417  ;;  %2567 = vst [vmem:[%s4314_s13 + $0x1a8] sm:$0xff] %v2503_v22  ;;  %3427 = vrsqrt.f32 %v2383_v5  ;;  %v2384_v27 = vadd.f32 1e-12, %v2319_v6 }
 0x4a4   : > { %v3420_v1 = vpop.eup %3419  ;;  %v2508_v24 = vmul.f32 %v3418_v23, %v4547_v46  ;;  %v2321_v28 = vpop.xlane.xlu1 %2320 }
 0x4a5   : > { %v2509_v26 = vmul.f32 %v3420_v1, %v4548_v25  ;;  %3429 = vrsqrt.f32 %v2384_v27  ;;  %v2385_v35 = vadd.f32 1e-12, %v2321_v28 }
 0x4a6   : > { %2572 = vst [vmem:[%s4314_s13 + $0x1d0] sm:$0xff] %v2508_v24 }
 0x4a7   : > { %v3422_v45 = vpop.eup %3421  ;;  %2573 = vst [vmem:[%s4314_s13 + $0x1d8] sm:$0xff] %v2509_v26  ;;  %3431 = vrsqrt.f32 %v2385_v35 }
 0x4a8   : > { %v3424_v49 = vpop.eup %3423  ;;  %v2506_v60 = vmul.f32 %v3422_v45, %v4549_v54 }
 0x4a9   : > { %v2507_v51 = vmul.f32 %v3424_v49, %v4550_v47 }
 0x4aa   : > { %2570 = vst [vmem:[%s4314_s13 + $0x1c0] sm:$0xff] %v2506_v60 }
 0x4ab   : > { %v3426_v61 = vpop.eup %3425  ;;  %2571 = vst [vmem:[%s4314_s13 + $0x1c8] sm:$0xff] %v2507_v51 }
 0x4ac   : > { %v2510_v55 = vmul.f32 %v3426_v61, %v4551_v53 }
 0x4ad   : > { %v3428_v33 = vpop.eup %3427 }
 0x4ae   : > { %2574 = vst [vmem:[%s4314_s13 + $0x1e0] sm:$0xff] %v2510_v55  ;;  %v2511_v3 = vmul.f32 %v3428_v33, %v4552_v38  ;;  %2585 = sbr.rel (!%p3569_p5) target bundleno = 1233 (0x4d1), region = 44 }
 0x4af   : > { %v3430_v7 = vpop.eup %3429 }
 0x4b0   : > { %2575 = vst [vmem:[%s4314_s13 + $0x1e8] sm:$0xff] %v2511_v3  ;;  %v2512_v58 = vmul.f32 %v3430_v7, %v4553_v57 }
 0x4b1   : > { %v3432_v2 = vpop.eup %3431 }
 0x4b2   : > { %2576 = vst [vmem:[%s4314_s13 + $0x1f0] sm:$0xff] %v2512_v58  ;;  %v2513_v31 = vmul.f32 %v3432_v2, %v4554_v11 }
 0x4b4   : > { %2577 = vst [vmem:[%s4314_s13 + $0x1f8] sm:$0xff] %v2513_v31 }
 0x4b5   : > { %s4560_s15 = smov (!%p2588_p11, %s2587_s15), 64 }
 0x4b6   : > { %s4449_s17 = sshll.u32 %s4560_s15, 7 }
 0x4b7   : > { %s2592_s23 = ssub.s32 8192, %s4449_s17 }
 0x4b8   : > { %2593 = vsyncadd %s4444_s14, %s2592_s23  ;;  %p2746_p12 = scmp.ne.s32.totalorder %s4449_s17, 0  ;;  %s2752_s25 = sshll.u32 %s3552_s22, 13 }
 0x4b9   : > { %s4458_s30 = scalar_lea.hbm %s4510_s5, %s2752_s25  ;;  %s2598_s7 = sshll.u32 %s4314_s13, 4  ;;  %s4461_s7 = int_to_ptr.vmem [resolvable:$true] %s2598_s7 }
 0x4ba   : > { %s3434_s6 = scalar_lea.vmem %s4461_s7, %s4449_s17  ;;  %s3498_s8 = smov [#allocation2]  }
 0x4bb   : > { %p3435_p13 = scmp.ne.s32.totalorder %s4461_s7, %s3434_s6  ;;  %s3438_s9 = sshll.u32 %s3498_s8, 4  ;;  %s3439_s9 = int_to_ptr.vmem [resolvable:$false] %s3438_s9 }
 0x4bc   : > { %s3440_s22 = scalar_lea.vmem %s3439_s9, 16384  ;;  %p3441_p2 = scmp.lt.s32.totalorder %s4461_s7, %s3439_s9 }
 0x4bd   : > { %p3436_p0 = pnand %p3435_p13, %p2746_p12  ;;  %p3442_p3 = scmp.lt.s32.totalorder %s3440_s22, %s3434_s6 }
 0x4bf   : > { %p3437_p1 = pneg %p3436_p0  ;;  %p3443_p4 = por %p3442_p3, %p3441_p2 }
 0x4c1   : > { %p3444_p5 = pnand %p3443_p4, %p3437_p1 }
 0x4c3   : > { %3447 = shalt.err (!%p3444_p5)
}
 0x4c4   : > { %s3448_s16 = scalar_lea.hbm %s4458_s30, %s4449_s17  ;;  %s3452_s12 = scalar_lea.hbm %s4510_s5, 16000 }
 0x4c5   : > { %p3449_p7 = scmp.ne.s32.totalorder %s4458_s30, %s3448_s16  ;;  %p3453_p10 = scmp.lt.u32.totalorder %s4458_s30, %s4510_s5 }
 0x4c6   : > { %p3454_p11 = scmp.lt.u32.totalorder %s3452_s12, %s3448_s16  ;;  %p3456_p0 = scmp.lt.u32.totalorder %s3448_s16, %s4458_s30 }
 0x4c7   : > { %p3450_p8 = pnand %p3449_p7, %p2746_p12 }
 0x4c8   : > { %p3455_p13 = por %p3454_p11, %p3453_p10 }
 0x4c9   : > { %p3451_p9 = pneg %p3450_p8 }
 0x4ca   : > { %p3457_p1 = por %p3456_p0, %p3455_p13 }
 0x4cc   : > { %p3458_p2 = pnand %p3457_p1, %p3451_p9 }
 0x4ce   : > { %3461 = shalt.err (!%p3458_p2)
}
 0x4cf   : > { %s3499_s23 = smov 128   ;;  %s3500_s25 = smov 8  }
 0x4d0   : > { %2604 = dma.vmem_to_hbm [thread:$0]  (%p2746_p12), %s4461_s7, %s4449_s17, %s4458_s30, %s4444_s14, %s3499_s23, %s3499_s23, %s3500_s25  }
 0x4d1 PF: > { %p3242_p3 = scmp.ge.s32.totalorder %s3496_s21, 2  ;;  %s2613_s26 = sand.u32 1, %s3484_s18  }
 0x4d2   : > { %s2614_s28 = scalar_lea.sflag [#allocation3], %s2613_s26 }
 0x4d3   : > { %p3239_p4 = pnand %p3242_p3, %p3573_p6 }
 0x4d5   : > { %3479 = dma.done.wait (!%p3239_p4), %s2614_s28, 8192  }
 0x4d6   : > { %3481 = vsyncadd (!%p3239_p4), %s2614_s28, 4294959104  ;;  %p15_p5 = scmp.ge.s32.totalorder %s3556_s24, 4   ;;  %s4555_s18 = smov %s3488_s19 }
 0x4d7   : > { %s4556_s19 = smov %s3492_s20  ;;  %s4557_s20 = smov %s3567_s27 }
 0x4d8   : > { %s4558_s21 = smov %s3556_s24  ;;  %17 = sbr.rel (!%p15_p5) target bundleno = 3 (0x3), region = 76 }
 0x4df   :  { %2619 = vsyncpa [#allocation3], 1 }
 0x4e0   :  { %2621 = vsyncpa [#allocation3 + $0x1], 1 }

</bundles_post_ra>
